<compile_context>
chip_gen: v7x
topology: tpu7x:2x2x1
jax: 0.10.0
libtpu: 0.0.40
codegen_flags: <defaults>
</compile_context>

<pallas_src>
import jax
import jax.numpy as jnp
from jax.experimental import pallas as pl
from jax.experimental.pallas import tpu as pltpu


def _round_up(x, m):
    return (x + m - 1) // m * m


def _chunked_time_loop(T, Bt, body, rows_target=512):
    """Run body(t0, n_steps) over t in [0, T), chunked so each call sees ~rows_target rows."""
    ch = max(1, min(T, rows_target // max(Bt, 1)))
    n_full = T // ch
    rem = T - n_full * ch
    if n_full == 1:
        body(0, ch)                      # static offsets for the common single-chunk case
    elif n_full > 1:
        def loop(c, carry):
            body(c * ch, ch)
            return carry
        jax.lax.fori_loop(0, n_full, loop, 0)
    if rem:
        body(n_full * ch, rem)


def _bilstm_kernel(x_ref, wih_ref, b_ref, whh_f_ref, whh_b_ref, wl_ref, bl_ref,
                   out_ref, gxf_ref, gxb_ref, rec_ref):
    T, Bt, D = x_ref.shape
    Hp = whh_f_ref.shape[0]
    G = 4 * Hp
    Op = out_ref.shape[-1]

    wih = wih_ref[...]          # [D, 8Hp]  (fwd gates | bwd gates), gate order (i, f, o, g)
    b = b_ref[...]              # [1, 8Hp]  f32
    whh_f = whh_f_ref[...]      # [Hp, 4Hp]
    whh_b = whh_b_ref[...]      # [Hp, 4Hp]

    # ---- Stage 1: input projection for both directions, hoisted off the serial chain and
    # flattened into a few large-M matmuls ([chunk*Bt, D] @ [D, 8Hp]). ----
    def proj(t0, n):
        rows = x_ref[pl.ds(t0, n)].reshape(n * Bt, D)   # leading-dim collapse: free (Bt % 8 == 0)
        g = jnp.dot(rows, wih, preferred_element_type=jnp.float32) + b
        gxf_ref[pl.ds(t0, n)] = g[:, :G].reshape(n, Bt, G).astype(gxf_ref.dtype)
        gxb_ref[pl.ds(t0, n)] = g[:, G:].reshape(n, Bt, G).astype(gxb_ref.dtype)
    _chunked_time_loop(T, Bt, proj)

    # ---- Stage 2: merged forward/backward recurrence (two independent chains per step). ----
    def cell(gates, h, c, whh):
        gates = gates + jnp.dot(h.astype(whh.dtype), whh,
                                preferred_element_type=jnp.float32)
        sg = jax.nn.sigmoid(gates[:, :3 * Hp])          # one sigmoid over (i, f, o)
        i = sg[:, 0 * Hp:1 * Hp]
        f = sg[:, 1 * Hp:2 * Hp]
        o = sg[:, 2 * Hp:3 * Hp]
        g = jnp.tanh(gates[:, 3 * Hp:])
        c_new = f * c + i * g
        h_new = o * jnp.tanh(c_new)
        return h_new, c_new

    def step(s, carry):
        h_f, c_f, h_b, c_b = carry
        tb = T - 1 - s
        h_f, c_f = cell(gxf_ref[s], h_f, c_f, whh_f)    # only the fwd half is loaded
        h_b, c_b = cell(gxb_ref[tb], h_b, c_b, whh_b)   # only the bwd half is loaded
        rec_ref[s, :, 0:Hp] = h_f.astype(rec_ref.dtype)        # 128-lane-aligned, unmasked
        rec_ref[tb, :, Hp:2 * Hp] = h_b.astype(rec_ref.dtype)  # 128-lane-aligned, unmasked
        return h_f, c_f, h_b, c_b

    z = jnp.zeros((Bt, Hp), jnp.float32)
    # unroll=1: four [Bt, Hp] f32 carries already stress the 64-vreg file at large Bt.
    jax.lax.fori_loop(0, T, step, (z, z, z, z))

    # ---- Stage 3: final Linear over the merged rec buffer as large-M matmuls
    # ([chunk*Bt, 2Hp] @ [2Hp, Op]; K = 2Hp fills the v6e/v7x 256-deep MXU). ----
    wl = wl_ref[...]            # [2Hp, Op] = stacked (fwd ; bwd) Linear weight
    bl = bl_ref[...]            # [1, Op]
    def lin(t0, n):
        rows = rec_ref[pl.ds(t0, n)].reshape(n * Bt, 2 * Hp)
        y = jnp.dot(rows, wl, preferred_element_type=jnp.float32) + bl
        out_ref[pl.ds(t0, n)] = y.reshape(n, Bt, Op).astype(out_ref.dtype)
    _chunked_time_loop(T, Bt, lin)


def _prep_params(p, H, O, Hp, Op, w_dtype):
    """Reorder PyTorch gates (i,f,g,o)->(i,f,o,g), zero-pad H->Hp / O->Op, fuse fwd/bwd."""
    def reorder_pad(w):
        blocks = (w[..., 0:H], w[..., H:2 * H], w[..., 3 * H:4 * H], w[..., 2 * H:3 * H])
        pad = [(0, 0)] * (w.ndim - 1) + [(0, Hp - H)]
        return jnp.concatenate([jnp.pad(blk, pad) for blk in blocks], axis=-1)

    wih = jnp.concatenate([reorder_pad(p["wih_f"]), reorder_pad(p["wih_b"])], axis=-1)  # [D, 8Hp]
    b = jnp.concatenate([reorder_pad(p["b_f"]), reorder_pad(p["b_b"])], axis=-1)        # [1, 8Hp]
    whh_f = jnp.pad(reorder_pad(p["whh_f"]), ((0, Hp - H), (0, 0)))                     # [Hp, 4Hp]
    whh_b = jnp.pad(reorder_pad(p["whh_b"]), ((0, Hp - H), (0, 0)))                     # [Hp, 4Hp]
    wl = jnp.concatenate([                                                              # [2Hp, Op]
        jnp.pad(p["wlin"][:H], ((0, Hp - H), (0, Op - O))),
        jnp.pad(p["wlin"][H:], ((0, Hp - H), (0, Op - O)))], axis=0)
    blin = jnp.pad(p["blin"], ((0, 0), (0, Op - O)))                                    # [1, Op]
    return (wih.astype(w_dtype), b.astype(jnp.float32),
            whh_f.astype(w_dtype), whh_b.astype(w_dtype),
            wl.astype(w_dtype), blin.astype(jnp.float32))


def _vmem_capacity_bytes():
    try:
        cap = getattr(pltpu.get_tpu_info(), "vmem_capacity_bytes", None)
        if cap:
            return int(cap)
    except Exception:
        pass
    return 128 * 1024 * 1024      # v5e/v6e default


def _pick_batch_tile(B, T, D, Hp, Op, weight_bytes, elem_bytes, vmem_cap):
    """Largest sublane-aligned batch tile fitting a generation-aware VMEM budget."""
    is_small_vmem = vmem_cap <= 96 * 1024 * 1024               # v7x: 64 MiB per TensorCore
    budget = (44 if is_small_vmem else 96) * 1024 * 1024       # v5e/v6e: 128 MiB VMEM
    avail = max(budget - 2 * weight_bytes, 0)                  # weights, worst-case double-buffered
    # bytes per batch row: double-buffered x/out tiles + gx_f/gx_b + merged rec scratch
    per_row = T * (2 * elem_bytes * D + 2 * 4 * Op + elem_bytes * (8 * Hp + 2 * Hp))
    bt = int(avail // max(per_row, 1))
    bt = min(bt, 1024)
    if is_small_vmem and B >= 16:
        # keep >= 2 grid tiles so both v7x TensorCores get work
        bt = min(bt, _round_up((B + 1) // 2, 8))
    if bt >= B:
        return B
    return max(8, bt // 8 * 8)


def bidirectional_lstm(x, p, *, batch_tile=None, store_dtype=jnp.float32):
    """Forward pass of BidirectionalLSTM: x [B, T, D] -> [B, T, O].

    store_dtype: dtype for streamed activations/weights (x, wih, whh, wl, gx/rec scratch);
    carries and all matmul accumulation stay f32.  Default f32 for bit-tight parity with the
    reference; jnp.bfloat16 ~doubles MXU throughput and halves VMEM (tolerance ~1e-2).
    """
    B, T, D = x.shape
    H = p["whh_f"].shape[0]
    O = p["wlin"].shape[1]
    # NOTE: design targets H >= 128.  For H < 128 the per-gate padding to Hp multiplies the
    # recurrence (MXU/EUP/VPU) work by Hp/H; correctness is unaffected.
    # TODO(synk): packed-4H gate layout (pad only the full gate vector to 128) for H < 128.
    Hp = _round_up(H, 128)        # lane-align each gate block
    Op = _round_up(O, 128)        # lane-dense output stores (HBM writes inflate by Op/O)

    weights = _prep_params(p, H, O, Hp, Op, store_dtype)
    weight_bytes = sum(int(w.size) * w.dtype.itemsize for w in weights)
    elem_bytes = jnp.dtype(store_dtype).itemsize

    B_pad = _round_up(B, 8)       # sublane-align batch so leading-dim flattens are free
    vmem_cap = _vmem_capacity_bytes()
    bt = batch_tile if batch_tile is not None else _pick_batch_tile(
        B_pad, T, D, Hp, Op, weight_bytes, elem_bytes, vmem_cap)
    grid = (pl.cdiv(B_pad, bt),)
    vmem_limit = (56 if vmem_cap <= 96 * 1024 * 1024 else 108) * 1024 * 1024

    # time-major [T, B_pad, D]; the pad/swapaxes is one extra HBM round-trip of the input.
    x_tm = jnp.swapaxes(jnp.pad(x, ((0, B_pad - B), (0, 0), (0, 0))), 0, 1).astype(store_dtype)

    def w_spec(a, single_buffer):
        nd = a.ndim
        idx = lambda bi: (0,) * nd
        if single_buffer:
            # constant index map -> no refetch needed; avoid the 2x weight VMEM footprint
            return pl.BlockSpec(a.shape, idx, pipeline_mode=pl.Buffered(1))
        return pl.BlockSpec(a.shape, idx)

    def call(single_buffer_weights):
        return pl.pallas_call(
            _bilstm_kernel,
            out_shape=jax.ShapeDtypeStruct((T, B_pad, Op), jnp.float32),
            grid=grid,
            in_specs=[pl.BlockSpec((T, bt, D), lambda bi: (0, bi, 0))]
                     + [w_spec(w, single_buffer_weights) for w in weights],
            out_specs=pl.BlockSpec((T, bt, Op), lambda bi: (0, bi, 0)),
            scratch_shapes=[
                pltpu.VMEM((T, bt, 4 * Hp), store_dtype),   # fwd input-projected gates
                pltpu.VMEM((T, bt, 4 * Hp), store_dtype),   # bwd input-projected gates
                pltpu.VMEM((T, bt, 2 * Hp), store_dtype),   # merged hidden states (fwd | bwd)
            ],
            compiler_params=pltpu.CompilerParams(
                dimension_semantics=("parallel",),
                vmem_limit_bytes=vmem_limit),
        )(x_tm, *weights)

    try:
        out_tm = call(True)
    except Exception:   # pipeline_mode=Buffered(1) unsupported -> fall back to default buffering
        out_tm = call(False)

    # TODO(synk): for very long T the all-T-resident gx/rec scratch forces small batch tiles
    # (esp. on v7x's 64 MiB VMEM); a time-chunked restructure with carried h/c would fix that.
    return jnp.swapaxes(out_tm[:, :B, :O], 0, 1)            # [B, T, O]


def make_params(key, D, H, O):
    """Deterministic synthetic parameters, shaped like nn.LSTM / nn.Linear init."""
    ks = jax.random.split(key, 10)
    kH = 1.0 / float(jnp.sqrt(H))
    kL = 1.0 / float(jnp.sqrt(2 * H))
    u = lambda k, shape, s: jax.random.uniform(k, shape, jnp.float32, -s, s)
    return dict(
        # PyTorch stores weight_ih [4H, D], weight_hh [4H, H]; transpose for right-multiply.
        wih_f=u(ks[0], (4 * H, D), kH).T,
        whh_f=u(ks[1], (4 * H, H), kH).T,
        b_f=(u(ks[2], (4 * H,), kH) + u(ks[3], (4 * H,), kH))[None, :],
        wih_b=u(ks[4], (4 * H, D), kH).T,
        whh_b=u(ks[5], (4 * H, H), kH).T,
        b_b=(u(ks[6], (4 * H,), kH) + u(ks[7], (4 * H,), kH))[None, :],
        wlin=u(ks[8], (O, 2 * H), kL).T,
        blin=u(ks[9], (O,), kL)[None, :],
    )


def reference(x, p):
    """Pure-JAX reference of the PyTorch BidirectionalLSTM forward."""
    B, T, _ = x.shape
    H = p["whh_f"].shape[0]

    def run(wih, whh, b, xs):
        def step(carry, x_t):
            h, c = carry
            gates = x_t @ wih + h @ whh + b[0]
            i = jax.nn.sigmoid(gates[:, :H])
            f = jax.nn.sigmoid(gates[:, H:2 * H])
            g = jnp.tanh(gates[:, 2 * H:3 * H])
            o = jax.nn.sigmoid(gates[:, 3 * H:])
            c = f * c + i * g
            h = o * jnp.tanh(c)
            return (h, c), h
        init = (jnp.zeros((B, H), jnp.float32), jnp.zeros((B, H), jnp.float32))
        _, hs = jax.lax.scan(step, init, xs)
        return hs  # [T, B, H]

    xs = jnp.swapaxes(x, 0, 1)
    hf = run(p["wih_f"], p["whh_f"], p["b_f"], xs)
    hb = run(p["wih_b"], p["whh_b"], p["b_b"], xs[::-1])[::-1]
    rec = jnp.swapaxes(jnp.concatenate([hf, hb], axis=-1), 0, 1)  # [B, T, 2H]
    return rec @ p["wlin"] + p["blin"][0]


if __name__ == "__main__":
    B, T, D, H, O = 2, 8, 16, 32, 16

    key = jax.random.PRNGKey(0)
    kx, kp = jax.random.split(key)
    x = jax.random.normal(kx, (B, T, D), jnp.float32)
    params = make_params(kp, D, H, O)

    out = jax.block_until_ready(bidirectional_lstm(x, params))
    assert out.shape == (B, T, O), out.shape

    ref = jax.block_until_ready(reference(x, params))
    assert jnp.allclose(out, ref, atol=1e-3, rtol=1e-3), float(jnp.max(jnp.abs(out - ref)))

    print("KERNEL_OK")
</pallas_src>

<mosaic_0001>
module attributes {stable_mosaic.version = 11 : i64} {
  func.func @_bilstm_kernel(%arg0: i32, %arg1: memref<8x8x16xf32, #tpu.memory_space<vmem>>, %arg2: memref<16x1024xf32, #tpu.memory_space<vmem>>, %arg3: memref<1x1024xf32, #tpu.memory_space<vmem>>, %arg4: memref<128x512xf32, #tpu.memory_space<vmem>>, %arg5: memref<128x512xf32, #tpu.memory_space<vmem>>, %arg6: memref<256x128xf32, #tpu.memory_space<vmem>>, %arg7: memref<1x128xf32, #tpu.memory_space<vmem>>, %arg8: memref<8x8x128xf32, #tpu.memory_space<vmem>>, %arg9: memref<8x8x512xf32, #tpu.memory_space<vmem>>, %arg10: memref<8x8x512xf32, #tpu.memory_space<vmem>>, %arg11: memref<8x8x256xf32, #tpu.memory_space<vmem>>) attributes {dimension_semantics = [#tpu.dimension_semantics<parallel>], iteration_bounds = array<i64: 1>, scalar_prefetch = 0 : i64, scratch_operands = 3 : i64, tpu.core_type = #tpu.core_type<tc>, window_params = [{transform_indices = @transform_0, window_bounds = array<i64: 8, 8, 16>}, {pipeline_mode = #tpu.pipeline_mode<synchronous>, transform_indices = @transform_1, window_bounds = array<i64: 16, 1024>}, {pipeline_mode = #tpu.pipeline_mode<synchronous>, transform_indices = @transform_2, window_bounds = array<i64: 1, 1024>}, {pipeline_mode = #tpu.pipeline_mode<synchronous>, transform_indices = @transform_3, window_bounds = array<i64: 128, 512>}, {pipeline_mode = #tpu.pipeline_mode<synchronous>, transform_indices = @transform_4, window_bounds = array<i64: 128, 512>}, {pipeline_mode = #tpu.pipeline_mode<synchronous>, transform_indices = @transform_5, window_bounds = array<i64: 256, 128>}, {pipeline_mode = #tpu.pipeline_mode<synchronous>, transform_indices = @transform_6, window_bounds = array<i64: 1, 128>}, {transform_indices = @transform_7, window_bounds = array<i64: 8, 8, 128>}]} {
    %c0 = arith.constant 0 : index
    %c0_0 = arith.constant 0 : index
    %0 = vector.load %arg2[%c0, %c0_0] : memref<16x1024xf32, #tpu.memory_space<vmem>>, vector<16x1024xf32>
    %c0_1 = arith.constant 0 : index
    %c0_2 = arith.constant 0 : index
    %1 = vector.load %arg3[%c0_1, %c0_2] : memref<1x1024xf32, #tpu.memory_space<vmem>>, vector<1x1024xf32>
    %c0_3 = arith.constant 0 : index
    %c0_4 = arith.constant 0 : index
    %2 = vector.load %arg4[%c0_3, %c0_4] : memref<128x512xf32, #tpu.memory_space<vmem>>, vector<128x512xf32>
    %c0_5 = arith.constant 0 : index
    %c0_6 = arith.constant 0 : index
    %3 = vector.load %arg5[%c0_5, %c0_6] : memref<128x512xf32, #tpu.memory_space<vmem>>, vector<128x512xf32>
    %c0_7 = arith.constant 0 : index
    %c0_8 = arith.constant 0 : index
    %c0_9 = arith.constant 0 : index
    %4 = vector.load %arg1[%c0_7, %c0_8, %c0_9] : memref<8x8x16xf32, #tpu.memory_space<vmem>>, vector<8x8x16xf32>
    %5 = vector.shape_cast %4 : vector<8x8x16xf32> to vector<64x16xf32>
    %cst = arith.constant dense<0.000000e+00> : vector<64x1024xf32>
    %6 = tpu.matmul %5, %0, %cst {dimension_numbers = #tpu.dot_dimension_numbers<[1], [0], [0], [1], [0, 0, 1, 1], [], []>} : vector<64x16xf32>, vector<16x1024xf32>, vector<64x1024xf32> -> vector<64x1024xf32>
    %7 = vector.broadcast %1 : vector<1x1024xf32> to vector<64x1024xf32>
    %8 = arith.addf %6, %7 : vector<64x1024xf32>
    %9 = vector.extract_strided_slice %8 {offsets = [0, 0], sizes = [64, 512], strides = [1, 1]} : vector<64x1024xf32> to vector<64x512xf32>
    %10 = vector.shape_cast %9 : vector<64x512xf32> to vector<8x8x512xf32>
    %c0_10 = arith.constant 0 : index
    %c0_11 = arith.constant 0 : index
    %c0_12 = arith.constant 0 : index
    %11 = vector.load %arg9[%c0_10, %c0_11, %c0_12] : memref<8x8x512xf32, #tpu.memory_space<vmem>>, vector<8x8x512xf32>
    tpu.vector_store %arg9[%c0_10, %c0_11, %c0_12], %10 {strides = array<i32>} : memref<8x8x512xf32, #tpu.memory_space<vmem>>, vector<8x8x512xf32>,
    %12 = vector.extract_strided_slice %8 {offsets = [0, 512], sizes = [64, 512], strides = [1, 1]} : vector<64x1024xf32> to vector<64x512xf32>
    %13 = vector.shape_cast %12 : vector<64x512xf32> to vector<8x8x512xf32>
    %c0_13 = arith.constant 0 : index
    %c0_14 = arith.constant 0 : index
    %c0_15 = arith.constant 0 : index
    %14 = vector.load %arg10[%c0_13, %c0_14, %c0_15] : memref<8x8x512xf32, #tpu.memory_space<vmem>>, vector<8x8x512xf32>
    tpu.vector_store %arg10[%c0_13, %c0_14, %c0_15], %13 {strides = array<i32>} : memref<8x8x512xf32, #tpu.memory_space<vmem>>, vector<8x8x512xf32>,
    %cst_16 = arith.constant 0.000000e+00 : f32
    %15 = vector.broadcast %cst_16 : f32 to vector<8x128xf32>
    %c0_i32 = arith.constant 0 : i32
    %c8_i32 = arith.constant 8 : i32
    %16 = arith.addi %c0_i32, %c8_i32 : i32
    %c1_i32 = arith.constant 1 : i32
    %17:4 = scf.for %arg12 = %c0_i32 to %16 step %c1_i32 iter_args(%arg13 = %15, %arg14 = %15, %arg15 = %15, %arg16 = %15) -> (vector<8x128xf32>, vector<8x128xf32>, vector<8x128xf32>, vector<8x128xf32>)  : i32 {
      %c7_i32 = arith.constant 7 : i32
      %27 = arith.subi %c7_i32, %arg12 : i32
      %28 = arith.index_cast %arg12 : i32 to index
      %c0_29 = arith.constant 0 : index
      %c0_30 = arith.constant 0 : index
      %29 = vector.load %arg9[%28, %c0_29, %c0_30] : memref<8x8x512xf32, #tpu.memory_space<vmem>>, vector<1x8x512xf32>
      %30 = vector.shape_cast %29 : vector<1x8x512xf32> to vector<8x512xf32>
      %cst_31 = arith.constant dense<0.000000e+00> : vector<8x512xf32>
      %31 = tpu.matmul %arg13, %2, %cst_31 {dimension_numbers = #tpu.dot_dimension_numbers<[1], [0], [0], [1], [0, 0, 1, 1], [], []>} : vector<8x128xf32>, vector<128x512xf32>, vector<8x512xf32> -> vector<8x512xf32>
      %32 = arith.addf %30, %31 : vector<8x512xf32>
      %33 = vector.extract_strided_slice %32 {offsets = [0, 0], sizes = [8, 384], strides = [1, 1]} : vector<8x512xf32> to vector<8x384xf32>
      %34 = arith.negf %33 : vector<8x384xf32>
      %35 = math.exp %34 : vector<8x384xf32>
      %cst_32 = arith.constant 1.000000e+00 : f32
      %36 = vector.broadcast %cst_32 : f32 to vector<8x384xf32>
      %37 = arith.addf %36, %35 : vector<8x384xf32>
      %38 = arith.divf %36, %37 : vector<8x384xf32>
      %39 = vector.extract_strided_slice %38 {offsets = [0, 0], sizes = [8, 128], strides = [1, 1]} : vector<8x384xf32> to vector<8x128xf32>
      %40 = vector.extract_strided_slice %38 {offsets = [0, 128], sizes = [8, 128], strides = [1, 1]} : vector<8x384xf32> to vector<8x128xf32>
      %41 = vector.extract_strided_slice %38 {offsets = [0, 256], sizes = [8, 128], strides = [1, 1]} : vector<8x384xf32> to vector<8x128xf32>
      %42 = vector.extract_strided_slice %32 {offsets = [0, 384], sizes = [8, 128], strides = [1, 1]} : vector<8x512xf32> to vector<8x128xf32>
      %43 = math.tanh %42 : vector<8x128xf32>
      %44 = arith.mulf %40, %arg14 : vector<8x128xf32>
      %45 = arith.mulf %39, %43 : vector<8x128xf32>
      %46 = arith.addf %44, %45 : vector<8x128xf32>
      %47 = math.tanh %46 : vector<8x128xf32>
      %48 = arith.mulf %41, %47 : vector<8x128xf32>
      %49 = arith.index_cast %27 : i32 to index
      %c0_33 = arith.constant 0 : index
      %c0_34 = arith.constant 0 : index
      %50 = vector.load %arg10[%49, %c0_33, %c0_34] : memref<8x8x512xf32, #tpu.memory_space<vmem>>, vector<1x8x512xf32>
      %51 = vector.shape_cast %50 : vector<1x8x512xf32> to vector<8x512xf32>
      %cst_35 = arith.constant dense<0.000000e+00> : vector<8x512xf32>
      %52 = tpu.matmul %arg15, %3, %cst_35 {dimension_numbers = #tpu.dot_dimension_numbers<[1], [0], [0], [1], [0, 0, 1, 1], [], []>} : vector<8x128xf32>, vector<128x512xf32>, vector<8x512xf32> -> vector<8x512xf32>
      %53 = arith.addf %51, %52 : vector<8x512xf32>
      %54 = vector.extract_strided_slice %53 {offsets = [0, 0], sizes = [8, 384], strides = [1, 1]} : vector<8x512xf32> to vector<8x384xf32>
      %55 = arith.negf %54 : vector<8x384xf32>
      %56 = math.exp %55 : vector<8x384xf32>
      %cst_36 = arith.constant 1.000000e+00 : f32
      %57 = vector.broadcast %cst_36 : f32 to vector<8x384xf32>
      %58 = arith.addf %57, %56 : vector<8x384xf32>
      %59 = arith.divf %57, %58 : vector<8x384xf32>
      %60 = vector.extract_strided_slice %59 {offsets = [0, 0], sizes = [8, 128], strides = [1, 1]} : vector<8x384xf32> to vector<8x128xf32>
      %61 = vector.extract_strided_slice %59 {offsets = [0, 128], sizes = [8, 128], strides = [1, 1]} : vector<8x384xf32> to vector<8x128xf32>
      %62 = vector.extract_strided_slice %59 {offsets = [0, 256], sizes = [8, 128], strides = [1, 1]} : vector<8x384xf32> to vector<8x128xf32>
      %63 = vector.extract_strided_slice %53 {offsets = [0, 384], sizes = [8, 128], strides = [1, 1]} : vector<8x512xf32> to vector<8x128xf32>
      %64 = math.tanh %63 : vector<8x128xf32>
      %65 = arith.mulf %61, %arg16 : vector<8x128xf32>
      %66 = arith.mulf %60, %64 : vector<8x128xf32>
      %67 = arith.addf %65, %66 : vector<8x128xf32>
      %68 = math.tanh %67 : vector<8x128xf32>
      %69 = arith.mulf %62, %68 : vector<8x128xf32>
      %70 = arith.index_cast %arg12 : i32 to index
      %c0_37 = arith.constant 0 : index
      %c0_38 = arith.constant 0 : index
      %71 = vector.load %arg11[%70, %c0_37, %c0_38] : memref<8x8x256xf32, #tpu.memory_space<vmem>>, vector<1x8x128xf32>
      %72 = vector.shape_cast %71 : vector<1x8x128xf32> to vector<8x128xf32>
      %73 = vector.shape_cast %48 : vector<8x128xf32> to vector<1x8x128xf32>
      tpu.vector_store %arg11[%70, %c0_37, %c0_38], %73 {strides = array<i32>} : memref<8x8x256xf32, #tpu.memory_space<vmem>>, vector<1x8x128xf32>,
      %74 = arith.index_cast %27 : i32 to index
      %c0_39 = arith.constant 0 : index
      %c128 = arith.constant 128 : index
      %75 = vector.load %arg11[%74, %c0_39, %c128] : memref<8x8x256xf32, #tpu.memory_space<vmem>>, vector<1x8x128xf32>
      %76 = vector.shape_cast %75 : vector<1x8x128xf32> to vector<8x128xf32>
      %77 = vector.shape_cast %69 : vector<8x128xf32> to vector<1x8x128xf32>
      tpu.vector_store %arg11[%74, %c0_39, %c128], %77 {strides = array<i32>} : memref<8x8x256xf32, #tpu.memory_space<vmem>>, vector<1x8x128xf32>,
      scf.yield %48, %46, %69, %67 : vector<8x128xf32>, vector<8x128xf32>, vector<8x128xf32>, vector<8x128xf32>
    }
    %c8_i32_17 = arith.constant 8 : i32
    %c0_18 = arith.constant 0 : index
    %c0_19 = arith.constant 0 : index
    %18 = vector.load %arg6[%c0_18, %c0_19] : memref<256x128xf32, #tpu.memory_space<vmem>>, vector<256x128xf32>
    %c0_20 = arith.constant 0 : index
    %c0_21 = arith.constant 0 : index
    %19 = vector.load %arg7[%c0_20, %c0_21] : memref<1x128xf32, #tpu.memory_space<vmem>>, vector<1x128xf32>
    %c0_22 = arith.constant 0 : index
    %c0_23 = arith.constant 0 : index
    %c0_24 = arith.constant 0 : index
    %20 = vector.load %arg11[%c0_22, %c0_23, %c0_24] : memref<8x8x256xf32, #tpu.memory_space<vmem>>, vector<8x8x256xf32>
    %21 = vector.shape_cast %20 : vector<8x8x256xf32> to vector<64x256xf32>
    %cst_25 = arith.constant dense<0.000000e+00> : vector<64x128xf32>
    %22 = tpu.matmul %21, %18, %cst_25 {dimension_numbers = #tpu.dot_dimension_numbers<[1], [0], [0], [1], [0, 0, 1, 1], [], []>} : vector<64x256xf32>, vector<256x128xf32>, vector<64x128xf32> -> vector<64x128xf32>
    %23 = vector.broadcast %19 : vector<1x128xf32> to vector<64x128xf32>
    %24 = arith.addf %22, %23 : vector<64x128xf32>
    %25 = vector.shape_cast %24 : vector<64x128xf32> to vector<8x8x128xf32>
    %c0_26 = arith.constant 0 : index
    %c0_27 = arith.constant 0 : index
    %c0_28 = arith.constant 0 : index
    %26 = vector.load %arg8[%c0_26, %c0_27, %c0_28] : memref<8x8x128xf32, #tpu.memory_space<vmem>>, vector<8x8x128xf32>
    tpu.vector_store %arg8[%c0_26, %c0_27, %c0_28], %25 {strides = array<i32>} : memref<8x8x128xf32, #tpu.memory_space<vmem>>, vector<8x8x128xf32>,
    return
  }
  func.func @transform_0(%arg0: i32) -> (i32, i32, i32) {
    %c0_i32 = arith.constant 0 : i32
    %c0_i32_0 = arith.constant 0 : i32
    %c0_i32_1 = arith.constant 0 : i32
    return %c0_i32, %arg0, %c0_i32_0 : i32, i32, i32
  }
  func.func @transform_1(%arg0: i32) -> (i32, i32) {
    %c0_i32 = arith.constant 0 : i32
    %c0_i32_0 = arith.constant 0 : i32
    %c0_i32_1 = arith.constant 0 : i32
    return %c0_i32, %c0_i32_0 : i32, i32
  }
  func.func @transform_2(%arg0: i32) -> (i32, i32) {
    %c0_i32 = arith.constant 0 : i32
    %c0_i32_0 = arith.constant 0 : i32
    %c0_i32_1 = arith.constant 0 : i32
    return %c0_i32, %c0_i32_0 : i32, i32
  }
  func.func @transform_3(%arg0: i32) -> (i32, i32) {
    %c0_i32 = arith.constant 0 : i32
    %c0_i32_0 = arith.constant 0 : i32
    %c0_i32_1 = arith.constant 0 : i32
    return %c0_i32, %c0_i32_0 : i32, i32
  }
  func.func @transform_4(%arg0: i32) -> (i32, i32) {
    %c0_i32 = arith.constant 0 : i32
    %c0_i32_0 = arith.constant 0 : i32
    %c0_i32_1 = arith.constant 0 : i32
    return %c0_i32, %c0_i32_0 : i32, i32
  }
  func.func @transform_5(%arg0: i32) -> (i32, i32) {
    %c0_i32 = arith.constant 0 : i32
    %c0_i32_0 = arith.constant 0 : i32
    %c0_i32_1 = arith.constant 0 : i32
    return %c0_i32, %c0_i32_0 : i32, i32
  }
  func.func @transform_6(%arg0: i32) -> (i32, i32) {
    %c0_i32 = arith.constant 0 : i32
    %c0_i32_0 = arith.constant 0 : i32
    %c0_i32_1 = arith.constant 0 : i32
    return %c0_i32, %c0_i32_0 : i32, i32
  }
  func.func @transform_7(%arg0: i32) -> (i32, i32, i32) {
    %c0_i32 = arith.constant 0 : i32
    %c0_i32_0 = arith.constant 0 : i32
    %c0_i32_1 = arith.constant 0 : i32
    return %c0_i32, %arg0, %c0_i32_0 : i32, i32, i32
  }
}

module attributes {stable_mosaic.version = 11 : i64} {
  func.func @_bilstm_kernel(%arg0: i32, %arg1: memref<8x8x16xf32, #tpu.memory_space<vmem>>, %arg2: memref<16x1024xf32, #tpu.memory_space<vmem>>, %arg3: memref<1x1024xf32, #tpu.memory_space<vmem>>, %arg4: memref<128x512xf32, #tpu.memory_space<vmem>>, %arg5: memref<128x512xf32, #tpu.memory_space<vmem>>, %arg6: memref<256x128xf32, #tpu.memory_space<vmem>>, %arg7: memref<1x128xf32, #tpu.memory_space<vmem>>, %arg8: memref<8x8x128xf32, #tpu.memory_space<vmem>>, %arg9: memref<8x8x512xf32, #tpu.memory_space<vmem>>, %arg10: memref<8x8x512xf32, #tpu.memory_space<vmem>>, %arg11: memref<8x8x256xf32, #tpu.memory_space<vmem>>) attributes {dimension_semantics = [#tpu.dimension_semantics<parallel>], iteration_bounds = array<i64: 1>, scalar_prefetch = 0 : i64, scratch_operands = 3 : i64, tpu.core_type = #tpu.core_type<tc>, window_params = [{transform_indices = @transform_0, window_bounds = array<i64: 8, 8, 16>}, {pipeline_mode = #tpu.pipeline_mode<synchronous>, transform_indices = @transform_1, window_bounds = array<i64: 16, 1024>}, {pipeline_mode = #tpu.pipeline_mode<synchronous>, transform_indices = @transform_2, window_bounds = array<i64: 1, 1024>}, {pipeline_mode = #tpu.pipeline_mode<synchronous>, transform_indices = @transform_3, window_bounds = array<i64: 128, 512>}, {pipeline_mode = #tpu.pipeline_mode<synchronous>, transform_indices = @transform_4, window_bounds = array<i64: 128, 512>}, {pipeline_mode = #tpu.pipeline_mode<synchronous>, transform_indices = @transform_5, window_bounds = array<i64: 256, 128>}, {pipeline_mode = #tpu.pipeline_mode<synchronous>, transform_indices = @transform_6, window_bounds = array<i64: 1, 128>}, {transform_indices = @transform_7, window_bounds = array<i64: 8, 8, 128>}]} {
    %c0 = arith.constant 0 : index
    %c0_0 = arith.constant 0 : index
    %0 = vector.load %arg2[%c0, %c0_0] : memref<16x1024xf32, #tpu.memory_space<vmem>>, vector<16x1024xf32>
    %c0_1 = arith.constant 0 : index
    %c0_2 = arith.constant 0 : index
    %1 = vector.load %arg3[%c0_1, %c0_2] : memref<1x1024xf32, #tpu.memory_space<vmem>>, vector<1x1024xf32>
    %c0_3 = arith.constant 0 : index
    %c0_4 = arith.constant 0 : index
    %2 = vector.load %arg4[%c0_3, %c0_4] : memref<128x512xf32, #tpu.memory_space<vmem>>, vector<128x512xf32>
    %c0_5 = arith.constant 0 : index
    %c0_6 = arith.constant 0 : index
    %3 = vector.load %arg5[%c0_5, %c0_6] : memref<128x512xf32, #tpu.memory_space<vmem>>, vector<128x512xf32>
    %c0_7 = arith.constant 0 : index
    %c0_8 = arith.constant 0 : index
    %c0_9 = arith.constant 0 : index
    %4 = vector.load %arg1[%c0_7, %c0_8, %c0_9] : memref<8x8x16xf32, #tpu.memory_space<vmem>>, vector<8x8x16xf32>
    %5 = vector.shape_cast %4 : vector<8x8x16xf32> to vector<64x16xf32>
    %cst = arith.constant dense<0.000000e+00> : vector<64x1024xf32>
    %6 = tpu.matmul %5, %0, %cst {dimension_numbers = #tpu.dot_dimension_numbers<[1], [0], [0], [1], [0, 0, 1, 1], [], []>} : vector<64x16xf32>, vector<16x1024xf32>, vector<64x1024xf32> -> vector<64x1024xf32>
    %7 = vector.broadcast %1 : vector<1x1024xf32> to vector<64x1024xf32>
    %8 = arith.addf %6, %7 : vector<64x1024xf32>
    %9 = vector.extract_strided_slice %8 {offsets = [0, 0], sizes = [64, 512], strides = [1, 1]} : vector<64x1024xf32> to vector<64x512xf32>
    %10 = vector.shape_cast %9 : vector<64x512xf32> to vector<8x8x512xf32>
    %c0_10 = arith.constant 0 : index
    %c0_11 = arith.constant 0 : index
    %c0_12 = arith.constant 0 : index
    %11 = vector.load %arg9[%c0_10, %c0_11, %c0_12] : memref<8x8x512xf32, #tpu.memory_space<vmem>>, vector<8x8x512xf32>
    tpu.vector_store %arg9[%c0_10, %c0_11, %c0_12], %10 {strides = array<i32>} : memref<8x8x512xf32, #tpu.memory_space<vmem>>, vector<8x8x512xf32>,
    %12 = vector.extract_strided_slice %8 {offsets = [0, 512], sizes = [64, 512], strides = [1, 1]} : vector<64x1024xf32> to vector<64x512xf32>
    %13 = vector.shape_cast %12 : vector<64x512xf32> to vector<8x8x512xf32>
    %c0_13 = arith.constant 0 : index
    %c0_14 = arith.constant 0 : index
    %c0_15 = arith.constant 0 : index
    %14 = vector.load %arg10[%c0_13, %c0_14, %c0_15] : memref<8x8x512xf32, #tpu.memory_space<vmem>>, vector<8x8x512xf32>
    tpu.vector_store %arg10[%c0_13, %c0_14, %c0_15], %13 {strides = array<i32>} : memref<8x8x512xf32, #tpu.memory_space<vmem>>, vector<8x8x512xf32>,
    %cst_16 = arith.constant 0.000000e+00 : f32
    %15 = vector.broadcast %cst_16 : f32 to vector<8x128xf32>
    %c0_i32 = arith.constant 0 : i32
    %c8_i32 = arith.constant 8 : i32
    %16 = arith.addi %c0_i32, %c8_i32 : i32
    %c1_i32 = arith.constant 1 : i32
    %17:4 = scf.for %arg12 = %c0_i32 to %16 step %c1_i32 iter_args(%arg13 = %15, %arg14 = %15, %arg15 = %15, %arg16 = %15) -> (vector<8x128xf32>, vector<8x128xf32>, vector<8x128xf32>, vector<8x128xf32>)  : i32 {
      %c7_i32 = arith.constant 7 : i32
      %27 = arith.subi %c7_i32, %arg12 : i32
      %28 = arith.index_cast %arg12 : i32 to index
      %c0_29 = arith.constant 0 : index
      %c0_30 = arith.constant 0 : index
      %29 = vector.load %arg9[%28, %c0_29, %c0_30] : memref<8x8x512xf32, #tpu.memory_space<vmem>>, vector<1x8x512xf32>
      %30 = vector.shape_cast %29 : vector<1x8x512xf32> to vector<8x512xf32>
      %cst_31 = arith.constant dense<0.000000e+00> : vector<8x512xf32>
      %31 = tpu.matmul %arg13, %2, %cst_31 {dimension_numbers = #tpu.dot_dimension_numbers<[1], [0], [0], [1], [0, 0, 1, 1], [], []>} : vector<8x128xf32>, vector<128x512xf32>, vector<8x512xf32> -> vector<8x512xf32>
      %32 = arith.addf %30, %31 : vector<8x512xf32>
      %33 = vector.extract_strided_slice %32 {offsets = [0, 0], sizes = [8, 384], strides = [1, 1]} : vector<8x512xf32> to vector<8x384xf32>
      %34 = arith.negf %33 : vector<8x384xf32>
      %35 = math.exp %34 : vector<8x384xf32>
      %cst_32 = arith.constant 1.000000e+00 : f32
      %36 = vector.broadcast %cst_32 : f32 to vector<8x384xf32>
      %37 = arith.addf %36, %35 : vector<8x384xf32>
      %38 = arith.divf %36, %37 : vector<8x384xf32>
      %39 = vector.extract_strided_slice %38 {offsets = [0, 0], sizes = [8, 128], strides = [1, 1]} : vector<8x384xf32> to vector<8x128xf32>
      %40 = vector.extract_strided_slice %38 {offsets = [0, 128], sizes = [8, 128], strides = [1, 1]} : vector<8x384xf32> to vector<8x128xf32>
      %41 = vector.extract_strided_slice %38 {offsets = [0, 256], sizes = [8, 128], strides = [1, 1]} : vector<8x384xf32> to vector<8x128xf32>
      %42 = vector.extract_strided_slice %32 {offsets = [0, 384], sizes = [8, 128], strides = [1, 1]} : vector<8x512xf32> to vector<8x128xf32>
      %43 = math.tanh %42 : vector<8x128xf32>
      %44 = arith.mulf %40, %arg14 : vector<8x128xf32>
      %45 = arith.mulf %39, %43 : vector<8x128xf32>
      %46 = arith.addf %44, %45 : vector<8x128xf32>
      %47 = math.tanh %46 : vector<8x128xf32>
      %48 = arith.mulf %41, %47 : vector<8x128xf32>
      %49 = arith.index_cast %27 : i32 to index
      %c0_33 = arith.constant 0 : index
      %c0_34 = arith.constant 0 : index
      %50 = vector.load %arg10[%49, %c0_33, %c0_34] : memref<8x8x512xf32, #tpu.memory_space<vmem>>, vector<1x8x512xf32>
      %51 = vector.shape_cast %50 : vector<1x8x512xf32> to vector<8x512xf32>
      %cst_35 = arith.constant dense<0.000000e+00> : vector<8x512xf32>
      %52 = tpu.matmul %arg15, %3, %cst_35 {dimension_numbers = #tpu.dot_dimension_numbers<[1], [0], [0], [1], [0, 0, 1, 1], [], []>} : vector<8x128xf32>, vector<128x512xf32>, vector<8x512xf32> -> vector<8x512xf32>
      %53 = arith.addf %51, %52 : vector<8x512xf32>
      %54 = vector.extract_strided_slice %53 {offsets = [0, 0], sizes = [8, 384], strides = [1, 1]} : vector<8x512xf32> to vector<8x384xf32>
      %55 = arith.negf %54 : vector<8x384xf32>
      %56 = math.exp %55 : vector<8x384xf32>
      %cst_36 = arith.constant 1.000000e+00 : f32
      %57 = vector.broadcast %cst_36 : f32 to vector<8x384xf32>
      %58 = arith.addf %57, %56 : vector<8x384xf32>
      %59 = arith.divf %57, %58 : vector<8x384xf32>
      %60 = vector.extract_strided_slice %59 {offsets = [0, 0], sizes = [8, 128], strides = [1, 1]} : vector<8x384xf32> to vector<8x128xf32>
      %61 = vector.extract_strided_slice %59 {offsets = [0, 128], sizes = [8, 128], strides = [1, 1]} : vector<8x384xf32> to vector<8x128xf32>
      %62 = vector.extract_strided_slice %59 {offsets = [0, 256], sizes = [8, 128], strides = [1, 1]} : vector<8x384xf32> to vector<8x128xf32>
      %63 = vector.extract_strided_slice %53 {offsets = [0, 384], sizes = [8, 128], strides = [1, 1]} : vector<8x512xf32> to vector<8x128xf32>
      %64 = math.tanh %63 : vector<8x128xf32>
      %65 = arith.mulf %61, %arg16 : vector<8x128xf32>
      %66 = arith.mulf %60, %64 : vector<8x128xf32>
      %67 = arith.addf %65, %66 : vector<8x128xf32>
      %68 = math.tanh %67 : vector<8x128xf32>
      %69 = arith.mulf %62, %68 : vector<8x128xf32>
      %70 = arith.index_cast %arg12 : i32 to index
      %c0_37 = arith.constant 0 : index
      %c0_38 = arith.constant 0 : index
      %71 = vector.load %arg11[%70, %c0_37, %c0_38] : memref<8x8x256xf32, #tpu.memory_space<vmem>>, vector<1x8x128xf32>
      %72 = vector.shape_cast %71 : vector<1x8x128xf32> to vector<8x128xf32>
      %73 = vector.shape_cast %48 : vector<8x128xf32> to vector<1x8x128xf32>
      tpu.vector_store %arg11[%70, %c0_37, %c0_38], %73 {strides = array<i32>} : memref<8x8x256xf32, #tpu.memory_space<vmem>>, vector<1x8x128xf32>,
      %74 = arith.index_cast %27 : i32 to index
      %c0_39 = arith.constant 0 : index
      %c128 = arith.constant 128 : index
      %75 = vector.load %arg11[%74, %c0_39, %c128] : memref<8x8x256xf32, #tpu.memory_space<vmem>>, vector<1x8x128xf32>
      %76 = vector.shape_cast %75 : vector<1x8x128xf32> to vector<8x128xf32>
      %77 = vector.shape_cast %69 : vector<8x128xf32> to vector<1x8x128xf32>
      tpu.vector_store %arg11[%74, %c0_39, %c128], %77 {strides = array<i32>} : memref<8x8x256xf32, #tpu.memory_space<vmem>>, vector<1x8x128xf32>,
      scf.yield %48, %46, %69, %67 : vector<8x128xf32>, vector<8x128xf32>, vector<8x128xf32>, vector<8x128xf32>
    }
    %c8_i32_17 = arith.constant 8 : i32
    %c0_18 = arith.constant 0 : index
    %c0_19 = arith.constant 0 : index
    %18 = vector.load %arg6[%c0_18, %c0_19] : memref<256x128xf32, #tpu.memory_space<vmem>>, vector<256x128xf32>
    %c0_20 = arith.constant 0 : index
    %c0_21 = arith.constant 0 : index
    %19 = vector.load %arg7[%c0_20, %c0_21] : memref<1x128xf32, #tpu.memory_space<vmem>>, vector<1x128xf32>
    %c0_22 = arith.constant 0 : index
    %c0_23 = arith.constant 0 : index
    %c0_24 = arith.constant 0 : index
    %20 = vector.load %arg11[%c0_22, %c0_23, %c0_24] : memref<8x8x256xf32, #tpu.memory_space<vmem>>, vector<8x8x256xf32>
    %21 = vector.shape_cast %20 : vector<8x8x256xf32> to vector<64x256xf32>
    %cst_25 = arith.constant dense<0.000000e+00> : vector<64x128xf32>
    %22 = tpu.matmul %21, %18, %cst_25 {dimension_numbers = #tpu.dot_dimension_numbers<[1], [0], [0], [1], [0, 0, 1, 1], [], []>} : vector<64x256xf32>, vector<256x128xf32>, vector<64x128xf32> -> vector<64x128xf32>
    %23 = vector.broadcast %19 : vector<1x128xf32> to vector<64x128xf32>
    %24 = arith.addf %22, %23 : vector<64x128xf32>
    %25 = vector.shape_cast %24 : vector<64x128xf32> to vector<8x8x128xf32>
    %c0_26 = arith.constant 0 : index
    %c0_27 = arith.constant 0 : index
    %c0_28 = arith.constant 0 : index
    %26 = vector.load %arg8[%c0_26, %c0_27, %c0_28] : memref<8x8x128xf32, #tpu.memory_space<vmem>>, vector<8x8x128xf32>
    tpu.vector_store %arg8[%c0_26, %c0_27, %c0_28], %25 {strides = array<i32>} : memref<8x8x128xf32, #tpu.memory_space<vmem>>, vector<8x8x128xf32>,
    return
  }
  func.func @transform_0(%arg0: i32) -> (i32, i32, i32) {
    %c0_i32 = arith.constant 0 : i32
    %c0_i32_0 = arith.constant 0 : i32
    %c0_i32_1 = arith.constant 0 : i32
    return %c0_i32, %arg0, %c0_i32_0 : i32, i32, i32
  }
  func.func @transform_1(%arg0: i32) -> (i32, i32) {
    %c0_i32 = arith.constant 0 : i32
    %c0_i32_0 = arith.constant 0 : i32
    %c0_i32_1 = arith.constant 0 : i32
    return %c0_i32, %c0_i32_0 : i32, i32
  }
  func.func @transform_2(%arg0: i32) -> (i32, i32) {
    %c0_i32 = arith.constant 0 : i32
    %c0_i32_0 = arith.constant 0 : i32
    %c0_i32_1 = arith.constant 0 : i32
    return %c0_i32, %c0_i32_0 : i32, i32
  }
  func.func @transform_3(%arg0: i32) -> (i32, i32) {
    %c0_i32 = arith.constant 0 : i32
    %c0_i32_0 = arith.constant 0 : i32
    %c0_i32_1 = arith.constant 0 : i32
    return %c0_i32, %c0_i32_0 : i32, i32
  }
  func.func @transform_4(%arg0: i32) -> (i32, i32) {
    %c0_i32 = arith.constant 0 : i32
    %c0_i32_0 = arith.constant 0 : i32
    %c0_i32_1 = arith.constant 0 : i32
    return %c0_i32, %c0_i32_0 : i32, i32
  }
  func.func @transform_5(%arg0: i32) -> (i32, i32) {
    %c0_i32 = arith.constant 0 : i32
    %c0_i32_0 = arith.constant 0 : i32
    %c0_i32_1 = arith.constant 0 : i32
    return %c0_i32, %c0_i32_0 : i32, i32
  }
  func.func @transform_6(%arg0: i32) -> (i32, i32) {
    %c0_i32 = arith.constant 0 : i32
    %c0_i32_0 = arith.constant 0 : i32
    %c0_i32_1 = arith.constant 0 : i32
    return %c0_i32, %c0_i32_0 : i32, i32
  }
  func.func @transform_7(%arg0: i32) -> (i32, i32, i32) {
    %c0_i32 = arith.constant 0 : i32
    %c0_i32_0 = arith.constant 0 : i32
    %c0_i32_1 = arith.constant 0 : i32
    return %c0_i32, %arg0, %c0_i32_0 : i32, i32, i32
  }
}

</mosaic_0001>

<bundles_post_ra>
// kernel: tpu_custom_call.1
= control target key start
LH: loop header
LB: loop body
LE: loop exit
PB: predicated region body
PF: predicated region fallthrough
CT: control target
= control target key end

     0   :  { %12 = vsyncpa [#allocation6], 0  ;;  %s2840_s0 = inlined_call_operand.hbm [shape: f32[8,8,16], index: 0, kind: input, shape index: {}]   ;;  %s2841_s1 = inlined_call_operand.hbm [shape: f32[16,1024], index: 1, kind: input, shape index: {}]   ;;  %s2842_s2 = inlined_call_operand.hbm [shape: f32[1,1024], index: 2, kind: input, shape index: {}]   ;;  %s2843_s3 = inlined_call_operand.hbm [shape: f32[128,512], index: 3, kind: input, shape index: {}]   ;;  %s2844_s4 = inlined_call_operand.hbm [shape: f32[128,512], index: 4, kind: input, shape index: {}]   ;;  %s2845_s5 = inlined_call_operand.hbm [shape: f32[256,128], index: 5, kind: input, shape index: {}]   ;;  %s2846_s6 = inlined_call_operand.hbm [shape: f32[1,128], index: 6, kind: input, shape index: {}]   ;;  %s2847_s7 = inlined_call_operand.hbm [shape: f32[8,8,128], index: 7, kind: output, shape index: {}]  }
   0x1   :  { %13 = vsyncpa [#allocation9], 0 }
   0x2   :  { %14 = vsyncpa [#allocation12], 0 }
   0x3   :  { %15 = vsyncpa [#allocation15], 0 }
   0x4   :  { %16 = vsyncpa [#allocation7], 0  ;;  %s2052_s24 = smov [#allocation8]   ;;  %s1826_s28 = scalar_lea.hbm %s2841_s1, 2048 }
   0x5   :  { %s34_s25 = sshll.u32 %s2052_s24, 4  ;;  %p1827_p0 = scmp.ne.s32.totalorder %s2841_s1, %s1826_s28  ;;  %s35_s25 = int_to_ptr.vmem [resolvable:$true] %s34_s25 }
   0x6   :  { %p1830_p1 = scmp.lt.u32.totalorder %s1826_s28, %s2841_s1 }
   0x8   :  { %p1832_p2 = pnand %p1830_p1, %p1827_p0 }
   0xa   :  { %1835 = shalt.err (!%p1832_p2)
}
   0xb   :  { %s1836_s10 = scalar_lea.vmem %s35_s25, 2048  ;;  %p1841_p4 = scmp.lt.s32.totalorder %s35_s25, %s35_s25 }
   0xc   :  { %p1837_p3 = scmp.ne.s32.totalorder %s35_s25, %s1836_s10  ;;  %p1842_p5 = scmp.lt.s32.totalorder %s1836_s10, %s1836_s10 }
   0xe   :  { %p1843_p6 = por %p1842_p5, %p1841_p4 }
  0x10   :  { %p1844_p7 = pnand %p1843_p6, %p1837_p3 }
  0x12   :  { %1847 = shalt.err (!%p1844_p7)
}
  0x13   :  { %s2053_s11 = smov 1024   ;;  %s2054_s12 = smov 64  }
  0x14   :  { %40 = dma.hbm_to_vmem [thread:$0]  %s2841_s1, 2048, %s35_s25, [#allocation9], %s2053_s11, %s2053_s11, %s2054_s12  }
  0x15   :  { %s2055_s15 = smov [#allocation11]   ;;  %s1848_s19 = scalar_lea.hbm %s2843_s3, 8192 }
  0x16   :  { %s56_s16 = sshll.u32 %s2055_s15, 4  ;;  %p1849_p8 = scmp.ne.s32.totalorder %s2843_s3, %s1848_s19  ;;  %s57_s16 = int_to_ptr.vmem [resolvable:$true] %s56_s16 }
  0x17   :  { %p1852_p9 = scmp.lt.u32.totalorder %s1848_s19, %s2843_s3 }
  0x19   :  { %p1854_p10 = pnand %p1852_p9, %p1849_p8 }
  0x1b   :  { %1857 = shalt.err (!%p1854_p10)
}
  0x1c   :  { %s1858_s24 = scalar_lea.vmem %s57_s16, 8192  ;;  %p1863_p12 = scmp.lt.s32.totalorder %s57_s16, %s57_s16 }
  0x1d   :  { %p1859_p11 = scmp.ne.s32.totalorder %s57_s16, %s1858_s24  ;;  %p1864_p13 = scmp.lt.s32.totalorder %s1858_s24, %s1858_s24 }
  0x1f   :  { %p1865_p0 = por %p1864_p13, %p1863_p12 }
  0x21   :  { %p1866_p1 = pnand %p1865_p0, %p1859_p11 }
  0x23   :  { %1869 = shalt.err (!%p1866_p1)
}
  0x24   :  { %s2056_s1 = smov 512   ;;  %s2057_s25 = smov 32  }
  0x25   :  { %62 = dma.hbm_to_vmem [thread:$0]  %s2843_s3, 8192, %s57_s16, [#allocation12], %s2056_s1, %s2056_s1, %s2057_s25  }
  0x26   :  { %s2058_s28 = smov [#allocation14]   ;;  %s2059_s30 = smov [#allocation5]  }
  0x27   :  { %s80_s29 = sshll.u32 %s2058_s28, 4  ;;  %s22_s8 = sshll.u32 %s2059_s30, 4  ;;  %s81_s29 = int_to_ptr.vmem [resolvable:$true] %s80_s29  ;;  %s2135_s8 = int_to_ptr.vmem [resolvable:$true] %s22_s8 }
  0x28   :  { %s1870_s11 = scalar_lea.hbm %s2845_s5, 4096 }
  0x29   :  { %p1871_p2 = scmp.ne.s32.totalorder %s2845_s5, %s1870_s11  ;;  %p1874_p3 = scmp.lt.u32.totalorder %s1870_s11, %s2845_s5 }
  0x2b   :  { %p1876_p4 = pnand %p1874_p3, %p1871_p2 }
  0x2d   :  { %1879 = shalt.err (!%p1876_p4)
}
  0x2e   :  { %s1880_s3 = scalar_lea.vmem %s81_s29, 4096  ;;  %p1885_p6 = scmp.lt.s32.totalorder %s81_s29, %s81_s29 }
  0x2f   :  { %p1881_p5 = scmp.ne.s32.totalorder %s81_s29, %s1880_s3  ;;  %p1886_p7 = scmp.lt.s32.totalorder %s1880_s3, %s1880_s3 }
  0x31   :  { %p1887_p8 = por %p1886_p7, %p1885_p6 }
  0x33   :  { %p1888_p9 = pnand %p1887_p8, %p1881_p5 }
  0x35   :  { %1891 = shalt.err (!%p1888_p9)
}
  0x36   :  { %s2060_s16 = smov 128   ;;  %s2061_s17 = smov 8  }
  0x37   :  { %86 = dma.hbm_to_vmem [thread:$0]  %s2845_s5, 4096, %s81_s29, [#allocation15], %s2060_s16, %s2060_s16, %s2061_s17  }
  0x38   :  { %s1892_s22 = scalar_lea.hbm %s2840_s0, 1024 }
  0x39   :  { %p1893_p10 = scmp.ne.s32.totalorder %s2840_s0, %s1892_s22  ;;  %p1896_p11 = scmp.lt.u32.totalorder %s1892_s22, %s2840_s0 }
  0x3b   :  { %p1898_p12 = pnand %p1896_p11, %p1893_p10 }
  0x3d   :  { %1901 = shalt.err (!%p1898_p12)
}
  0x3e   :  { %s1902_s28 = scalar_lea.vmem %s2135_s8, 1024  ;;  %p1907_p0 = scmp.lt.s32.totalorder %s2135_s8, %s2135_s8 }
  0x3f   :  { %p1903_p13 = scmp.ne.s32.totalorder %s2135_s8, %s1902_s28  ;;  %p1908_p1 = scmp.lt.s32.totalorder %s1902_s28, %s1902_s28 }
  0x41   :  { %p1909_p2 = por %p1908_p1, %p1907_p0 }
  0x43   :  { %p1910_p3 = pnand %p1909_p2, %p1903_p13 }
  0x45   :  { %1913 = shalt.err (!%p1910_p3)
}
  0x46   :  { %28 = dma.hbm_to_vmem [thread:$0]  %s2840_s0, 1024, %s2135_s8, [#allocation6], %s2060_s16, %s2060_s16, %s2061_s17  }
  0x47   :  { %s2062_s30 = smov [#allocation10]   ;;  %s2063_s10 = smov [#allocation13]  }
  0x48   :  { %s47_s9 = sshll.u32 %s2062_s30, 4  ;;  %s68_s11 = sshll.u32 %s2063_s10, 4  ;;  %s48_s9 = int_to_ptr.vmem [resolvable:$true] %s47_s9  ;;  %s2172_s11 = int_to_ptr.vmem [resolvable:$true] %s68_s11 }
  0x49   :  { %s1914_s14 = scalar_lea.hbm %s2842_s2, 128 }
  0x4a   :  { %p1915_p4 = scmp.ne.s32.totalorder %s2842_s2, %s1914_s14  ;;  %p1918_p5 = scmp.lt.u32.totalorder %s1914_s14, %s2842_s2 }
  0x4c   :  { %p1920_p6 = pnand %p1918_p5, %p1915_p4 }
  0x4e   :  { %1923 = shalt.err (!%p1920_p6)
}
  0x4f   :  { %s1924_s0 = scalar_lea.vmem %s48_s9, 128  ;;  %p1929_p8 = scmp.lt.s32.totalorder %s48_s9, %s48_s9 }
  0x50   :  { %p1925_p7 = scmp.ne.s32.totalorder %s48_s9, %s1924_s0  ;;  %p1930_p9 = scmp.lt.s32.totalorder %s1924_s0, %s1924_s0 }
  0x52   :  { %p1931_p10 = por %p1930_p9, %p1929_p8 }
  0x54   :  { %p1932_p11 = pnand %p1931_p10, %p1925_p7 }
  0x56   :  { %1935 = shalt.err (!%p1932_p11)
}
  0x57   :  { %50 = dma.hbm_to_vmem [thread:$0]  %s2842_s2, 128, %s48_s9, [#allocation9]  }
  0x58   :  { %s1936_s23 = scalar_lea.hbm %s2844_s4, 8192 }
  0x59   :  { %p1937_p12 = scmp.ne.s32.totalorder %s2844_s4, %s1936_s23  ;;  %p1940_p13 = scmp.lt.u32.totalorder %s1936_s23, %s2844_s4 }
  0x5b   :  { %p1942_p0 = pnand %p1940_p13, %p1937_p12 }
  0x5d   :  { %1945 = shalt.err (!%p1942_p0)
}
  0x5e   :  { %s1946_s5 = scalar_lea.vmem %s2172_s11, 8192  ;;  %p1951_p2 = scmp.lt.s32.totalorder %s2172_s11, %s2172_s11 }
  0x5f   :  { %p1947_p1 = scmp.ne.s32.totalorder %s2172_s11, %s1946_s5  ;;  %p1952_p3 = scmp.lt.s32.totalorder %s1946_s5, %s1946_s5 }
  0x61   :  { %p1953_p4 = por %p1952_p3, %p1951_p2 }
  0x63   :  { %p1954_p5 = pnand %p1953_p4, %p1947_p1 }
  0x65   :  { %1957 = shalt.err (!%p1954_p5)
}
  0x66   :  { %74 = dma.hbm_to_vmem [thread:$0]  %s2844_s4, 8192, %s2172_s11, [#allocation12], %s2056_s1, %s2056_s1, %s2057_s25  }
  0x67   :  { %s2064_s30 = smov [#allocation16]   ;;  %s1958_s13 = scalar_lea.hbm %s2846_s6, 16 }
  0x68   :  { %s93_s9 = sshll.u32 %s2064_s30, 4  ;;  %p1959_p6 = scmp.ne.s32.totalorder %s2846_s6, %s1958_s13  ;;  %s94_s9 = int_to_ptr.vmem [resolvable:$true] %s93_s9 }
  0x69   :  { %p1962_p7 = scmp.lt.u32.totalorder %s1958_s13, %s2846_s6 }
  0x6b   :  { %p1964_p8 = pnand %p1962_p7, %p1959_p6 }
  0x6d   :  { %1967 = shalt.err (!%p1964_p8)
}
  0x6e   :  { %s1968_s19 = scalar_lea.vmem %s94_s9, 16  ;;  %s1972_s4 = scalar_lea.vmem %s94_s9, 32 }
  0x6f   :  { %p1969_p9 = scmp.ne.s32.totalorder %s94_s9, %s1968_s19  ;;  %p1973_p10 = scmp.lt.s32.totalorder %s94_s9, %s94_s9 }
  0x70   :  { %p1974_p11 = scmp.lt.s32.totalorder %s1972_s4, %s1968_s19 }
  0x72   :  { %p1975_p12 = por %p1974_p11, %p1973_p10 }
  0x74   :  { %p1976_p13 = pnand %p1975_p12, %p1969_p9 }
  0x76   :  { %1979 = shalt.err (!%p1976_p13)
}
  0x77   :  { %96 = dma.hbm_to_vmem [thread:$0]  %s2846_s6, 16, %s94_s9, [#allocation15]  }
  0x78   :  { %2022 = dma.done.wait [#allocation6], 1024  }
  0x79   :  { %2023 = vsyncadd [#allocation6], 4294966272 }
  0x7a   :  { %2024 = dma.done.wait [#allocation9], 2176  }
  0x7b   :  { %2025 = vsyncadd [#allocation9], 4294965120 }
  0x7c   :  { %2026 = dma.done.wait [#allocation12], 16384  }
  0x7d   :  { %2027 = vsyncadd [#allocation12], 4294950912 }
  0x7e   :  { %2028 = dma.done.wait [#allocation15], 4112  }
  0x7f   :  { %2029 = vsyncadd [#allocation15], 4294963184  ;;  %v2848_v0 = vmov 0.0   ;;  %v2220_v1 = vld [vmem:[#allocation11] sm:$0xff]  ;;  %v2222_v2 = vld [vmem:[#allocation11 + $0x8] sm:$0xff]  ;;  %vm312_vm0 = vcmask 130048  }
  0x80   :  { %401 = vmatprep.mubr.f32.mxu0 %v2848_v0  ;;  %514 = vmatprep.mubr.f32.mxu1 %v2848_v0  ;;  %2852 = vst [vmem:[#allocation23_spill] sm:$0xff] %v2220_v1  ;;  %2853 = vst [vmem:[#allocation24_spill] sm:$0xff] %v2222_v2  ;;  %v2224_v3 = vld [vmem:[#allocation11 + $0x10] sm:$0xff]  ;;  %v2226_v4 = vld [vmem:[#allocation11 + $0x18] sm:$0xff]  ;;  %s2652_s6 = smov 0  }
  0x81   :  { %v2228_v5 = vld [vmem:[#allocation11 + $0x20] sm:$0xff]  ;;  %v2230_v6 = vld [vmem:[#allocation11 + $0x28] sm:$0xff]  ;;  %v2232_v7 = vld [vmem:[#allocation11 + $0x30] sm:$0xff] }
  0x82   :  { %v2234_v8 = vld [vmem:[#allocation11 + $0x38] sm:$0xff]  ;;  %v2236_v9 = vld [vmem:[#allocation11 + $0x40] sm:$0xff]  ;;  %v2238_v10 = vld [vmem:[#allocation11 + $0x48] sm:$0xff] }
  0x83   :  { %v2240_v11 = vld [vmem:[#allocation11 + $0x50] sm:$0xff]  ;;  %v2242_v12 = vld [vmem:[#allocation11 + $0x58] sm:$0xff]  ;;  %v2244_v13 = vld [vmem:[#allocation11 + $0x60] sm:$0xff] }
  0x84   :  { %v2246_v14 = vld [vmem:[#allocation11 + $0x68] sm:$0xff]  ;;  %v2248_v15 = vld [vmem:[#allocation11 + $0x70] sm:$0xff]  ;;  %v2250_v16 = vld [vmem:[#allocation11 + $0x78] sm:$0xff] }
  0x85   :  { %v2252_v17 = vld [vmem:[#allocation11 + $0x80] sm:$0xff]  ;;  %v2254_v18 = vld [vmem:[#allocation11 + $0x88] sm:$0xff]  ;;  %v2256_v19 = vld [vmem:[#allocation11 + $0x90] sm:$0xff] }
  0x86   :  { %v2258_v20 = vld [vmem:[#allocation11 + $0x98] sm:$0xff]  ;;  %v2260_v21 = vld [vmem:[#allocation11 + $0xa0] sm:$0xff]  ;;  %v2262_v22 = vld [vmem:[#allocation11 + $0xa8] sm:$0xff] }
  0x87   :  { %v2264_v23 = vld [vmem:[#allocation11 + $0xb0] sm:$0xff]  ;;  %v2266_v24 = vld [vmem:[#allocation11 + $0xb8] sm:$0xff]  ;;  %v2268_v25 = vld [vmem:[#allocation11 + $0xc0] sm:$0xff] }
  0x88   :  { %v2270_v26 = vld [vmem:[#allocation11 + $0xc8] sm:$0xff]  ;;  %v2272_v27 = vld [vmem:[#allocation11 + $0xd0] sm:$0xff]  ;;  %v2274_v28 = vld [vmem:[#allocation11 + $0xd8] sm:$0xff] }
  0x89   :  { %v2276_v29 = vld [vmem:[#allocation11 + $0xe0] sm:$0xff]  ;;  %v2278_v30 = vld [vmem:[#allocation11 + $0xe8] sm:$0xff]  ;;  %v2280_v31 = vld [vmem:[#allocation11 + $0xf0] sm:$0xff] }
  0x8a   :  { %v2282_v32 = vld [vmem:[#allocation11 + $0xf8] sm:$0xff]  ;;  %v2284_v33 = vld [vmem:[#allocation11 + $0x100] sm:$0xff]  ;;  %v2286_v34 = vld [vmem:[#allocation11 + $0x108] sm:$0xff] }
  0x8b   :  { %v2288_v35 = vld [vmem:[#allocation11 + $0x110] sm:$0xff]  ;;  %v2290_v36 = vld [vmem:[#allocation11 + $0x118] sm:$0xff]  ;;  %v2292_v37 = vld [vmem:[#allocation11 + $0x120] sm:$0xff] }
  0x8c   :  { %v2294_v38 = vld [vmem:[#allocation11 + $0x128] sm:$0xff]  ;;  %v2296_v39 = vld [vmem:[#allocation11 + $0x130] sm:$0xff]  ;;  %v2298_v40 = vld [vmem:[#allocation11 + $0x138] sm:$0xff] }
  0x8d   :  { %v2300_v41 = vld [vmem:[#allocation11 + $0x140] sm:$0xff]  ;;  %v2302_v42 = vld [vmem:[#allocation11 + $0x148] sm:$0xff]  ;;  %v2304_v43 = vld [vmem:[#allocation11 + $0x150] sm:$0xff] }
  0x8e   :  { %2854 = vst [vmem:[#allocation25_spill] sm:$0xff] %v2300_v41  ;;  %2855 = vst [vmem:[#allocation26_spill] sm:$0xff] %v2304_v43  ;;  %v2306_v44 = vld [vmem:[#allocation11 + $0x158] sm:$0xff]  ;;  %v2308_v45 = vld [vmem:[#allocation11 + $0x160] sm:$0xff] }
  0x8f   :  { %2856 = vst [vmem:[#allocation27_spill] sm:$0xff] %v2306_v44  ;;  %2857 = vst [vmem:[#allocation28_spill] sm:$0xff] %v2308_v45  ;;  %v2310_v46 = vld [vmem:[#allocation11 + $0x168] sm:$0xff]  ;;  %v2312_v47 = vld [vmem:[#allocation11 + $0x170] sm:$0xff] }
  0x90   :  { %2858 = vst [vmem:[#allocation29_spill] sm:$0xff] %v2312_v47  ;;  %v2314_v48 = vld [vmem:[#allocation11 + $0x178] sm:$0xff]  ;;  %v2316_v49 = vld [vmem:[#allocation11 + $0x180] sm:$0xff]  ;;  %v2318_v50 = vld [vmem:[#allocation11 + $0x188] sm:$0xff] }
  0x91   :  { %2859 = vst [vmem:[#allocation30_spill] sm:$0xff] %v2314_v48  ;;  %2860 = vst [vmem:[#allocation31_spill] sm:$0xff] %v2316_v49  ;;  %v2320_v51 = vld [vmem:[#allocation11 + $0x190] sm:$0xff]  ;;  %v2322_v52 = vld [vmem:[#allocation11 + $0x198] sm:$0xff] }
  0x92   :  { %2861 = vst [vmem:[#allocation32_spill] sm:$0xff] %v2318_v50  ;;  %2862 = vst [vmem:[#allocation33_spill] sm:$0xff] %v2320_v51  ;;  %v2324_v53 = vld [vmem:[#allocation11 + $0x1a0] sm:$0xff]  ;;  %v2326_v54 = vld [vmem:[#allocation11 + $0x1a8] sm:$0xff] }
  0x93   :  { %2863 = vst [vmem:[#allocation34_spill] sm:$0xff] %v2322_v52  ;;  %2864 = vst [vmem:[#allocation35_spill] sm:$0xff] %v2324_v53  ;;  %v2328_v55 = vld [vmem:[#allocation11 + $0x1b0] sm:$0xff]  ;;  %v2330_v56 = vld [vmem:[#allocation11 + $0x1b8] sm:$0xff] }
  0x94   :  { %2865 = vst [vmem:[#allocation36_spill] sm:$0xff] %v2326_v54  ;;  %2866 = vst [vmem:[#allocation37_spill] sm:$0xff] %v2328_v55  ;;  %v2332_v57 = vld [vmem:[#allocation11 + $0x1c0] sm:$0xff]  ;;  %v2334_v58 = vld [vmem:[#allocation11 + $0x1c8] sm:$0xff] }
  0x95   :  { %2867 = vst [vmem:[#allocation38_spill] sm:$0xff] %v2330_v56  ;;  %2868 = vst [vmem:[#allocation39_spill] sm:$0xff] %v2332_v57  ;;  %v2336_v59 = vld [vmem:[#allocation11 + $0x1d0] sm:$0xff]  ;;  %v2338_v60 = vld [vmem:[#allocation11 + $0x1d8] sm:$0xff] }
  0x96   :  { %2869 = vst [vmem:[#allocation40_spill] sm:$0xff] %v2334_v58  ;;  %2870 = vst [vmem:[#allocation41_spill] sm:$0xff] %v2336_v59  ;;  %v2340_v61 = vld [vmem:[#allocation11 + $0x1e0] sm:$0xff]  ;;  %v2342_v62 = vld [vmem:[#allocation11 + $0x1e8] sm:$0xff] }
  0x97   :  { %2871 = vst [vmem:[#allocation42_spill] sm:$0xff] %v2338_v60  ;;  %2872 = vst [vmem:[#allocation43_spill] sm:$0xff] %v2340_v61  ;;  %v2344_v63 = vld [vmem:[#allocation11 + $0x1f0] sm:$0xff]  ;;  %v2346_v0 = vld [vmem:[#allocation11 + $0x1f8] sm:$0xff] }
  0x98   :  { %2873 = vst [vmem:[#allocation44_spill] sm:$0xff] %v2342_v62  ;;  %2874 = vst [vmem:[#allocation45_spill] sm:$0xff] %v2344_v63  ;;  %v2348_v51 = vld [vmem:[#allocation13] sm:$0xff]  ;;  %v2350_v55 = vld [vmem:[#allocation13 + $0x8] sm:$0xff] }
  0x99   :  { %2875 = vst [vmem:[#allocation46_spill] sm:$0xff] %v2346_v0  ;;  %2876 = vst [vmem:[#allocation47_spill] sm:$0xff] %v2348_v51  ;;  %v2352_v53 = vld [vmem:[#allocation13 + $0x10] sm:$0xff]  ;;  %v2354_v57 = vld [vmem:[#allocation13 + $0x18] sm:$0xff] }
  0x9a   :  { %2877 = vst [vmem:[#allocation48_spill] sm:$0xff] %v2350_v55  ;;  %2878 = vst [vmem:[#allocation49_spill] sm:$0xff] %v2352_v53  ;;  %v2356_v58 = vld [vmem:[#allocation13 + $0x20] sm:$0xff]  ;;  %v2358_v59 = vld [vmem:[#allocation13 + $0x28] sm:$0xff] }
  0x9b   :  { %2879 = vst [vmem:[#allocation50_spill] sm:$0xff] %v2354_v57  ;;  %2880 = vst [vmem:[#allocation51_spill] sm:$0xff] %v2356_v58  ;;  %v2360_v60 = vld [vmem:[#allocation13 + $0x30] sm:$0xff]  ;;  %v2362_v61 = vld [vmem:[#allocation13 + $0x38] sm:$0xff] }
  0x9c   :  { %2881 = vst [vmem:[#allocation52_spill] sm:$0xff] %v2358_v59  ;;  %2882 = vst [vmem:[#allocation53_spill] sm:$0xff] %v2360_v60  ;;  %v2364_v62 = vld [vmem:[#allocation13 + $0x40] sm:$0xff]  ;;  %v2366_v63 = vld [vmem:[#allocation13 + $0x48] sm:$0xff] }
  0x9d   :  { %2883 = vst [vmem:[#allocation54_spill] sm:$0xff] %v2362_v61  ;;  %2884 = vst [vmem:[#allocation55_spill] sm:$0xff] %v2364_v62  ;;  %v2368_v0 = vld [vmem:[#allocation13 + $0x50] sm:$0xff]  ;;  %v2370_v51 = vld [vmem:[#allocation13 + $0x58] sm:$0xff] }
  0x9e   :  { %2885 = vst [vmem:[#allocation56_spill] sm:$0xff] %v2366_v63  ;;  %2886 = vst [vmem:[#allocation57_spill] sm:$0xff] %v2368_v0  ;;  %v2372_v55 = vld [vmem:[#allocation13 + $0x60] sm:$0xff]  ;;  %v2374_v53 = vld [vmem:[#allocation13 + $0x68] sm:$0xff] }
  0x9f   :  { %2887 = vst [vmem:[#allocation58_spill] sm:$0xff] %v2370_v51  ;;  %2888 = vst [vmem:[#allocation59_spill] sm:$0xff] %v2372_v55  ;;  %v2376_v57 = vld [vmem:[#allocation13 + $0x70] sm:$0xff]  ;;  %v2378_v58 = vld [vmem:[#allocation13 + $0x78] sm:$0xff] }
  0xa0   :  { %2889 = vst [vmem:[#allocation60_spill] sm:$0xff] %v2374_v53  ;;  %2890 = vst [vmem:[#allocation61_spill] sm:$0xff] %v2376_v57  ;;  %v2380_v59 = vld [vmem:[#allocation13 + $0x80] sm:$0xff]  ;;  %v2382_v60 = vld [vmem:[#allocation13 + $0x88] sm:$0xff] }
  0xa1   :  { %2891 = vst [vmem:[#allocation62_spill] sm:$0xff] %v2378_v58  ;;  %2892 = vst [vmem:[#allocation63_spill] sm:$0xff] %v2380_v59  ;;  %v2384_v61 = vld [vmem:[#allocation13 + $0x90] sm:$0xff]  ;;  %v2386_v62 = vld [vmem:[#allocation13 + $0x98] sm:$0xff] }
  0xa2   :  { %2893 = vst [vmem:[#allocation64_spill] sm:$0xff] %v2382_v60  ;;  %2894 = vst [vmem:[#allocation65_spill] sm:$0xff] %v2384_v61  ;;  %v2388_v63 = vld [vmem:[#allocation13 + $0xa0] sm:$0xff]  ;;  %v2390_v0 = vld [vmem:[#allocation13 + $0xa8] sm:$0xff] }
  0xa3   :  { %2895 = vst [vmem:[#allocation66_spill] sm:$0xff] %v2386_v62  ;;  %2896 = vst [vmem:[#allocation67_spill] sm:$0xff] %v2388_v63  ;;  %v2392_v51 = vld [vmem:[#allocation13 + $0xb0] sm:$0xff]  ;;  %v2394_v55 = vld [vmem:[#allocation13 + $0xb8] sm:$0xff] }
  0xa4   :  { %2897 = vst [vmem:[#allocation68_spill] sm:$0xff] %v2390_v0  ;;  %2898 = vst [vmem:[#allocation69_spill] sm:$0xff] %v2392_v51  ;;  %v2396_v53 = vld [vmem:[#allocation13 + $0xc0] sm:$0xff]  ;;  %v2398_v57 = vld [vmem:[#allocation13 + $0xc8] sm:$0xff] }
  0xa5   :  { %2899 = vst [vmem:[#allocation70_spill] sm:$0xff] %v2394_v55  ;;  %2900 = vst [vmem:[#allocation71_spill] sm:$0xff] %v2396_v53  ;;  %v2400_v58 = vld [vmem:[#allocation13 + $0xd0] sm:$0xff]  ;;  %v2402_v59 = vld [vmem:[#allocation13 + $0xd8] sm:$0xff] }
  0xa6   :  { %2901 = vst [vmem:[#allocation72_spill] sm:$0xff] %v2398_v57  ;;  %2902 = vst [vmem:[#allocation73_spill] sm:$0xff] %v2400_v58  ;;  %v2404_v60 = vld [vmem:[#allocation13 + $0xe0] sm:$0xff]  ;;  %v2406_v61 = vld [vmem:[#allocation13 + $0xe8] sm:$0xff] }
  0xa7   :  { %2903 = vst [vmem:[#allocation74_spill] sm:$0xff] %v2402_v59  ;;  %2904 = vst [vmem:[#allocation75_spill] sm:$0xff] %v2404_v60  ;;  %v2408_v62 = vld [vmem:[#allocation13 + $0xf0] sm:$0xff]  ;;  %v2410_v63 = vld [vmem:[#allocation13 + $0xf8] sm:$0xff] }
  0xa8   :  { %2905 = vst [vmem:[#allocation76_spill] sm:$0xff] %v2406_v61  ;;  %2906 = vst [vmem:[#allocation77_spill] sm:$0xff] %v2408_v62  ;;  %v2412_v0 = vld [vmem:[#allocation13 + $0x100] sm:$0xff]  ;;  %v2414_v51 = vld [vmem:[#allocation13 + $0x108] sm:$0xff] }
  0xa9   :  { %2907 = vst [vmem:[#allocation78_spill] sm:$0xff] %v2410_v63  ;;  %2908 = vst [vmem:[#allocation79_spill] sm:$0xff] %v2412_v0  ;;  %v2416_v55 = vld [vmem:[#allocation13 + $0x110] sm:$0xff]  ;;  %v2418_v53 = vld [vmem:[#allocation13 + $0x118] sm:$0xff] }
  0xaa   :  { %2909 = vst [vmem:[#allocation80_spill] sm:$0xff] %v2414_v51  ;;  %2910 = vst [vmem:[#allocation81_spill] sm:$0xff] %v2416_v55  ;;  %v2420_v57 = vld [vmem:[#allocation13 + $0x120] sm:$0xff]  ;;  %v2422_v58 = vld [vmem:[#allocation13 + $0x128] sm:$0xff] }
  0xab   :  { %2911 = vst [vmem:[#allocation82_spill] sm:$0xff] %v2418_v53  ;;  %2912 = vst [vmem:[#allocation83_spill] sm:$0xff] %v2420_v57  ;;  %v2424_v59 = vld [vmem:[#allocation13 + $0x130] sm:$0xff]  ;;  %v2426_v60 = vld [vmem:[#allocation13 + $0x138] sm:$0xff] }
  0xac   :  { %2913 = vst [vmem:[#allocation84_spill] sm:$0xff] %v2422_v58  ;;  %2914 = vst [vmem:[#allocation85_spill] sm:$0xff] %v2424_v59  ;;  %v2428_v61 = vld [vmem:[#allocation13 + $0x140] sm:$0xff]  ;;  %v2430_v62 = vld [vmem:[#allocation13 + $0x148] sm:$0xff] }
  0xad   :  { %2915 = vst [vmem:[#allocation86_spill] sm:$0xff] %v2426_v60  ;;  %2916 = vst [vmem:[#allocation87_spill] sm:$0xff] %v2428_v61  ;;  %v2432_v63 = vld [vmem:[#allocation13 + $0x150] sm:$0xff]  ;;  %v2434_v0 = vld [vmem:[#allocation13 + $0x158] sm:$0xff] }
  0xae   :  { %2917 = vst [vmem:[#allocation88_spill] sm:$0xff] %v2430_v62  ;;  %2918 = vst [vmem:[#allocation89_spill] sm:$0xff] %v2432_v63  ;;  %v2436_v51 = vld [vmem:[#allocation13 + $0x160] sm:$0xff]  ;;  %v2438_v55 = vld [vmem:[#allocation13 + $0x168] sm:$0xff] }
  0xaf   :  { %2919 = vst [vmem:[#allocation90_spill] sm:$0xff] %v2434_v0  ;;  %2920 = vst [vmem:[#allocation91_spill] sm:$0xff] %v2436_v51  ;;  %v2440_v53 = vld [vmem:[#allocation13 + $0x170] sm:$0xff]  ;;  %v2442_v57 = vld [vmem:[#allocation13 + $0x178] sm:$0xff] }
  0xb0   :  { %2921 = vst [vmem:[#allocation92_spill] sm:$0xff] %v2438_v55  ;;  %2922 = vst [vmem:[#allocation93_spill] sm:$0xff] %v2440_v53  ;;  %v2444_v58 = vld [vmem:[#allocation13 + $0x180] sm:$0xff]  ;;  %v2446_v59 = vld [vmem:[#allocation13 + $0x188] sm:$0xff] }
  0xb1   :  { %2923 = vst [vmem:[#allocation94_spill] sm:$0xff] %v2442_v57  ;;  %2924 = vst [vmem:[#allocation95_spill] sm:$0xff] %v2444_v58  ;;  %v2448_v60 = vld [vmem:[#allocation13 + $0x190] sm:$0xff]  ;;  %v2450_v61 = vld [vmem:[#allocation13 + $0x198] sm:$0xff] }
  0xb2   :  { %2925 = vst [vmem:[#allocation96_spill] sm:$0xff] %v2446_v59  ;;  %2926 = vst [vmem:[#allocation97_spill] sm:$0xff] %v2448_v60  ;;  %v2452_v62 = vld [vmem:[#allocation13 + $0x1a0] sm:$0xff]  ;;  %v2454_v63 = vld [vmem:[#allocation13 + $0x1a8] sm:$0xff] }
  0xb3   :  { %2927 = vst [vmem:[#allocation98_spill] sm:$0xff] %v2450_v61  ;;  %2928 = vst [vmem:[#allocation99_spill] sm:$0xff] %v2452_v62  ;;  %v2456_v0 = vld [vmem:[#allocation13 + $0x1b0] sm:$0xff]  ;;  %v2458_v51 = vld [vmem:[#allocation13 + $0x1b8] sm:$0xff] }
  0xb4   :  { %2929 = vst [vmem:[#allocation100_spill] sm:$0xff] %v2454_v63  ;;  %2930 = vst [vmem:[#allocation101_spill] sm:$0xff] %v2456_v0  ;;  %v2460_v55 = vld [vmem:[#allocation13 + $0x1c0] sm:$0xff]  ;;  %v2462_v53 = vld [vmem:[#allocation13 + $0x1c8] sm:$0xff] }
  0xb5   :  { %2931 = vst [vmem:[#allocation102_spill] sm:$0xff] %v2458_v51  ;;  %2932 = vst [vmem:[#allocation103_spill] sm:$0xff] %v2460_v55  ;;  %v2464_v57 = vld [vmem:[#allocation13 + $0x1d0] sm:$0xff]  ;;  %v2466_v58 = vld [vmem:[#allocation13 + $0x1d8] sm:$0xff] }
  0xb6   :  { %2933 = vst [vmem:[#allocation104_spill] sm:$0xff] %v2462_v53  ;;  %2934 = vst [vmem:[#allocation105_spill] sm:$0xff] %v2464_v57  ;;  %v2468_v59 = vld [vmem:[#allocation13 + $0x1e0] sm:$0xff]  ;;  %v2470_v60 = vld [vmem:[#allocation13 + $0x1e8] sm:$0xff] }
  0xb7   :  { %2935 = vst [vmem:[#allocation106_spill] sm:$0xff] %v2466_v58  ;;  %2936 = vst [vmem:[#allocation107_spill] sm:$0xff] %v2468_v59  ;;  %v2472_v61 = vld [vmem:[#allocation13 + $0x1f0] sm:$0xff]  ;;  %v2474_v62 = vld [vmem:[#allocation13 + $0x1f8] sm:$0xff] }
  0xb8   :  { %2937 = vst [vmem:[#allocation108_spill] sm:$0xff] %v2470_v60  ;;  %2938 = vst [vmem:[#allocation109_spill] sm:$0xff] %v2472_v61  ;;  %v119_v63 = vld [vmem:[#allocation8 + $0x8] sm:$0xff]  ;;  %v121_v49 = vld [vmem:[#allocation8 + $0x18] sm:$0xff] }
  0xb9   :  { %2939 = vst [vmem:[#allocation110_spill] sm:$0xff] %v2474_v62  ;;  %v127_v0 = vld [vmem:[#allocation8 + $0x48] sm:$0xff]  ;;  %v129_v51 = vld [vmem:[#allocation8 + $0x58] sm:$0xff]  ;;  %v118_v52 = vld [vmem:[#allocation8] sm:$0xff] }
  0xba   :  { %v1546_v56 = vpack.c.bf16 %v127_v0, %v119_v63  ;;  %v1550_v55 = vpack.c.bf16 %v129_v51, %v121_v49  ;;  %v126_v53 = vld [vmem:[#allocation8 + $0x40] sm:$0xff]  ;;  %v120_v47 = vld [vmem:[#allocation8 + $0x10] sm:$0xff]  ;;  %v123_v59 = vld [vmem:[#allocation8 + $0x28] sm:$0xff] }
  0xbb   :  { %v1548_v57 = vpack.c.bf16 %v126_v53, %v118_v52  ;;  %v128_v43 = vld [vmem:[#allocation8 + $0x50] sm:$0xff]  ;;  %v2476_v58 = vld [vmem:[#allocation5] sm:$0xff]  ;;  %v131_v61 = vld [vmem:[#allocation8 + $0x68] sm:$0xff] }
  0xbc   :  { %1547 = vmatprep.subr.bf16.mxu0 %v1546_v56  ;;  %1551 = vmatprep.subr.bf16.mxu1 %v1550_v55  ;;  %v1552_v60 = vpack.c.bf16 %v128_v43, %v120_v47  ;;  %v125_v54 = vld [vmem:[#allocation8 + $0x38] sm:$0xff]  ;;  %v1554_v50 = vpack.c.bf16 %v131_v61, %v123_v59  ;;  %v122_v0 = vld [vmem:[#allocation8 + $0x20] sm:$0xff]  ;;  %v124_v51 = vld [vmem:[#allocation8 + $0x30] sm:$0xff]  ;;  %v2940_v47 = vmov 0.0  }
  0xbd   :  { %v133_v62 = vld [vmem:[#allocation8 + $0x78] sm:$0xff]  ;;  %1549 = vmatpush1.bf16.msra.mxu0 %v1548_v57  ;;  %v130_v49 = vld [vmem:[#allocation8 + $0x60] sm:$0xff]  ;;  %v132_v52 = vld [vmem:[#allocation8 + $0x70] sm:$0xff] }
  0xbe   :  { %v1558_v45 = vpack.c.bf16 %v133_v62, %v125_v54  ;;  %1553 = vmatpush1.bf16.msra.mxu1 %v1552_v60  ;;  %v1556_v63 = vpack.c.bf16 %v130_v49, %v122_v0  ;;  %1555 = vmatprep.subr.bf16.mxu0 %v1554_v50  ;;  %v1560_v53 = vpack.c.bf16 %v132_v52, %v124_v51  ;;  %v264_v43 = vld [vmem:[#allocation5 + $0x8] sm:$0xff]  ;;  %v266_v50 = vld [vmem:[#allocation5 + $0x18] sm:$0xff]  ;;  %v267_v54 = vld [vmem:[#allocation5 + $0x20] sm:$0xff] }
  0xbf   :  { %v268_v55 = vld [vmem:[#allocation5 + $0x28] sm:$0xff]  ;;  %v269_v56 = vld [vmem:[#allocation5 + $0x30] sm:$0xff]  ;;  %v270_v57 = vld [vmem:[#allocation5 + $0x38] sm:$0xff] }
  0xc0   :  { %1559 = vmatprep.subr.bf16.mxu1 %v1558_v45  ;;  %1439 = vmatmul.mubr.msk.f32.vlgmr.msra.gmra.mrb[0].mxu0 %vm312_vm0, %v2476_v58  ;;  %v265_v45 = vld [vmem:[#allocation5 + $0x10] sm:$0xff]  ;;  %v2547_v61 = vld [vmem:[#allocation10] sm:$0xff] }
  0xc1   :  { %1447 = vmatmul.mubr.msk.f32.vlgmr.msra.gmra.mrb[0].mxu1 %vm312_vm0, %v2476_v58  ;;  %1557 = vmatpush1.bf16.msra.mxu0 %v1556_v63 }
  0xc2   :  { %1561 = vmatpush1.bf16.msra.mxu1 %v1560_v53  ;;  %407 = vmatprep.mubr.f32.mxu0 %v2940_v47 }
  0xc3   :  { %520 = vmatprep.mubr.f32.mxu1 %v2940_v47 }
  0xc4   :  { %1440 = vmatmul.mubr.msk.f32.gmra.mrb[2].mxu0 %vm312_vm0, %v264_v43 }
  0xc5   :  { %1448 = vmatmul.mubr.msk.f32.gmra.mrb[2].mxu1 %vm312_vm0, %v264_v43  ;;  %413 = vmatprep.mubr.f32.mxu0 %v2940_v47 }
  0xc6   :  { %526 = vmatprep.mubr.f32.mxu1 %v2940_v47 }
  0xc8   :  { %1441 = vmatmul.mubr.msk.f32.gmra.mrb[4].mxu0 %vm312_vm0, %v265_v45 }
  0xc9   :  { %1449 = vmatmul.mubr.msk.f32.gmra.mrb[4].mxu1 %vm312_vm0, %v265_v45  ;;  %419 = vmatprep.mubr.f32.mxu0 %v2940_v47 }
  0xca   :  { %532 = vmatprep.mubr.f32.mxu1 %v2940_v47 }
  0xcc   :  { %1442 = vmatmul.mubr.msk.f32.gmra.mrb[6].mxu0 %vm312_vm0, %v266_v50 }
  0xcd   :  { %1450 = vmatmul.mubr.msk.f32.gmra.mrb[6].mxu1 %vm312_vm0, %v266_v50  ;;  %425 = vmatprep.mubr.f32.mxu0 %v2940_v47 }
  0xce   :  { %538 = vmatprep.mubr.f32.mxu1 %v2940_v47 }
  0xd0   :  { %1443 = vmatmul.mubr.msk.f32.gmra.mrb[8].mxu0 %vm312_vm0, %v267_v54 }
  0xd1   :  { %1451 = vmatmul.mubr.msk.f32.gmra.mrb[8].mxu1 %vm312_vm0, %v267_v54  ;;  %431 = vmatprep.mubr.f32.mxu0 %v2940_v47 }
  0xd2   :  { %544 = vmatprep.mubr.f32.mxu1 %v2940_v47 }
  0xd4   :  { %1444 = vmatmul.mubr.msk.f32.gmra.mrb[10].mxu0 %vm312_vm0, %v268_v55 }
  0xd5   :  { %1452 = vmatmul.mubr.msk.f32.gmra.mrb[10].mxu1 %vm312_vm0, %v268_v55  ;;  %437 = vmatprep.mubr.f32.mxu0 %v2940_v47 }
  0xd6   :  { %550 = vmatprep.mubr.f32.mxu1 %v2940_v47 }
  0xd8   :  { %1445 = vmatmul.mubr.msk.f32.gmra.mrb[12].mxu0 %vm312_vm0, %v269_v56 }
  0xd9   :  { %1453 = vmatmul.mubr.msk.f32.gmra.mrb[12].mxu1 %vm312_vm0, %v269_v56  ;;  %443 = vmatprep.mubr.f32.mxu0 %v2940_v47 }
  0xda   :  { %556 = vmatprep.mubr.f32.mxu1 %v2940_v47 }
  0xdc   :  { %1446 = vmatmul.mubr.msk.f32.gmra.mrb[14].mxu0 %vm312_vm0, %v270_v57 }
  0xdd   :  { %1454 = vmatmul.mubr.msk.f32.gmra.mrb[14].mxu1 %vm312_vm0, %v270_v57  ;;  %627 = vmatprep.mubr.f32.mxu0 %v2940_v47 }
  0xde   :  { %740 = vmatprep.mubr.f32.mxu1 %v2940_v47 }
  0xe0   :  { %1455 = vmatmul.mubr.msk.f32.vlgmr.msra.gmra.mrb[16].mxu0 %vm312_vm0, %v2476_v58 }
  0xe1   :  { %1463 = vmatmul.mubr.msk.f32.vlgmr.msra.gmra.mrb[16].mxu1 %vm312_vm0, %v2476_v58  ;;  %633 = vmatprep.mubr.f32.mxu0 %v2940_v47  ;;  %v272_v58 = vlaneseq }
  0xe2   :  { %746 = vmatprep.mubr.f32.mxu1 %v2940_v47 }
  0xe3   :  { %v2544_v59 = vshrl.u32 %v272_v58, 7 }
  0xe4   :  { %1456 = vmatmul.mubr.msk.f32.gmra.mrb[18].mxu0 %vm312_vm0, %v264_v43 }
  0xe5   :  { %1464 = vmatmul.mubr.msk.f32.gmra.mrb[18].mxu1 %vm312_vm0, %v264_v43  ;;  %639 = vmatprep.mubr.f32.mxu0 %v2940_v47  ;;  %v274_v60 = vsub.s32 0, %v2544_v59  ;;  %v282_v62 = vsub.s32 2, %v2544_v59  ;;  %v278_v0 = vsub.s32 1, %v2544_v59  ;;  %v286_v49 = vsub.s32 3, %v2544_v59 }
  0xe6   :  { %752 = vmatprep.mubr.f32.mxu1 %v2940_v47 }
  0xe7   :  { %v2553_v51 = vrot.slane %v2547_v61, %v274_v60  ;;  %v2556_v63 = vrot.slane %v2547_v61, %v282_v62  ;;  %v2559_v52 = vrot.slane %v2547_v61, %v278_v0  ;;  %v2562_v53 = vrot.slane %v2547_v61, %v286_v49 }
  0xe8   :  { %1457 = vmatmul.mubr.msk.f32.gmra.mrb[20].mxu0 %vm312_vm0, %v265_v45 }
  0xe9   :  { %1465 = vmatmul.mubr.msk.f32.gmra.mrb[20].mxu1 %vm312_vm0, %v265_v45  ;;  %645 = vmatprep.mubr.f32.mxu0 %v2940_v47 }
  0xea   :  { %758 = vmatprep.mubr.f32.mxu1 %v2940_v47 }
  0xec   :  { %1458 = vmatmul.mubr.msk.f32.gmra.mrb[22].mxu0 %vm312_vm0, %v266_v50 }
  0xed   :  { %1466 = vmatmul.mubr.msk.f32.gmra.mrb[22].mxu1 %vm312_vm0, %v266_v50  ;;  %651 = vmatprep.mubr.f32.mxu0 %v2940_v47 }
  0xee   :  { %764 = vmatprep.mubr.f32.mxu1 %v2940_v47 }
  0xf0   :  { %1459 = vmatmul.mubr.msk.f32.gmra.mrb[24].mxu0 %vm312_vm0, %v267_v54 }
  0xf1   :  { %1467 = vmatmul.mubr.msk.f32.gmra.mrb[24].mxu1 %vm312_vm0, %v267_v54  ;;  %657 = vmatprep.mubr.f32.mxu0 %v2940_v47 }
  0xf2   :  { %770 = vmatprep.mubr.f32.mxu1 %v2940_v47 }
  0xf4   :  { %1460 = vmatmul.mubr.msk.f32.gmra.mrb[26].mxu0 %vm312_vm0, %v268_v55 }
  0xf5   :  { %1468 = vmatmul.mubr.msk.f32.gmra.mrb[26].mxu1 %vm312_vm0, %v268_v55  ;;  %663 = vmatprep.mubr.f32.mxu0 %v2940_v47 }
  0xf6   :  { %776 = vmatprep.mubr.f32.mxu1 %v2940_v47 }
  0xf8   :  { %1461 = vmatmul.mubr.msk.f32.gmra.mrb[28].mxu0 %vm312_vm0, %v269_v56 }
  0xf9   :  { %1469 = vmatmul.mubr.msk.f32.gmra.mrb[28].mxu1 %vm312_vm0, %v269_v56  ;;  %669 = vmatprep.mubr.f32.mxu0 %v2940_v47 }
  0xfa   :  { %782 = vmatprep.mubr.f32.mxu1 %v2940_v47 }
  0xfc   :  { %1462 = vmatmul.mubr.msk.f32.gmra.mrb[30].mxu0 %vm312_vm0, %v270_v57 }
  0xfd   :  { %1470 = vmatmul.mubr.msk.f32.gmra.mrb[30].mxu1 %vm312_vm0, %v270_v57 }
 0x193   :  { %v403_v43 = vpop.f32.mrb[0].mxu0 }
 0x194   :  { %v404_v47 = vadd.f32 %v403_v43, %v2553_v51  ;;  %v516_v45 = vpop.f32.mrb[0].mxu1  ;;  %v405_v50 = vpop.f32.mrb[1].mxu0 }
 0x195   :  { %v517_v54 = vadd.f32 %v516_v45, %v2556_v63  ;;  %v406_v55 = vadd.f32 %v405_v50, %v2559_v52  ;;  %v518_v56 = vpop.f32.mrb[1].mxu1 }
 0x196   :  { %789 = vst [vmem:[#allocation2] sm:$0xff] %v404_v47  ;;  %v519_v57 = vadd.f32 %v518_v56, %v2562_v53 }
 0x197   :  { %791 = vst [vmem:[#allocation2 + $0x10] sm:$0xff] %v517_v54  ;;  %790 = vst [vmem:[#allocation2 + $0x8] sm:$0xff] %v406_v55  ;;  %v409_v58 = vpop.f32.mrb[2].mxu0 }
 0x198   :  { %792 = vst [vmem:[#allocation2 + $0x18] sm:$0xff] %v519_v57  ;;  %v410_v60 = vadd.f32 %v409_v58, %v2553_v51  ;;  %v522_v62 = vpop.f32.mrb[2].mxu1  ;;  %v411_v0 = vpop.f32.mrb[3].mxu0 }
 0x199   :  { %v523_v49 = vadd.f32 %v522_v62, %v2556_v63  ;;  %v412_v43 = vadd.f32 %v411_v0, %v2559_v52  ;;  %v524_v41 = vpop.f32.mrb[3].mxu1 }
 0x19a   :  { %793 = vst [vmem:[#allocation2 + $0x20] sm:$0xff] %v410_v60  ;;  %v525_v45 = vadd.f32 %v524_v41, %v2562_v53 }
 0x19b   :  { %795 = vst [vmem:[#allocation2 + $0x30] sm:$0xff] %v523_v49  ;;  %794 = vst [vmem:[#allocation2 + $0x28] sm:$0xff] %v412_v43  ;;  %v415_v47 = vpop.f32.mrb[4].mxu0 }
 0x19c   :  { %796 = vst [vmem:[#allocation2 + $0x38] sm:$0xff] %v525_v45  ;;  %v416_v50 = vadd.f32 %v415_v47, %v2553_v51  ;;  %v528_v54 = vpop.f32.mrb[4].mxu1  ;;  %v417_v55 = vpop.f32.mrb[5].mxu0 }
 0x19d   :  { %v529_v56 = vadd.f32 %v528_v54, %v2556_v63  ;;  %v418_v57 = vadd.f32 %v417_v55, %v2559_v52  ;;  %v530_v58 = vpop.f32.mrb[5].mxu1 }
 0x19e   :  { %797 = vst [vmem:[#allocation2 + $0x40] sm:$0xff] %v416_v50  ;;  %v531_v62 = vadd.f32 %v530_v58, %v2562_v53 }
 0x19f   :  { %799 = vst [vmem:[#allocation2 + $0x50] sm:$0xff] %v529_v56  ;;  %798 = vst [vmem:[#allocation2 + $0x48] sm:$0xff] %v418_v57  ;;  %v421_v60 = vpop.f32.mrb[6].mxu0 }
 0x1a0   :  { %800 = vst [vmem:[#allocation2 + $0x58] sm:$0xff] %v531_v62  ;;  %v422_v41 = vadd.f32 %v421_v60, %v2553_v51  ;;  %v534_v0 = vpop.f32.mrb[6].mxu1  ;;  %v423_v49 = vpop.f32.mrb[7].mxu0 }
 0x1a1   :  { %v535_v43 = vadd.f32 %v534_v0, %v2556_v63  ;;  %v424_v45 = vadd.f32 %v423_v49, %v2559_v52  ;;  %v536_v47 = vpop.f32.mrb[7].mxu1 }
 0x1a2   :  { %801 = vst [vmem:[#allocation2 + $0x60] sm:$0xff] %v422_v41  ;;  %v537_v54 = vadd.f32 %v536_v47, %v2562_v53 }
 0x1a3   :  { %803 = vst [vmem:[#allocation2 + $0x70] sm:$0xff] %v535_v43  ;;  %802 = vst [vmem:[#allocation2 + $0x68] sm:$0xff] %v424_v45  ;;  %v427_v50 = vpop.f32.mrb[8].mxu0 }
 0x1a4   :  { %804 = vst [vmem:[#allocation2 + $0x78] sm:$0xff] %v537_v54  ;;  %v428_v55 = vadd.f32 %v427_v50, %v2553_v51  ;;  %v540_v56 = vpop.f32.mrb[8].mxu1  ;;  %v429_v57 = vpop.f32.mrb[9].mxu0 }
 0x1a5   :  { %v541_v58 = vadd.f32 %v540_v56, %v2556_v63  ;;  %v430_v62 = vadd.f32 %v429_v57, %v2559_v52  ;;  %v542_v60 = vpop.f32.mrb[9].mxu1 }
 0x1a6   :  { %805 = vst [vmem:[#allocation2 + $0x80] sm:$0xff] %v428_v55  ;;  %v543_v0 = vadd.f32 %v542_v60, %v2562_v53  ;;  %v290_v60 = vsub.s32 4, %v2544_v59 }
 0x1a7   :  { %807 = vst [vmem:[#allocation2 + $0x90] sm:$0xff] %v541_v58  ;;  %806 = vst [vmem:[#allocation2 + $0x88] sm:$0xff] %v430_v62  ;;  %v433_v41 = vpop.f32.mrb[10].mxu0 }
 0x1a8   :  { %808 = vst [vmem:[#allocation2 + $0x98] sm:$0xff] %v543_v0  ;;  %v434_v49 = vadd.f32 %v433_v41, %v2553_v51  ;;  %v546_v43 = vpop.f32.mrb[10].mxu1  ;;  %v435_v45 = vpop.f32.mrb[11].mxu0 }
 0x1a9   :  { %v547_v47 = vadd.f32 %v546_v43, %v2556_v63  ;;  %v436_v54 = vadd.f32 %v435_v45, %v2559_v52  ;;  %v548_v50 = vpop.f32.mrb[11].mxu1  ;;  %v298_v45 = vsub.s32 6, %v2544_v59 }
 0x1aa   :  { %809 = vst [vmem:[#allocation2 + $0xa0] sm:$0xff] %v434_v49  ;;  %v549_v56 = vadd.f32 %v548_v50, %v2562_v53  ;;  %v294_v49 = vsub.s32 5, %v2544_v59 }
 0x1ab   :  { %811 = vst [vmem:[#allocation2 + $0xb0] sm:$0xff] %v547_v47  ;;  %810 = vst [vmem:[#allocation2 + $0xa8] sm:$0xff] %v436_v54  ;;  %v439_v55 = vpop.f32.mrb[12].mxu0  ;;  %v302_v54 = vsub.s32 7, %v2544_v59 }
 0x1ac   :  { %812 = vst [vmem:[#allocation2 + $0xb8] sm:$0xff] %v549_v56  ;;  %v440_v57 = vadd.f32 %v439_v55, %v2553_v51  ;;  %v552_v58 = vpop.f32.mrb[12].mxu1  ;;  %v441_v62 = vpop.f32.mrb[13].mxu0  ;;  %v2606_v59 = vrot.slane %v2547_v61, %v294_v49 }
 0x1ad   :  { %v553_v0 = vadd.f32 %v552_v58, %v2556_v63  ;;  %v442_v41 = vadd.f32 %v441_v62, %v2559_v52  ;;  %v554_v43 = vpop.f32.mrb[13].mxu1  ;;  %v2598_v62 = vrot.slane %v2547_v61, %v290_v60 }
 0x1ae   :  { %813 = vst [vmem:[#allocation2 + $0xc0] sm:$0xff] %v440_v57  ;;  %v555_v47 = vadd.f32 %v554_v43, %v2562_v53  ;;  %v2603_v43 = vrot.slane %v2547_v61, %v298_v45 }
 0x1af   :  { %815 = vst [vmem:[#allocation2 + $0xd0] sm:$0xff] %v553_v0  ;;  %814 = vst [vmem:[#allocation2 + $0xc8] sm:$0xff] %v442_v41  ;;  %v445_v50 = vpop.f32.mrb[14].mxu0 }
 0x1b0   :  { %816 = vst [vmem:[#allocation2 + $0xd8] sm:$0xff] %v555_v47  ;;  %v446_v56 = vadd.f32 %v445_v50, %v2553_v51  ;;  %v558_v55 = vpop.f32.mrb[14].mxu1  ;;  %v447_v58 = vpop.f32.mrb[15].mxu0  ;;  %v2610_v51 = vrot.slane %v2547_v61, %v302_v54 }
 0x1b1   :  { %v559_v48 = vadd.f32 %v558_v55, %v2556_v63  ;;  %v448_v44 = vadd.f32 %v447_v58, %v2559_v52  ;;  %v560_v57 = vpop.f32.mrb[15].mxu1 }
 0x1b2   :  { %817 = vst [vmem:[#allocation2 + $0xe0] sm:$0xff] %v446_v56  ;;  %v561_v0 = vadd.f32 %v560_v57, %v2562_v53 }
 0x1b3   :  { %819 = vst [vmem:[#allocation2 + $0xf0] sm:$0xff] %v559_v48  ;;  %818 = vst [vmem:[#allocation2 + $0xe8] sm:$0xff] %v448_v44  ;;  %v629_v60 = vpop.f32.mrb[16].mxu0 }
 0x1b4   :  { %820 = vst [vmem:[#allocation2 + $0xf8] sm:$0xff] %v561_v0  ;;  %v630_v63 = vadd.f32 %v629_v60, %v2598_v62  ;;  %v742_v52 = vpop.f32.mrb[16].mxu1  ;;  %v631_v41 = vpop.f32.mrb[17].mxu0 }
 0x1b5   :  { %v743_v45 = vadd.f32 %v742_v52, %v2603_v43  ;;  %v632_v47 = vadd.f32 %v631_v41, %v2606_v59  ;;  %v744_v49 = vpop.f32.mrb[17].mxu1 }
 0x1b6   :  { %821 = vst [vmem:[#allocation3] sm:$0xff] %v630_v63  ;;  %v745_v50 = vadd.f32 %v744_v49, %v2610_v51 }
 0x1b7   :  { %823 = vst [vmem:[#allocation3 + $0x10] sm:$0xff] %v743_v45  ;;  %822 = vst [vmem:[#allocation3 + $0x8] sm:$0xff] %v632_v47  ;;  %v635_v61 = vpop.f32.mrb[18].mxu0 }
 0x1b8   :  { %824 = vst [vmem:[#allocation3 + $0x18] sm:$0xff] %v745_v50  ;;  %v636_v44 = vadd.f32 %v635_v61, %v2598_v62  ;;  %v748_v48 = vpop.f32.mrb[18].mxu1  ;;  %v637_v53 = vpop.f32.mrb[19].mxu0 }
 0x1b9   :  { %v749_v54 = vadd.f32 %v748_v48, %v2603_v43  ;;  %v638_v56 = vadd.f32 %v637_v53, %v2606_v59  ;;  %v750_v55 = vpop.f32.mrb[19].mxu1 }
 0x1ba   :  { %825 = vst [vmem:[#allocation3 + $0x20] sm:$0xff] %v636_v44  ;;  %v751_v58 = vadd.f32 %v750_v55, %v2610_v51 }
 0x1bb   :  { %827 = vst [vmem:[#allocation3 + $0x30] sm:$0xff] %v749_v54  ;;  %826 = vst [vmem:[#allocation3 + $0x28] sm:$0xff] %v638_v56  ;;  %v641_v57 = vpop.f32.mrb[20].mxu0 }
 0x1bc   :  { %828 = vst [vmem:[#allocation3 + $0x38] sm:$0xff] %v751_v58  ;;  %v642_v0 = vadd.f32 %v641_v57, %v2598_v62  ;;  %v754_v60 = vpop.f32.mrb[20].mxu1  ;;  %v643_v63 = vpop.f32.mrb[21].mxu0 }
 0x1bd   :  { %v755_v52 = vadd.f32 %v754_v60, %v2603_v43  ;;  %v644_v41 = vadd.f32 %v643_v63, %v2606_v59  ;;  %v756_v45 = vpop.f32.mrb[21].mxu1 }
 0x1be   :  { %829 = vst [vmem:[#allocation3 + $0x40] sm:$0xff] %v642_v0  ;;  %v757_v47 = vadd.f32 %v756_v45, %v2610_v51 }
 0x1bf   :  { %831 = vst [vmem:[#allocation3 + $0x50] sm:$0xff] %v755_v52  ;;  %830 = vst [vmem:[#allocation3 + $0x48] sm:$0xff] %v644_v41  ;;  %v647_v49 = vpop.f32.mrb[22].mxu0 }
 0x1c0   :  { %832 = vst [vmem:[#allocation3 + $0x58] sm:$0xff] %v757_v47  ;;  %v648_v50 = vadd.f32 %v647_v49, %v2598_v62  ;;  %v760_v61 = vpop.f32.mrb[22].mxu1  ;;  %v649_v44 = vpop.f32.mrb[23].mxu0 }
 0x1c1   :  { %v761_v48 = vadd.f32 %v760_v61, %v2603_v43  ;;  %v650_v53 = vadd.f32 %v649_v44, %v2606_v59  ;;  %v762_v54 = vpop.f32.mrb[23].mxu1 }
 0x1c2   :  { %833 = vst [vmem:[#allocation3 + $0x60] sm:$0xff] %v648_v50  ;;  %v763_v56 = vadd.f32 %v762_v54, %v2610_v51 }
 0x1c3   :  { %835 = vst [vmem:[#allocation3 + $0x70] sm:$0xff] %v761_v48  ;;  %834 = vst [vmem:[#allocation3 + $0x68] sm:$0xff] %v650_v53  ;;  %v653_v55 = vpop.f32.mrb[24].mxu0 }
 0x1c4   :  { %836 = vst [vmem:[#allocation3 + $0x78] sm:$0xff] %v763_v56  ;;  %v654_v58 = vadd.f32 %v653_v55, %v2598_v62  ;;  %v766_v57 = vpop.f32.mrb[24].mxu1  ;;  %v655_v0 = vpop.f32.mrb[25].mxu0 }
 0x1c5   :  { %v767_v60 = vadd.f32 %v766_v57, %v2603_v43  ;;  %v656_v63 = vadd.f32 %v655_v0, %v2606_v59  ;;  %v768_v52 = vpop.f32.mrb[25].mxu1 }
 0x1c6   :  { %837 = vst [vmem:[#allocation3 + $0x80] sm:$0xff] %v654_v58  ;;  %v769_v41 = vadd.f32 %v768_v52, %v2610_v51 }
 0x1c7   :  { %839 = vst [vmem:[#allocation3 + $0x90] sm:$0xff] %v767_v60  ;;  %838 = vst [vmem:[#allocation3 + $0x88] sm:$0xff] %v656_v63  ;;  %v659_v45 = vpop.f32.mrb[26].mxu0 }
 0x1c8   :  { %840 = vst [vmem:[#allocation3 + $0x98] sm:$0xff] %v769_v41  ;;  %v660_v47 = vadd.f32 %v659_v45, %v2598_v62  ;;  %v772_v49 = vpop.f32.mrb[26].mxu1  ;;  %v661_v50 = vpop.f32.mrb[27].mxu0 }
 0x1c9   :  { %v773_v61 = vadd.f32 %v772_v49, %v2603_v43  ;;  %v662_v44 = vadd.f32 %v661_v50, %v2606_v59  ;;  %v774_v48 = vpop.f32.mrb[27].mxu1 }
 0x1ca   :  { %841 = vst [vmem:[#allocation3 + $0xa0] sm:$0xff] %v660_v47  ;;  %v775_v53 = vadd.f32 %v774_v48, %v2610_v51  ;;  %v2644_v48 = vmov 0.0  }
 0x1cb   :  { %843 = vst [vmem:[#allocation3 + $0xb0] sm:$0xff] %v773_v61  ;;  %842 = vst [vmem:[#allocation3 + $0xa8] sm:$0xff] %v662_v44  ;;  %v665_v54 = vpop.f32.mrb[28].mxu0 }
 0x1cc   :  { %844 = vst [vmem:[#allocation3 + $0xb8] sm:$0xff] %v775_v53  ;;  %v666_v56 = vadd.f32 %v665_v54, %v2598_v62  ;;  %v778_v55 = vpop.f32.mrb[28].mxu1  ;;  %v667_v58 = vpop.f32.mrb[29].mxu0  ;;  %v2646_v53 = vmov 0.0   ;;  %v2648_v54 = vmov 0.0  }
 0x1cd   :  { %v779_v57 = vadd.f32 %v778_v55, %v2603_v43  ;;  %v668_v0 = vadd.f32 %v667_v58, %v2606_v59  ;;  %v780_v60 = vpop.f32.mrb[29].mxu1 }
 0x1ce   :  { %845 = vst [vmem:[#allocation3 + $0xc0] sm:$0xff] %v666_v56  ;;  %v781_v63 = vadd.f32 %v780_v60, %v2610_v51 }
 0x1cf   :  { %847 = vst [vmem:[#allocation3 + $0xd0] sm:$0xff] %v779_v57  ;;  %846 = vst [vmem:[#allocation3 + $0xc8] sm:$0xff] %v668_v0  ;;  %v671_v52 = vpop.f32.mrb[30].mxu0 }
 0x1d0   :  { %848 = vst [vmem:[#allocation3 + $0xd8] sm:$0xff] %v781_v63  ;;  %v672_v41 = vadd.f32 %v671_v52, %v2598_v62  ;;  %v784_v45 = vpop.f32.mrb[30].mxu1  ;;  %v673_v47 = vpop.f32.mrb[31].mxu0  ;;  %v2650_v62 = vmov 0.0  }
 0x1d1   :  { %v785_v49 = vadd.f32 %v784_v45, %v2603_v43  ;;  %v674_v50 = vadd.f32 %v673_v47, %v2606_v59  ;;  %v786_v61 = vpop.f32.mrb[31].mxu1 }
 0x1d2   :  { %849 = vst [vmem:[#allocation3 + $0xe0] sm:$0xff] %v672_v41  ;;  %v787_v44 = vadd.f32 %v786_v61, %v2610_v51 }
 0x1d3   :  { %851 = vst [vmem:[#allocation3 + $0xf0] sm:$0xff] %v785_v49  ;;  %850 = vst [vmem:[#allocation3 + $0xe8] sm:$0xff] %v674_v50 }
 0x1d4   :  { %852 = vst [vmem:[#allocation3 + $0xf8] sm:$0xff] %v787_v44 }
 0x1d5 LB: > { %v2941_v2 = vld [vmem:[#allocation24_spill] sm:$0xff]  ;;  %v2942_v1 = vld [vmem:[#allocation23_spill] sm:$0xff]  ;;  %v1566_v51 = vpack.c.bf16 %v2246_v14, %v2238_v10  ;;  %v1594_v56 = vpack.c.bf16 %v2234_v8, %v2226_v4  ;;  %v1596_v55 = vpack.c.bf16 %v2232_v7, %v2224_v3  ;;  %v1568_v58 = vpack.c.bf16 %v2244_v13, %v2236_v9  ;;  %s1486_s11 = sshll.u32 %s2050_s6, 5  ;;  %s863_s8 = ssub.s32 7, %s2050_s6  ;;  %s2050_s6 = sphi %s2652_s6, %s858_s6   ;;  %v2046_v62 = vphi %v2650_v62, %v1040_v62   ;;  %v2042_v54 = vphi %v2648_v54, %v1038_v54   ;;  %v2038_v53 = vphi %v2646_v53, %v1217_v53   ;;  %v2034_v48 = vphi %v2644_v48, %v1215_v48  }
 0x1d6   : > { %v1562_v43 = vpack.c.bf16 %v2230_v6, %v2941_v2  ;;  %v1564_v59 = vpack.c.bf16 %v2228_v5, %v2942_v1  ;;  %v1598_v57 = vpack.c.bf16 %v2250_v16, %v2242_v12  ;;  %v1570_v0 = vpack.c.bf16 %v2262_v22, %v2254_v18  ;;  %v2954_v2 = vld [vmem:[#allocation35_spill] sm:$0xff]  ;;  %s866_s0 = scalar_lea.vmem [#allocation2], %s1486_s11  ;;  %s1487_s20 = sshll.u32 %s863_s8, 5 }
 0x1d7   : > { %1595 = vmatprep.subr.bf16.mxu1 %v1594_v56  ;;  %v1600_v60 = vpack.c.bf16 %v2248_v15, %v2240_v11  ;;  %v1602_v63 = vpack.c.bf16 %v2266_v24, %v2258_v20  ;;  %v2850_v52 = vmov 0.0   ;;  %v1572_v41 = vpack.c.bf16 %v2260_v21, %v2252_v17  ;;  %s1043_s21 = scalar_lea.vmem [#allocation3], %s1487_s20  ;;  %s1488_s22 = sshll.u32 %s2050_s6, 4 }
 0x1d8   : > { %1563 = vmatprep.subr.bf16.mxu0 %v1562_v43  ;;  %1597 = vmatpush1.bf16.msra.mxu1 %v1596_v55  ;;  %v1574_v45 = vpack.c.bf16 %v2278_v30, %v2270_v26  ;;  %v1604_v47 = vpack.c.bf16 %v2264_v23, %v2256_v19  ;;  %v1606_v49 = vpack.c.bf16 %v2282_v32, %v2274_v28  ;;  %v2943_v55 = vld [vmem:[#allocation27_spill] sm:$0xff]  ;;  %s1220_s23 = scalar_lea.vmem [#allocation4], %s1488_s22  ;;  %s1489_s24 = sshll.u32 %s863_s8, 4 }
 0x1d9   : > { %1565 = vmatpush1.bf16.msra.mxu0 %v1564_v59  ;;  %1599 = vmatprep.subr.bf16.mxu1 %v1598_v57  ;;  %v1576_v50 = vpack.c.bf16 %v2276_v29, %v2268_v25  ;;  %v1578_v61 = vpack.c.bf16 %v2294_v38, %v2286_v34  ;;  %v1608_v44 = vpack.c.bf16 %v2280_v31, %v2272_v27  ;;  %s1224_s26 = scalar_lea.vmem [#allocation4], %s1489_s24  ;;  %s858_s6 = sadd.s32 1, %s2050_s6  }
 0x1da   : > { %1567 = vmatprep.subr.bf16.mxu0 %v1566_v51  ;;  %935 = vmatprep.mubr.f32.mxu0 %v2850_v52  ;;  %v1610_v43 = vpack.c.bf16 %v2298_v40, %v2290_v36  ;;  %v1580_v59 = vpack.c.bf16 %v2292_v37, %v2284_v33  ;;  %v1582_v51 = vpack.c.bf16 %v2310_v46, %v2302_v42  ;;  %p855_p0 = scmp.ge.s32.totalorder %s858_s6, 8  }
 0x1db   : > { %1006 = vmatprep.mubr.f32.mxu1 %v2850_v52  ;;  %v1612_v56 = vpack.c.bf16 %v2296_v39, %v2288_v35  ;;  %v2952_v52 = vld [vmem:[#allocation38_spill] sm:$0xff]  ;;  %v1231_v5 = vld [vmem:[#allocation14 + $0x28] sm:$0xff] (%p855_p0)  ;;  %v1248_v6 = vld [vmem:[#allocation14 + $0xb0] sm:$0xff] (%p855_p0)  ;;  %s2067_s27 = smov (%p855_p0), [#allocation17]  }
 0x1dc   : > { %1601 = vmatpush1.bf16.msra.mxu1 %v1600_v60  ;;  %v2946_v60 = vld [vmem:[#allocation28_spill] sm:$0xff]  ;;  %v1230_v4 = vld [vmem:[#allocation14 + $0x20] sm:$0xff] (%p855_p0)  ;;  %v1249_v7 = vld [vmem:[#allocation14 + $0xb8] sm:$0xff] (%p855_p0)  ;;  %s1399_s28 = sshll.u32 (%p855_p0), %s2067_s27, 4  ;;  %s1400_s28 = int_to_ptr.vmem [resolvable:$true] %s1399_s28 }
 0x1dd   : > { %1569 = vmatpush1.bf16.msra.mxu0 %v1568_v58  ;;  %1603 = vmatprep.subr.bf16.mxu1 %v1602_v63  ;;  %v2944_v58 = vld [vmem:[#allocation30_spill] sm:$0xff]  ;;  %v1700_v8 = vpack.c.bf16 (%p855_p0), %v1231_v5, %v1230_v4  ;;  %v1702_v9 = vpack.c.bf16 (%p855_p0), %v1249_v7, %v1248_v6  ;;  %v1232_v10 = vld [vmem:[#allocation14 + $0x30] sm:$0xff] (%p855_p0)  ;;  %v1251_v13 = vld [vmem:[#allocation14 + $0xc8] sm:$0xff] (%p855_p0)  ;;  %s1980_s5 = scalar_lea.vmem (%p855_p0), %s1400_s28, 1024  ;;  %p1985_p2 = scmp.lt.s32.totalorder (%p855_p0), %s1400_s28, %s1400_s28 }
 0x1de   : > { %1571 = vmatprep.subr.bf16.mxu0 %v1570_v0  ;;  %v1614_v57 = vpack.c.bf16 %v2944_v58, %v2943_v55  ;;  %v2945_v0 = vld [vmem:[#allocation25_spill] sm:$0xff]  ;;  %v2956_v58 = vld [vmem:[#allocation44_spill] sm:$0xff]  ;;  %v1250_v12 = vld [vmem:[#allocation14 + $0xc0] sm:$0xff] (%p855_p0)  ;;  %p1981_p1 = scmp.ne.s32.totalorder (%p855_p0), %s1400_s28, %s1980_s5  ;;  %p1986_p3 = scmp.lt.s32.totalorder (%p855_p0), %s1980_s5, %s1980_s5 }
 0x1df   : > { %v1584_v63 = vpack.c.bf16 %v2946_v60, %v2945_v0  ;;  %v2958_v60 = vld [vmem:[#allocation37_spill] sm:$0xff]  ;;  %v1706_v17 = vpack.c.bf16 (%p855_p0), %v1251_v13, %v1250_v12  ;;  %v1234_v18 = vld [vmem:[#allocation14 + $0x40] sm:$0xff] (%p855_p0)  ;;  %v1235_v19 = vld [vmem:[#allocation14 + $0x48] sm:$0xff] (%p855_p0) }
 0x1e0   : > { %1605 = vmatpush1.bf16.msra.mxu1 %v1604_v47  ;;  %v1233_v11 = vld [vmem:[#allocation14 + $0x38] sm:$0xff] (%p855_p0)  ;;  %v1252_v20 = vld [vmem:[#allocation14 + $0xd0] sm:$0xff] (%p855_p0)  ;;  %v1708_v22 = vpack.c.bf16 (%p855_p0), %v1235_v19, %v1234_v18  ;;  %v1254_v26 = vld [vmem:[#allocation14 + $0xe0] sm:$0xff] (%p855_p0)  ;;  %p1987_p4 = por (%p855_p0), %p1986_p3, %p1985_p2 }
 0x1e1   : > { %1573 = vmatpush1.bf16.msra.mxu0 %v1572_v41  ;;  %1607 = vmatprep.subr.bf16.mxu1 %v1606_v49  ;;  %v2947_v41 = vld [vmem:[#allocation32_spill] sm:$0xff]  ;;  %v2949_v49 = vld [vmem:[#allocation26_spill] sm:$0xff]  ;;  %v1704_v16 = vpack.c.bf16 (%p855_p0), %v1233_v11, %v1232_v10 }
 0x1e2   : > { %1575 = vmatprep.subr.bf16.mxu0 %v1574_v45  ;;  %v2948_v45 = vld [vmem:[#allocation36_spill] sm:$0xff]  ;;  %v1253_v21 = vld [vmem:[#allocation14 + $0xd8] sm:$0xff] (%p855_p0)  ;;  %v1238_v30 = vld [vmem:[#allocation14 + $0x60] sm:$0xff] (%p855_p0)  ;;  %p1988_p5 = pnand (%p855_p0), %p1987_p4, %p1981_p1 }
 0x1e3   : > { %v1586_v47 = vpack.c.bf16 %v2948_v45, %v2947_v41  ;;  %v2960_v45 = vld [vmem:[#allocation46_spill] sm:$0xff]  ;;  %v1710_v23 = vpack.c.bf16 (%p855_p0), %v1253_v21, %v1252_v20  ;;  %v1236_v24 = vld [vmem:[#allocation14 + $0x50] sm:$0xff] (%p855_p0)  ;;  %v1255_v27 = vld [vmem:[#allocation14 + $0xe8] sm:$0xff] (%p855_p0) }
 0x1e4   : > { %1609 = vmatpush1.bf16.msra.mxu1 %v1608_v44  ;;  %v2951_v44 = vld [vmem:[#allocation34_spill] sm:$0xff]  ;;  %v1714_v29 = vpack.c.bf16 (%p855_p0), %v1255_v27, %v1254_v26  ;;  %v1239_v31 = vld [vmem:[#allocation14 + $0x68] sm:$0xff] (%p855_p0)  ;;  %v1256_v32 = vld [vmem:[#allocation14 + $0xf0] sm:$0xff] (%p855_p0) }
 0x1e5   : > { %1577 = vmatpush1.bf16.msra.mxu0 %v1576_v50  ;;  %1611 = vmatprep.subr.bf16.mxu1 %v1610_v43  ;;  %v2950_v50 = vld [vmem:[#allocation29_spill] sm:$0xff]  ;;  %v1618_v1 = vpack.c.bf16 %v2952_v52, %v2951_v44  ;;  %v2953_v43 = vld [vmem:[#allocation31_spill] sm:$0xff]  ;;  %v2964_v44 = vld [vmem:[#allocation52_spill] sm:$0xff]  ;;  %v1716_v34 = vpack.c.bf16 (%p855_p0), %v1239_v31, %v1238_v30 }
 0x1e6   : > { %1579 = vmatprep.subr.bf16.mxu0 %v1578_v61  ;;  %v1616_v61 = vpack.c.bf16 %v2950_v50, %v2949_v49  ;;  %v1588_v55 = vpack.c.bf16 %v2954_v2, %v2953_v43  ;;  %v2962_v50 = vld [vmem:[#allocation43_spill] sm:$0xff]  ;;  %v2966_v43 = vld [vmem:[#allocation45_spill] sm:$0xff] }
 0x1e7   :  { %v1237_v25 = vld [vmem:[#allocation14 + $0x58] sm:$0xff] (%p855_p0)  ;;  %v1240_v36 = vld [vmem:[#allocation14 + $0x70] sm:$0xff] (%p855_p0) }
 0x1e8   : > { %1613 = vmatpush1.bf16.msra.mxu1 %v1612_v56  ;;  %v2959_v56 = vld [vmem:[#allocation42_spill] sm:$0xff]  ;;  %v1712_v28 = vpack.c.bf16 (%p855_p0), %v1237_v25, %v1236_v24 }
 0x1e9   : > { %1581 = vmatpush1.bf16.msra.mxu0 %v1580_v59  ;;  %1615 = vmatprep.subr.bf16.mxu1 %v1614_v57  ;;  %v2955_v59 = vld [vmem:[#allocation40_spill] sm:$0xff]  ;;  %v1622_v49 = vpack.c.bf16 %v2960_v45, %v2959_v56  ;;  %v2961_v57 = vld [vmem:[#allocation39_spill] sm:$0xff]  ;;  %v1257_v33 = vld [vmem:[#allocation14 + $0xf8] sm:$0xff] (%p855_p0) }
 0x1ea   : > { %1583 = vmatprep.subr.bf16.mxu0 %v1582_v51  ;;  %v1590_v0 = vpack.c.bf16 %v2956_v58, %v2955_v59  ;;  %v2957_v51 = vld [vmem:[#allocation33_spill] sm:$0xff]  ;;  %v1592_v52 = vpack.c.bf16 %v2962_v50, %v2961_v57  ;;  %v2968_v58 = vld [vmem:[#allocation54_spill] sm:$0xff]  ;;  %v2972_v45 = vld [vmem:[#allocation60_spill] sm:$0xff]  ;;  %v1718_v35 = vpack.c.bf16 (%p855_p0), %v1257_v33, %v1256_v32 }
 0x1eb   : > { %v1620_v41 = vpack.c.bf16 %v2958_v60, %v2957_v51  ;;  %v2970_v60 = vld [vmem:[#allocation51_spill] sm:$0xff]  ;;  %v2974_v50 = vld [vmem:[#allocation53_spill] sm:$0xff] }
 0x1ec   : > { %1617 = vmatpush1.bf16.msra.mxu1 %v1616_v61  ;;  %v2967_v61 = vld [vmem:[#allocation50_spill] sm:$0xff] }
 0x1ed   : > { %1585 = vmatpush1.bf16.msra.mxu0 %v1584_v63  ;;  %1619 = vmatprep.subr.bf16.mxu1 %v1618_v1  ;;  %v2963_v63 = vld [vmem:[#allocation48_spill] sm:$0xff]  ;;  %v1658_v51 = vpack.c.bf16 %v2968_v58, %v2967_v61  ;;  %v2969_v1 = vld [vmem:[#allocation47_spill] sm:$0xff]  ;;  %v2979_v61 = vmov 0.0   ;;  %v1241_v37 = vld [vmem:[#allocation14 + $0x78] sm:$0xff] (%p855_p0) }
 0x1ee   : > { %1587 = vmatprep.subr.bf16.mxu0 %v1586_v47  ;;  %v1626_v2 = vpack.c.bf16 %v2964_v44, %v2963_v63  ;;  %v2965_v47 = vld [vmem:[#allocation41_spill] sm:$0xff]  ;;  %v1628_v56 = vpack.c.bf16 %v2970_v60, %v2969_v1  ;;  %v2981_v58 = vld [vmem:[#allocation68_spill] sm:$0xff]  ;;  %v1720_v38 = vpack.c.bf16 (%p855_p0), %v1241_v37, %v1240_v36 }
 0x1ef   : > { %v1624_v59 = vpack.c.bf16 %v2966_v43, %v2965_v47  ;;  %v2977_v47 = vld [vmem:[#allocation55_spill] sm:$0xff]  ;;  %v2983_v60 = vld [vmem:[#allocation61_spill] sm:$0xff] }
 0x1f0   : > { %1621 = vmatpush1.bf16.msra.mxu1 %v1620_v41  ;;  %v2975_v41 = vld [vmem:[#allocation58_spill] sm:$0xff] }
 0x1f1   : > { %1589 = vmatpush1.bf16.msra.mxu0 %v1588_v55  ;;  %1623 = vmatprep.subr.bf16.mxu1 %v1622_v49  ;;  %v2971_v55 = vld [vmem:[#allocation56_spill] sm:$0xff]  ;;  %v2976_v49 = vld [vmem:[#allocation62_spill] sm:$0xff] }
 0x1f2   : > { %1591 = vmatprep.subr.bf16.mxu0 %v1590_v0  ;;  %v1630_v57 = vpack.c.bf16 %v2972_v45, %v2971_v55  ;;  %v2973_v0 = vld [vmem:[#allocation49_spill] sm:$0xff]  ;;  %v1662_v44 = vpack.c.bf16 %v2976_v49, %v2975_v41  ;;  %v2989_v49 = vld [vmem:[#allocation76_spill] sm:$0xff] }
 0x1f3   : > { %v1660_v63 = vpack.c.bf16 %v2974_v50, %v2973_v0  ;;  %v2986_v0 = vld [vmem:[#allocation63_spill] sm:$0xff] }
 0x1f4   : > { %1625 = vmatpush1.bf16.msra.mxu1 %v1624_v59  ;;  %v2982_v59 = vld [vmem:[#allocation57_spill] sm:$0xff]  ;;  %v2987_v50 = vld [vmem:[#allocation67_spill] sm:$0xff] }
 0x1f5   : > { %1593 = vmatpush1.bf16.msra.mxu0 %v1592_v52  ;;  %1659 = vmatprep.subr.bf16.mxu1 %v1658_v51  ;;  %v2978_v52 = vld [vmem:[#allocation59_spill] sm:$0xff]  ;;  %v1664_v55 = vpack.c.bf16 %v2983_v60, %v2982_v59  ;;  %v2984_v51 = vld [vmem:[#allocation66_spill] sm:$0xff]  ;;  %v1636_v41 = vpack.c.bf16 %v2987_v50, %v2986_v0  ;;  %v2999_v0 = vld [vmem:[#allocation77_spill] sm:$0xff] }
 0x1f6   : > { %1627 = vmatprep.subr.bf16.mxu0 %v1626_v2  ;;  %v1632_v43 = vpack.c.bf16 %v2978_v52, %v2977_v47  ;;  %v2980_v2 = vld [vmem:[#allocation64_spill] sm:$0xff]  ;;  %v2995_v59 = vld [vmem:[#allocation75_spill] sm:$0xff] }
 0x1f7   : > { %v1634_v1 = vpack.c.bf16 %v2981_v58, %v2980_v2  ;;  %1007 = vmatmul.mubr.f32.vlgmr.msra.gmra.mrb[0].mxu1 %v2046_v62  ;;  %v2992_v2 = vld [vmem:[#allocation74_spill] sm:$0xff] }
 0x1f8   : > { %936 = vmatmul.mubr.f32.vlgmr.msra.gmra.mrb[0].mxu0 %v2046_v62  ;;  %1661 = vmatpush1.bf16.msra.mxu1 %v1660_v63  ;;  %v2990_v62 = vld [vmem:[#allocation65_spill] sm:$0xff]  ;;  %v2993_v58 = vld [vmem:[#allocation78_spill] sm:$0xff] }
 0x1f9   : > { %1629 = vmatpush1.bf16.msra.mxu0 %v1628_v56  ;;  %1112 = vmatprep.mubr.f32.mxu0 %v2979_v61  ;;  %v2985_v56 = vld [vmem:[#allocation70_spill] sm:$0xff]  ;;  %v2991_v63 = vld [vmem:[#allocation69_spill] sm:$0xff] }
 0x1fa   : > { %1631 = vmatprep.subr.bf16.mxu0 %v1630_v57  ;;  %1183 = vmatprep.mubr.f32.mxu1 %v2979_v61  ;;  %v1666_v45 = vpack.c.bf16 %v2985_v56, %v2984_v51  ;;  %v2988_v57 = vld [vmem:[#allocation72_spill] sm:$0xff]  ;;  %v1668_v52 = vpack.c.bf16 %v2991_v63, %v2990_v62  ;;  %v1670_v61 = vpack.c.bf16 %v2993_v58, %v2992_v2  ;;  %v3003_v62 = vld [vmem:[#allocation83_spill] sm:$0xff] }
 0x1fb   : > { %1663 = vmatprep.subr.bf16.mxu1 %v1662_v44  ;;  %v1638_v47 = vpack.c.bf16 %v2989_v49, %v2988_v57  ;;  %v2994_v44 = vld [vmem:[#allocation71_spill] sm:$0xff]  ;;  %v2997_v51 = vld [vmem:[#allocation84_spill] sm:$0xff]  ;;  %v3001_v57 = vld [vmem:[#allocation86_spill] sm:$0xff] }
 0x1fc   : > { %1665 = vmatpush1.bf16.msra.mxu1 %v1664_v55  ;;  %v1640_v60 = vpack.c.bf16 %v2995_v59, %v2994_v44  ;;  %v3000_v55 = vld [vmem:[#allocation82_spill] sm:$0xff]  ;;  %v3005_v2 = vld [vmem:[#allocation92_spill] sm:$0xff]  ;;  %v3007_v44 = vld [vmem:[#allocation85_spill] sm:$0xff] }
 0x1fd   : > { %1633 = vmatpush1.bf16.msra.mxu0 %v1632_v43  ;;  %1667 = vmatprep.subr.bf16.mxu1 %v1666_v45  ;;  %v2996_v43 = vld [vmem:[#allocation80_spill] sm:$0xff]  ;;  %v1674_v49 = vpack.c.bf16 %v3001_v57, %v3000_v55  ;;  %v3002_v45 = vld [vmem:[#allocation79_spill] sm:$0xff] }
 0x1fe   : > { %1635 = vmatprep.subr.bf16.mxu0 %v1634_v1  ;;  %v1642_v56 = vpack.c.bf16 %v2997_v51, %v2996_v43  ;;  %v2998_v1 = vld [vmem:[#allocation73_spill] sm:$0xff]  ;;  %v1644_v63 = vpack.c.bf16 %v3003_v62, %v3002_v45  ;;  %v3009_v43 = vld [vmem:[#allocation94_spill] sm:$0xff]  ;;  %v3013_v55 = vld [vmem:[#allocation100_spill] sm:$0xff] }
 0x1ff   : > { %v1672_v50 = vpack.c.bf16 %v2999_v0, %v2998_v1  ;;  %v3011_v1 = vld [vmem:[#allocation91_spill] sm:$0xff]  ;;  %v3015_v45 = vld [vmem:[#allocation93_spill] sm:$0xff] }
 0x200   : > { %1669 = vmatpush1.bf16.msra.mxu1 %v1668_v52  ;;  %v3008_v52 = vld [vmem:[#allocation90_spill] sm:$0xff] }
 0x201   : > { %1637 = vmatpush1.bf16.msra.mxu0 %v1636_v41  ;;  %1671 = vmatprep.subr.bf16.mxu1 %v1670_v61  ;;  %v3004_v41 = vld [vmem:[#allocation88_spill] sm:$0xff]  ;;  %v1678_v51 = vpack.c.bf16 %v3009_v43, %v3008_v52  ;;  %v3010_v61 = vld [vmem:[#allocation87_spill] sm:$0xff]  ;;  %v3022_v43 = vld [vmem:[#allocation97_spill] sm:$0xff] }
 0x202   : > { %1639 = vmatprep.subr.bf16.mxu0 %v1638_v47  ;;  %v1646_v58 = vpack.c.bf16 %v3005_v2, %v3004_v41  ;;  %v3006_v47 = vld [vmem:[#allocation81_spill] sm:$0xff]  ;;  %v1648_v0 = vpack.c.bf16 %v3011_v1, %v3010_v61  ;;  %v3017_v41 = vld [vmem:[#allocation102_spill] sm:$0xff]  ;;  %v3021_v52 = vld [vmem:[#allocation108_spill] sm:$0xff] }
 0x203   : > { %v1676_v59 = vpack.c.bf16 %v3007_v44, %v3006_v47  ;;  %v3019_v47 = vld [vmem:[#allocation99_spill] sm:$0xff]  ;;  %v3023_v61 = vld [vmem:[#allocation101_spill] sm:$0xff]  ;;  %v3024_v1 = vld [vmem:[#allocation106_spill] sm:$0xff] }
 0x204   : > { %1673 = vmatpush1.bf16.msra.mxu1 %v1672_v50  ;;  %v3016_v50 = vld [vmem:[#allocation98_spill] sm:$0xff] }
 0x205   : > { %1641 = vmatpush1.bf16.msra.mxu0 %v1640_v60  ;;  %1675 = vmatprep.subr.bf16.mxu1 %v1674_v49  ;;  %v3012_v60 = vld [vmem:[#allocation96_spill] sm:$0xff]  ;;  %v1682_v2 = vpack.c.bf16 %v3017_v41, %v3016_v50  ;;  %v3018_v49 = vld [vmem:[#allocation95_spill] sm:$0xff] }
 0x206   : > { %1643 = vmatprep.subr.bf16.mxu0 %v1642_v56  ;;  %v1650_v57 = vpack.c.bf16 %v3013_v55, %v3012_v60  ;;  %v3014_v56 = vld [vmem:[#allocation89_spill] sm:$0xff]  ;;  %v1652_v44 = vpack.c.bf16 %v3019_v47, %v3018_v49  ;;  %v3025_v60 = vld [vmem:[#allocation110_spill] sm:$0xff]  ;;  %v3026_v55 = vld [vmem:[#allocation103_spill] sm:$0xff] }
 0x207   : > { %v1680_v62 = vpack.c.bf16 %v3015_v45, %v3014_v56  ;;  %v3027_v56 = vld [vmem:[#allocation107_spill] sm:$0xff]  ;;  %v3028_v45 = vld [vmem:[#allocation105_spill] sm:$0xff] }
 0x208   : > { %1677 = vmatpush1.bf16.msra.mxu1 %v1676_v59  ;;  %v1684_v59 = vpack.c.bf16 %v3023_v61, %v3022_v43  ;;  %v868_v41 = vld [vmem:[%s866_s0 + $0x8] sm:$0xff]  ;;  %v869_v61 = vld [vmem:[%s866_s0 + $0x10] sm:$0xff] }
 0x209   : > { %1645 = vmatpush1.bf16.msra.mxu0 %v1644_v63  ;;  %1679 = vmatprep.subr.bf16.mxu1 %v1678_v51  ;;  %v3020_v63 = vld [vmem:[#allocation104_spill] sm:$0xff]  ;;  %v1686_v51 = vpack.c.bf16 %v3025_v60, %v3024_v1 }
 0x20a   : > { %1647 = vmatprep.subr.bf16.mxu0 %v1646_v58  ;;  %v1654_v58 = vpack.c.bf16 %v3021_v52, %v3020_v63  ;;  %v870_v1 = vld [vmem:[%s866_s0 + $0x18] sm:$0xff] }
 0x20c   : > { %1681 = vmatpush1.bf16.msra.mxu1 %v1680_v62  ;;  %v867_v62 = vld [vmem:[%s866_s0] sm:$0xff] }
 0x20d   : > { %1649 = vmatpush1.bf16.msra.mxu0 %v1648_v0  ;;  %1683 = vmatprep.subr.bf16.mxu1 %v1682_v2  ;;  %v1656_v0 = vpack.c.bf16 %v3027_v56, %v3026_v55 }
 0x20e   : > { %1651 = vmatprep.subr.bf16.mxu0 %v1650_v57  ;;  %v3029_v57 = vld [vmem:[#allocation109_spill] sm:$0xff] }
 0x20f   : > { %v1688_v50 = vpack.c.bf16 %v3029_v57, %v3028_v45 }
 0x210   : > { %1685 = vmatpush1.bf16.msra.mxu1 %v1684_v59 }
 0x211   : > { %1653 = vmatpush1.bf16.msra.mxu0 %v1652_v44  ;;  %1687 = vmatprep.subr.bf16.mxu1 %v1686_v51 }
 0x212   : > { %1655 = vmatprep.subr.bf16.mxu0 %v1654_v58 }
 0x214   : > { %1689 = vmatpush1.bf16.msra.mxu1 %v1688_v50 }
 0x215   : > { %1657 = vmatpush1.bf16.msra.mxu0 %v1656_v0 }
 0x217   : > { %1184 = vmatmul.mubr.f32.vlgmr.msra.gmra.mrb[2].mxu1 %v2038_v53 }
 0x218   : > { %1113 = vmatmul.mubr.f32.vlgmr.msra.gmra.mrb[2].mxu0 %v2038_v53 }
 0x2ca   : > { %v1008_v63 = vpop.f32.mrb[0].mxu1 }
 0x2cb   : > { %v937_v2 = vpop.f32.mrb[0].mxu0  ;;  %v1010_v58 = vpop.f32.mrb[1].mxu1  ;;  %v1015_v59 = vadd.f32 %v1008_v63, %v869_v61 }
 0x2cc   : > { %v1013_v49 = vadd.f32 %v937_v2, %v867_v62  ;;  %v939_v47 = vpop.f32.mrb[1].mxu0  ;;  %v1016_v60 = vadd.f32 %v1010_v58, %v870_v1 }
 0x2cd   : > { %v1014_v44 = vadd.f32 %v939_v47, %v868_v41  ;;  %v1475_v53 = vmul.f32 -1.442695, %v1015_v59  ;;  %v1044_v47 = vld [vmem:[%s1043_s21] sm:$0xff] }
 0x2ce   : > { %v1473_v52 = vmul.f32 -1.442695, %v1013_v49 }
 0x2cf   : > { %v1474_v43 = vmul.f32 -1.442695, %v1014_v44  ;;  %v1045_v44 = vld [vmem:[%s1043_s21 + $0x8] sm:$0xff] }
 0x2d0   : > { %1794 = vpow2.f32 %v1473_v52 }
 0x2d1   : > { %1796 = vpow2.f32 %v1474_v43 }
 0x2d2   : > { %1798 = vpow2.f32 %v1475_v53 }
 0x2d3   : > { %1800 = vtanh.f32 %v1016_v60  ;;  %v1046_v60 = vld [vmem:[%s1043_s21 + $0x10] sm:$0xff] }
 0x2da   : > { %v1795_v51 = vpop.eup %1794 }
 0x2db   : > { %v1797_v55 = vpop.eup %1796  ;;  %v1026_v56 = vadd.f32 1.0, %v1795_v51 }
 0x2dc   : > { %v1027_v0 = vadd.f32 1.0, %v1797_v55  ;;  %v1799_v45 = vpop.eup %1798  ;;  %v1047_v55 = vld [vmem:[%s1043_s21 + $0x18] sm:$0xff] }
 0x2dd   : > { %1802 = vrcp.f32 %v1026_v56  ;;  %v1801_v57 = vpop.eup %1800  ;;  %v1028_v62 = vadd.f32 1.0, %v1799_v45 }
 0x2de   : > { %1804 = vrcp.f32 %v1027_v0 }
 0x2df   : > { %1806 = vrcp.f32 %v1028_v62 }
 0x2e7   : > { %v1803_v50 = vpop.eup %1802 }
 0x2e8   : > { %v1805_v41 = vpop.eup %1804  ;;  %v1037_v2 = vmul.f32 %v1803_v50, %v1801_v57 }
 0x2e9   : > { %v1036_v49 = vmul.f32 %v2042_v54, %v1805_v41  ;;  %v1807_v56 = vpop.eup %1806 }
 0x2ea   : > { %v1185_v61 = vpop.f32.mrb[2].mxu1 }
 0x2eb   : > { %v1038_v54 = vadd.f32 %v1037_v2, %v1036_v49   ;;  %v1114_v63 = vpop.f32.mrb[2].mxu0  ;;  %v1187_v1 = vpop.f32.mrb[3].mxu1  ;;  %v1192_v51 = vadd.f32 %v1185_v61, %v1046_v60  ;;  %v1242_v60 = vld [vmem:[#allocation14 + $0x80] sm:$0xff] (%p855_p0) }
 0x2ec   : > { %v1190_v52 = vadd.f32 %v1114_v63, %v1044_v47  ;;  %v1116_v58 = vpop.f32.mrb[3].mxu0  ;;  %v1193_v57 = vadd.f32 %v1187_v1, %v1047_v55  ;;  %v1226_v55 = vld [vmem:[#allocation14] sm:$0xff] (%p855_p0) }
 0x2ed   : > { %1808 = vtanh.f32 %v1038_v54  ;;  %v1191_v43 = vadd.f32 %v1116_v58, %v1045_v44  ;;  %v1480_v0 = vmul.f32 -1.442695, %v1192_v51  ;;  %v1243_v51 = vld [vmem:[#allocation14 + $0x88] sm:$0xff] (%p855_p0) }
 0x2ee   : > { %v1478_v59 = vmul.f32 -1.442695, %v1190_v52 }
 0x2ef   : > { %v1479_v53 = vmul.f32 -1.442695, %v1191_v43 }
 0x2f0   : > { %1810 = vpow2.f32 %v1478_v59 }
 0x2f1   : > { %1812 = vpow2.f32 %v1479_v53 }
 0x2f2   : > { %1814 = vpow2.f32 %v1480_v0  ;;  %v1227_v0 = vld [vmem:[#allocation14 + $0x8] sm:$0xff] (%p855_p0) }
 0x2f3   : > { %1816 = vtanh.f32 %v1193_v57  ;;  %v1245_v57 = vld [vmem:[#allocation14 + $0x98] sm:$0xff] (%p855_p0) }
 0x2f7   : > { %v1809_v45 = vpop.eup %1808 }
 0x2f8   : > { %v1040_v62 = vmul.f32 %v1809_v45, %v1807_v56   ;;  %v1690_v56 = vpack.c.bf16 (%p855_p0), %v1243_v51, %v1242_v60  ;;  %v1244_v45 = vld [vmem:[#allocation14 + $0x90] sm:$0xff] (%p855_p0) }
 0x2fa   : > { %v1811_v50 = vpop.eup %1810  ;;  %1221 = vst [vmem:[%s1220_s23] sm:$0xff] %v1040_v62  ;;  %1691 = vmatprep.subr.bf16.mxu0 (%p855_p0), %v1690_v56  ;;  %1722 = vmatprep.subr.bf16.mxu1 (%p855_p0), %v1690_v56 }
 0x2fb   : > { %v1813_v41 = vpop.eup %1812  ;;  %v1203_v2 = vadd.f32 1.0, %v1811_v50  ;;  %v1692_v50 = vpack.c.bf16 (%p855_p0), %v1227_v0, %v1226_v55  ;;  %v1485_v55 = vld [vmem:[#allocation16] ss:$0 sm:$0xff] (%p855_p0) }
 0x2fc   : > { %v1204_v49 = vadd.f32 1.0, %v1813_v41  ;;  %v1815_v47 = vpop.eup %1814  ;;  %v1694_v41 = vpack.c.bf16 (%p855_p0), %v1245_v57, %v1244_v45 }
 0x2fd   : > { %1818 = vrcp.f32 %v1203_v2  ;;  %v1817_v44 = vpop.eup %1816  ;;  %v1205_v52 = vadd.f32 1.0, %v1815_v47  ;;  %v1228_v2 = vld [vmem:[#allocation14 + $0x10] sm:$0xff] (%p855_p0)  ;;  %v1246_v47 = vld [vmem:[#allocation14 + $0xa0] sm:$0xff] (%p855_p0)  ;;  %1693 = vmatpush3.bf16.msra.mxu0 (%p855_p0), %v1692_v50  ;;  %1730 = vmatpush3.bf16.msra.mxu1 (%p855_p0), %v1692_v50 }
 0x2fe   : > { %1820 = vrcp.f32 %v1204_v49  ;;  %v1229_v49 = vld [vmem:[#allocation14 + $0x18] sm:$0xff] (%p855_p0)  ;;  %1695 = vmatprep.subr.bf16.mxu0 (%p855_p0), %v1694_v41  ;;  %1723 = vmatprep.subr.bf16.mxu1 (%p855_p0), %v1694_v41 }
 0x2ff   : > { %1822 = vrcp.f32 %v1205_v52  ;;  %v1696_v62 = vpack.c.bf16 (%p855_p0), %v1229_v49, %v1228_v2 }
 0x301   :  { %1697 = vmatpush3.bf16.msra.mxu0 (%p855_p0), %v1696_v62  ;;  %1731 = vmatpush3.bf16.msra.mxu1 (%p855_p0), %v1696_v62 }
 0x307   : > { %v1819_v63 = vpop.eup %1818 }
 0x308   : > { %v1821_v58 = vpop.eup %1820  ;;  %v1214_v43 = vmul.f32 %v1819_v63, %v1817_v44  ;;  %v1247_v44 = vld [vmem:[#allocation14 + $0xa8] sm:$0xff] (%p855_p0) }
 0x309   : > { %v1213_v61 = vmul.f32 %v2034_v48, %v1821_v58  ;;  %v1823_v59 = vpop.eup %1822  ;;  %v1698_v3 = vpack.c.bf16 (%p855_p0), %v1247_v44, %v1246_v47 }
 0x30b   : > { %v1215_v48 = vadd.f32 %v1214_v43, %v1213_v61   ;;  %1699 = vmatprep.subr.bf16.mxu0 (%p855_p0), %v1698_v3  ;;  %1724 = vmatprep.subr.bf16.mxu1 (%p855_p0), %v1698_v3 }
 0x30c   :  { %1701 = vmatpush3.bf16.msra.mxu0 (%p855_p0), %v1700_v8  ;;  %1732 = vmatpush3.bf16.msra.mxu1 (%p855_p0), %v1700_v8 }
 0x30d   : > { %1824 = vtanh.f32 %v1215_v48  ;;  %1703 = vmatprep.subr.bf16.mxu0 (%p855_p0), %v1702_v9  ;;  %1725 = vmatprep.subr.bf16.mxu1 (%p855_p0), %v1702_v9 }
 0x310   :  { %1705 = vmatpush3.bf16.msra.mxu0 (%p855_p0), %v1704_v16  ;;  %1733 = vmatpush3.bf16.msra.mxu1 (%p855_p0), %v1704_v16 }
 0x311   :  { %1707 = vmatprep.subr.bf16.mxu0 (%p855_p0), %v1706_v17  ;;  %1726 = vmatprep.subr.bf16.mxu1 (%p855_p0), %v1706_v17 }
 0x314   :  { %857 = sbr.rel (!%p855_p0) target bundleno = 469 (0x1d5), region = 87  ;;  %1709 = vmatpush3.bf16.msra.mxu0 (%p855_p0), %v1708_v22  ;;  %1734 = vmatpush3.bf16.msra.mxu1 (%p855_p0), %v1708_v22 }
 0x315   :  { %1711 = vmatprep.subr.bf16.mxu0 (%p855_p0), %v1710_v23  ;;  %1727 = vmatprep.subr.bf16.mxu1 (%p855_p0), %v1710_v23 }
 0x317   : > { %v1825_v1 = vpop.eup %1824 }
 0x318   : > { %v1217_v53 = vmul.f32 %v1825_v1, %v1823_v59   ;;  %1713 = vmatpush3.bf16.msra.mxu0 (%p855_p0), %v1712_v28  ;;  %1735 = vmatpush3.bf16.msra.mxu1 (%p855_p0), %v1712_v28 }
 0x319   :  { %1715 = vmatprep.subr.bf16.mxu0 (%p855_p0), %v1714_v29  ;;  %1728 = vmatprep.subr.bf16.mxu1 (%p855_p0), %v1714_v29 }
 0x31a   : > { %1225 = vst [vmem:[%s1224_s26 + $0x8] sm:$0xff] %v1217_v53 }
 0x31c   :  { %1717 = vmatpush3.bf16.msra.mxu0 %v1716_v34  ;;  %1736 = vmatpush3.bf16.msra.mxu1 %v1716_v34 }
 0x31d   :  { %1719 = vmatprep.subr.bf16.mxu0 %v1718_v35  ;;  %1729 = vmatprep.subr.bf16.mxu1 %v1718_v35 }
 0x320   :  { %1721 = vmatpush3.bf16.msra.mxu0 %v1720_v38  ;;  %1737 = vmatpush3.bf16.msra.mxu1 %v1720_v38 }
 0x321   :  { %v1260_v14 = vld [vmem:[#allocation4 + $0x8] sm:$0xff]  ;;  %v1259_v39 = vld [vmem:[#allocation4] sm:$0xff]  ;;  %v1262_v42 = vld [vmem:[#allocation4 + $0x18] sm:$0xff] }
 0x322   :  { %1345 = vmatprep.mubr.f32.mxu0 %v1260_v14  ;;  %v1268_v15 = vld [vmem:[#allocation4 + $0x48] sm:$0xff]  ;;  %v1267_v40 = vld [vmem:[#allocation4 + $0x40] sm:$0xff]  ;;  %v1270_v46 = vld [vmem:[#allocation4 + $0x58] sm:$0xff] }
 0x323   :  { %1365 = vmatprep.mubr.f32.mxu1 %v1268_v15  ;;  %1346 = vmatmul.mubr.f32.vlgmr.msra.gmra.mrb[0].mxu0 %v1259_v39  ;;  %v1261_v48 = vld [vmem:[#allocation4 + $0x10] sm:$0xff]  ;;  %v1264_v53 = vld [vmem:[#allocation4 + $0x28] sm:$0xff]  ;;  %v1263_v52 = vld [vmem:[#allocation4 + $0x20] sm:$0xff] }
 0x324   :  { %1366 = vmatmul.mubr.f32.vlgmr.msra.gmra.mrb[0].mxu1 %v1267_v40  ;;  %1350 = vmatprep.mubr.f32.mxu0 %v1262_v42  ;;  %v1269_v54 = vld [vmem:[#allocation4 + $0x50] sm:$0xff]  ;;  %v1272_v63 = vld [vmem:[#allocation4 + $0x68] sm:$0xff]  ;;  %v1271_v58 = vld [vmem:[#allocation4 + $0x60] sm:$0xff] }
 0x325   :  { %1370 = vmatprep.mubr.f32.mxu1 %v1270_v46  ;;  %v1266_v43 = vld [vmem:[#allocation4 + $0x38] sm:$0xff]  ;;  %v1265_v59 = vld [vmem:[#allocation4 + $0x30] sm:$0xff] }
 0x326   :  { %v1274_v61 = vld [vmem:[#allocation4 + $0x78] sm:$0xff]  ;;  %v1273_v1 = vld [vmem:[#allocation4 + $0x70] sm:$0xff] }
 0x327   :  { %1351 = vmatmul.mubr.f32.gmra.mrb[2].mxu0 %v1261_v48 }
 0x328   :  { %1371 = vmatmul.mubr.f32.gmra.mrb[2].mxu1 %v1269_v54  ;;  %1355 = vmatprep.mubr.f32.mxu0 %v1264_v53 }
 0x329   :  { %1375 = vmatprep.mubr.f32.mxu1 %v1272_v63 }
 0x32b   :  { %1356 = vmatmul.mubr.f32.gmra.mrb[4].mxu0 %v1263_v52 }
 0x32c   :  { %1376 = vmatmul.mubr.f32.gmra.mrb[4].mxu1 %v1271_v58  ;;  %1360 = vmatprep.mubr.f32.mxu0 %v1266_v43 }
 0x32d   :  { %1380 = vmatprep.mubr.f32.mxu1 %v1274_v61 }
 0x32f   :  { %1361 = vmatmul.mubr.f32.gmra.mrb[6].mxu0 %v1265_v59 }
 0x330   :  { %1381 = vmatmul.mubr.f32.gmra.mrb[6].mxu1 %v1273_v1 }
 0x3f6   :  { %v1522_v60 = vpop.f32.mrb[0].mxu0 }
 0x3f7   :  { %v1534_v51 = vpop.f32.mrb[0].mxu1  ;;  %v1523_v56 = vpop.f32.mrb[1].mxu0 }
 0x3f8   :  { %v1535_v0 = vpop.f32.mrb[1].mxu1  ;;  %v1524_v45 = vadd.f32 %v1523_v56, %v1522_v60 }
 0x3f9   :  { %v1536_v57 = vadd.f32 %v1535_v0, %v1534_v51 }
 0x3fa   :  { %v1348_v50 = vadd.f32 %v1524_v45, %v1485_v55  ;;  %v1525_v2 = vpop.f32.mrb[2].mxu0 }
 0x3fb   :  { %v1368_v41 = vadd.f32 %v1536_v57, %v1485_v55  ;;  %v1537_v49 = vpop.f32.mrb[2].mxu1  ;;  %v1526_v47 = vpop.f32.mrb[3].mxu0 }
 0x3fc   :  { %v1538_v44 = vpop.f32.mrb[3].mxu1  ;;  %1386 = vst [vmem:[#allocation17] sm:$0xff] %v1348_v50  ;;  %v1527_v62 = vadd.f32 %v1526_v47, %v1525_v2 }
 0x3fd   :  { %1390 = vst [vmem:[#allocation17 + $0x20] sm:$0xff] %v1368_v41  ;;  %v1539_v3 = vadd.f32 %v1538_v44, %v1537_v49 }
 0x3fe   :  { %v1353_v4 = vadd.f32 %v1527_v62, %v1485_v55  ;;  %v1528_v6 = vpop.f32.mrb[4].mxu0 }
 0x3ff   :  { %v1373_v5 = vadd.f32 %v1539_v3, %v1485_v55  ;;  %v1540_v7 = vpop.f32.mrb[4].mxu1  ;;  %v1529_v8 = vpop.f32.mrb[5].mxu0 }
 0x400   :  { %v1541_v9 = vpop.f32.mrb[5].mxu1  ;;  %1387 = vst [vmem:[#allocation17 + $0x8] sm:$0xff] %v1353_v4  ;;  %v1530_v10 = vadd.f32 %v1529_v8, %v1528_v6 }
 0x401   :  { %1391 = vst [vmem:[#allocation17 + $0x28] sm:$0xff] %v1373_v5  ;;  %v1542_v11 = vadd.f32 %v1541_v9, %v1540_v7 }
 0x402   :  { %v1358_v12 = vadd.f32 %v1530_v10, %v1485_v55  ;;  %v1531_v14 = vpop.f32.mrb[6].mxu0 }
 0x403   :  { %v1378_v13 = vadd.f32 %v1542_v11, %v1485_v55  ;;  %v1543_v15 = vpop.f32.mrb[6].mxu1  ;;  %v1532_v16 = vpop.f32.mrb[7].mxu0 }
 0x404   :  { %v1544_v17 = vpop.f32.mrb[7].mxu1  ;;  %1388 = vst [vmem:[#allocation17 + $0x10] sm:$0xff] %v1358_v12  ;;  %v1533_v18 = vadd.f32 %v1532_v16, %v1531_v14 }
 0x405   :  { %1392 = vst [vmem:[#allocation17 + $0x30] sm:$0xff] %v1378_v13  ;;  %v1545_v19 = vadd.f32 %v1544_v17, %v1543_v15 }
 0x406   :  { %v1363_v20 = vadd.f32 %v1533_v18, %v1485_v55 }
 0x407   :  { %v1383_v21 = vadd.f32 %v1545_v19, %v1485_v55 }
 0x408   :  { %1389 = vst [vmem:[#allocation17 + $0x18] sm:$0xff] %v1363_v20 }
 0x409   :  { %1393 = vst [vmem:[#allocation17 + $0x38] sm:$0xff] %v1383_v21 }
 0x40a   :  { %1991 = shalt.err (!%p1988_p5)
}
 0x40b   :  { %s1992_s30 = scalar_lea.hbm %s2847_s7, 1024 }
 0x40c   :  { %p1993_p6 = scmp.ne.s32.totalorder %s2847_s7, %s1992_s30  ;;  %p1996_p7 = scmp.lt.u32.totalorder %s1992_s30, %s2847_s7 }
 0x40e   :  { %p1998_p8 = pnand %p1996_p7, %p1993_p6 }
 0x410   :  { %2001 = shalt.err (!%p1998_p8)
}
 0x411   :  { %1405 = dma.vmem_to_hbm [thread:$0]  %s1400_s28, 1024, %s2847_s7, [#allocation7], %s2060_s16, %s2060_s16, %s2061_s17  }
 0x412   :  { %2030 = dma.done.wait [#allocation7], 1024  }
 0x413   :  { %2031 = vsyncadd [#allocation7], 4294966272 }
 0x414   :  { %1409 = vsyncpa [#allocation6], 1 }
 0x415   :  { %1410 = vsyncpa [#allocation9], 1 }
 0x416   :  { %1411 = vsyncpa [#allocation12], 1 }
 0x417   :  { %1412 = vsyncpa [#allocation15], 1 }
 0x418   :  { %1413 = vsyncpa [#allocation7], 1 }

// kernel: tpu_custom_call.1
= control target key start
LH: loop header
LB: loop body
LE: loop exit
PB: predicated region body
PF: predicated region fallthrough
CT: control target
= control target key end

     0   :  { %12 = vsyncpa [#allocation6], 0  ;;  %s2840_s0 = inlined_call_operand.hbm [shape: f32[8,8,16], index: 0, kind: input, shape index: {}]   ;;  %s2841_s1 = inlined_call_operand.hbm [shape: f32[16,1024], index: 1, kind: input, shape index: {}]   ;;  %s2842_s2 = inlined_call_operand.hbm [shape: f32[1,1024], index: 2, kind: input, shape index: {}]   ;;  %s2843_s3 = inlined_call_operand.hbm [shape: f32[128,512], index: 3, kind: input, shape index: {}]   ;;  %s2844_s4 = inlined_call_operand.hbm [shape: f32[128,512], index: 4, kind: input, shape index: {}]   ;;  %s2845_s5 = inlined_call_operand.hbm [shape: f32[256,128], index: 5, kind: input, shape index: {}]   ;;  %s2846_s6 = inlined_call_operand.hbm [shape: f32[1,128], index: 6, kind: input, shape index: {}]   ;;  %s2847_s7 = inlined_call_operand.hbm [shape: f32[8,8,128], index: 7, kind: output, shape index: {}]  }
   0x1   :  { %13 = vsyncpa [#allocation9], 0 }
   0x2   :  { %14 = vsyncpa [#allocation12], 0 }
   0x3   :  { %15 = vsyncpa [#allocation15], 0 }
   0x4   :  { %16 = vsyncpa [#allocation7], 0  ;;  %s2052_s24 = smov [#allocation8]   ;;  %s1826_s28 = scalar_lea.hbm %s2841_s1, 2048 }
   0x5   :  { %s34_s25 = sshll.u32 %s2052_s24, 4  ;;  %p1827_p0 = scmp.ne.s32.totalorder %s2841_s1, %s1826_s28  ;;  %s35_s25 = int_to_ptr.vmem [resolvable:$true] %s34_s25 }
   0x6   :  { %p1830_p1 = scmp.lt.u32.totalorder %s1826_s28, %s2841_s1 }
   0x8   :  { %p1832_p2 = pnand %p1830_p1, %p1827_p0 }
   0xa   :  { %1835 = shalt.err (!%p1832_p2)
}
   0xb   :  { %s1836_s10 = scalar_lea.vmem %s35_s25, 2048  ;;  %p1841_p4 = scmp.lt.s32.totalorder %s35_s25, %s35_s25 }
   0xc   :  { %p1837_p3 = scmp.ne.s32.totalorder %s35_s25, %s1836_s10  ;;  %p1842_p5 = scmp.lt.s32.totalorder %s1836_s10, %s1836_s10 }
   0xe   :  { %p1843_p6 = por %p1842_p5, %p1841_p4 }
  0x10   :  { %p1844_p7 = pnand %p1843_p6, %p1837_p3 }
  0x12   :  { %1847 = shalt.err (!%p1844_p7)
}
  0x13   :  { %s2053_s11 = smov 1024   ;;  %s2054_s12 = smov 64  }
  0x14   :  { %40 = dma.hbm_to_vmem [thread:$0]  %s2841_s1, 2048, %s35_s25, [#allocation9], %s2053_s11, %s2053_s11, %s2054_s12  }
  0x15   :  { %s2055_s15 = smov [#allocation11]   ;;  %s1848_s19 = scalar_lea.hbm %s2843_s3, 8192 }
  0x16   :  { %s56_s16 = sshll.u32 %s2055_s15, 4  ;;  %p1849_p8 = scmp.ne.s32.totalorder %s2843_s3, %s1848_s19  ;;  %s57_s16 = int_to_ptr.vmem [resolvable:$true] %s56_s16 }
  0x17   :  { %p1852_p9 = scmp.lt.u32.totalorder %s1848_s19, %s2843_s3 }
  0x19   :  { %p1854_p10 = pnand %p1852_p9, %p1849_p8 }
  0x1b   :  { %1857 = shalt.err (!%p1854_p10)
}
  0x1c   :  { %s1858_s24 = scalar_lea.vmem %s57_s16, 8192  ;;  %p1863_p12 = scmp.lt.s32.totalorder %s57_s16, %s57_s16 }
  0x1d   :  { %p1859_p11 = scmp.ne.s32.totalorder %s57_s16, %s1858_s24  ;;  %p1864_p13 = scmp.lt.s32.totalorder %s1858_s24, %s1858_s24 }
  0x1f   :  { %p1865_p0 = por %p1864_p13, %p1863_p12 }
  0x21   :  { %p1866_p1 = pnand %p1865_p0, %p1859_p11 }
  0x23   :  { %1869 = shalt.err (!%p1866_p1)
}
  0x24   :  { %s2056_s1 = smov 512   ;;  %s2057_s25 = smov 32  }
  0x25   :  { %62 = dma.hbm_to_vmem [thread:$0]  %s2843_s3, 8192, %s57_s16, [#allocation12], %s2056_s1, %s2056_s1, %s2057_s25  }
  0x26   :  { %s2058_s28 = smov [#allocation14]   ;;  %s2059_s30 = smov [#allocation5]  }
  0x27   :  { %s80_s29 = sshll.u32 %s2058_s28, 4  ;;  %s22_s8 = sshll.u32 %s2059_s30, 4  ;;  %s81_s29 = int_to_ptr.vmem [resolvable:$true] %s80_s29  ;;  %s2135_s8 = int_to_ptr.vmem [resolvable:$true] %s22_s8 }
  0x28   :  { %s1870_s11 = scalar_lea.hbm %s2845_s5, 4096 }
  0x29   :  { %p1871_p2 = scmp.ne.s32.totalorder %s2845_s5, %s1870_s11  ;;  %p1874_p3 = scmp.lt.u32.totalorder %s1870_s11, %s2845_s5 }
  0x2b   :  { %p1876_p4 = pnand %p1874_p3, %p1871_p2 }
  0x2d   :  { %1879 = shalt.err (!%p1876_p4)
}
  0x2e   :  { %s1880_s3 = scalar_lea.vmem %s81_s29, 4096  ;;  %p1885_p6 = scmp.lt.s32.totalorder %s81_s29, %s81_s29 }
  0x2f   :  { %p1881_p5 = scmp.ne.s32.totalorder %s81_s29, %s1880_s3  ;;  %p1886_p7 = scmp.lt.s32.totalorder %s1880_s3, %s1880_s3 }
  0x31   :  { %p1887_p8 = por %p1886_p7, %p1885_p6 }
  0x33   :  { %p1888_p9 = pnand %p1887_p8, %p1881_p5 }
  0x35   :  { %1891 = shalt.err (!%p1888_p9)
}
  0x36   :  { %s2060_s16 = smov 128   ;;  %s2061_s17 = smov 8  }
  0x37   :  { %86 = dma.hbm_to_vmem [thread:$0]  %s2845_s5, 4096, %s81_s29, [#allocation15], %s2060_s16, %s2060_s16, %s2061_s17  }
  0x38   :  { %s1892_s22 = scalar_lea.hbm %s2840_s0, 1024 }
  0x39   :  { %p1893_p10 = scmp.ne.s32.totalorder %s2840_s0, %s1892_s22  ;;  %p1896_p11 = scmp.lt.u32.totalorder %s1892_s22, %s2840_s0 }
  0x3b   :  { %p1898_p12 = pnand %p1896_p11, %p1893_p10 }
  0x3d   :  { %1901 = shalt.err (!%p1898_p12)
}
  0x3e   :  { %s1902_s28 = scalar_lea.vmem %s2135_s8, 1024  ;;  %p1907_p0 = scmp.lt.s32.totalorder %s2135_s8, %s2135_s8 }
  0x3f   :  { %p1903_p13 = scmp.ne.s32.totalorder %s2135_s8, %s1902_s28  ;;  %p1908_p1 = scmp.lt.s32.totalorder %s1902_s28, %s1902_s28 }
  0x41   :  { %p1909_p2 = por %p1908_p1, %p1907_p0 }
  0x43   :  { %p1910_p3 = pnand %p1909_p2, %p1903_p13 }
  0x45   :  { %1913 = shalt.err (!%p1910_p3)
}
  0x46   :  { %28 = dma.hbm_to_vmem [thread:$0]  %s2840_s0, 1024, %s2135_s8, [#allocation6], %s2060_s16, %s2060_s16, %s2061_s17  }
  0x47   :  { %s2062_s30 = smov [#allocation10]   ;;  %s2063_s10 = smov [#allocation13]  }
  0x48   :  { %s47_s9 = sshll.u32 %s2062_s30, 4  ;;  %s68_s11 = sshll.u32 %s2063_s10, 4  ;;  %s48_s9 = int_to_ptr.vmem [resolvable:$true] %s47_s9  ;;  %s2172_s11 = int_to_ptr.vmem [resolvable:$true] %s68_s11 }
  0x49   :  { %s1914_s14 = scalar_lea.hbm %s2842_s2, 128 }
  0x4a   :  { %p1915_p4 = scmp.ne.s32.totalorder %s2842_s2, %s1914_s14  ;;  %p1918_p5 = scmp.lt.u32.totalorder %s1914_s14, %s2842_s2 }
  0x4c   :  { %p1920_p6 = pnand %p1918_p5, %p1915_p4 }
  0x4e   :  { %1923 = shalt.err (!%p1920_p6)
}
  0x4f   :  { %s1924_s0 = scalar_lea.vmem %s48_s9, 128  ;;  %p1929_p8 = scmp.lt.s32.totalorder %s48_s9, %s48_s9 }
  0x50   :  { %p1925_p7 = scmp.ne.s32.totalorder %s48_s9, %s1924_s0  ;;  %p1930_p9 = scmp.lt.s32.totalorder %s1924_s0, %s1924_s0 }
  0x52   :  { %p1931_p10 = por %p1930_p9, %p1929_p8 }
  0x54   :  { %p1932_p11 = pnand %p1931_p10, %p1925_p7 }
  0x56   :  { %1935 = shalt.err (!%p1932_p11)
}
  0x57   :  { %50 = dma.hbm_to_vmem [thread:$0]  %s2842_s2, 128, %s48_s9, [#allocation9]  }
  0x58   :  { %s1936_s23 = scalar_lea.hbm %s2844_s4, 8192 }
  0x59   :  { %p1937_p12 = scmp.ne.s32.totalorder %s2844_s4, %s1936_s23  ;;  %p1940_p13 = scmp.lt.u32.totalorder %s1936_s23, %s2844_s4 }
  0x5b   :  { %p1942_p0 = pnand %p1940_p13, %p1937_p12 }
  0x5d   :  { %1945 = shalt.err (!%p1942_p0)
}
  0x5e   :  { %s1946_s5 = scalar_lea.vmem %s2172_s11, 8192  ;;  %p1951_p2 = scmp.lt.s32.totalorder %s2172_s11, %s2172_s11 }
  0x5f   :  { %p1947_p1 = scmp.ne.s32.totalorder %s2172_s11, %s1946_s5  ;;  %p1952_p3 = scmp.lt.s32.totalorder %s1946_s5, %s1946_s5 }
  0x61   :  { %p1953_p4 = por %p1952_p3, %p1951_p2 }
  0x63   :  { %p1954_p5 = pnand %p1953_p4, %p1947_p1 }
  0x65   :  { %1957 = shalt.err (!%p1954_p5)
}
  0x66   :  { %74 = dma.hbm_to_vmem [thread:$0]  %s2844_s4, 8192, %s2172_s11, [#allocation12], %s2056_s1, %s2056_s1, %s2057_s25  }
  0x67   :  { %s2064_s30 = smov [#allocation16]   ;;  %s1958_s13 = scalar_lea.hbm %s2846_s6, 16 }
  0x68   :  { %s93_s9 = sshll.u32 %s2064_s30, 4  ;;  %p1959_p6 = scmp.ne.s32.totalorder %s2846_s6, %s1958_s13  ;;  %s94_s9 = int_to_ptr.vmem [resolvable:$true] %s93_s9 }
  0x69   :  { %p1962_p7 = scmp.lt.u32.totalorder %s1958_s13, %s2846_s6 }
  0x6b   :  { %p1964_p8 = pnand %p1962_p7, %p1959_p6 }
  0x6d   :  { %1967 = shalt.err (!%p1964_p8)
}
  0x6e   :  { %s1968_s19 = scalar_lea.vmem %s94_s9, 16  ;;  %s1972_s4 = scalar_lea.vmem %s94_s9, 32 }
  0x6f   :  { %p1969_p9 = scmp.ne.s32.totalorder %s94_s9, %s1968_s19  ;;  %p1973_p10 = scmp.lt.s32.totalorder %s94_s9, %s94_s9 }
  0x70   :  { %p1974_p11 = scmp.lt.s32.totalorder %s1972_s4, %s1968_s19 }
  0x72   :  { %p1975_p12 = por %p1974_p11, %p1973_p10 }
  0x74   :  { %p1976_p13 = pnand %p1975_p12, %p1969_p9 }
  0x76   :  { %1979 = shalt.err (!%p1976_p13)
}
  0x77   :  { %96 = dma.hbm_to_vmem [thread:$0]  %s2846_s6, 16, %s94_s9, [#allocation15]  }
  0x78   :  { %2022 = dma.done.wait [#allocation6], 1024  }
  0x79   :  { %2023 = vsyncadd [#allocation6], 4294966272 }
  0x7a   :  { %2024 = dma.done.wait [#allocation9], 2176  }
  0x7b   :  { %2025 = vsyncadd [#allocation9], 4294965120 }
  0x7c   :  { %2026 = dma.done.wait [#allocation12], 16384  }
  0x7d   :  { %2027 = vsyncadd [#allocation12], 4294950912 }
  0x7e   :  { %2028 = dma.done.wait [#allocation15], 4112  }
  0x7f   :  { %2029 = vsyncadd [#allocation15], 4294963184  ;;  %v2848_v0 = vmov 0.0   ;;  %v2220_v1 = vld [vmem:[#allocation11] sm:$0xff]  ;;  %v2222_v2 = vld [vmem:[#allocation11 + $0x8] sm:$0xff]  ;;  %vm312_vm0 = vcmask 130048  }
  0x80   :  { %401 = vmatprep.mubr.f32.mxu0 %v2848_v0  ;;  %514 = vmatprep.mubr.f32.mxu1 %v2848_v0  ;;  %2852 = vst [vmem:[#allocation23_spill] sm:$0xff] %v2220_v1  ;;  %2853 = vst [vmem:[#allocation24_spill] sm:$0xff] %v2222_v2  ;;  %v2224_v3 = vld [vmem:[#allocation11 + $0x10] sm:$0xff]  ;;  %v2226_v4 = vld [vmem:[#allocation11 + $0x18] sm:$0xff]  ;;  %s2652_s6 = smov 0  }
  0x81   :  { %v2228_v5 = vld [vmem:[#allocation11 + $0x20] sm:$0xff]  ;;  %v2230_v6 = vld [vmem:[#allocation11 + $0x28] sm:$0xff]  ;;  %v2232_v7 = vld [vmem:[#allocation11 + $0x30] sm:$0xff] }
  0x82   :  { %v2234_v8 = vld [vmem:[#allocation11 + $0x38] sm:$0xff]  ;;  %v2236_v9 = vld [vmem:[#allocation11 + $0x40] sm:$0xff]  ;;  %v2238_v10 = vld [vmem:[#allocation11 + $0x48] sm:$0xff] }
  0x83   :  { %v2240_v11 = vld [vmem:[#allocation11 + $0x50] sm:$0xff]  ;;  %v2242_v12 = vld [vmem:[#allocation11 + $0x58] sm:$0xff]  ;;  %v2244_v13 = vld [vmem:[#allocation11 + $0x60] sm:$0xff] }
  0x84   :  { %v2246_v14 = vld [vmem:[#allocation11 + $0x68] sm:$0xff]  ;;  %v2248_v15 = vld [vmem:[#allocation11 + $0x70] sm:$0xff]  ;;  %v2250_v16 = vld [vmem:[#allocation11 + $0x78] sm:$0xff] }
  0x85   :  { %v2252_v17 = vld [vmem:[#allocation11 + $0x80] sm:$0xff]  ;;  %v2254_v18 = vld [vmem:[#allocation11 + $0x88] sm:$0xff]  ;;  %v2256_v19 = vld [vmem:[#allocation11 + $0x90] sm:$0xff] }
  0x86   :  { %v2258_v20 = vld [vmem:[#allocation11 + $0x98] sm:$0xff]  ;;  %v2260_v21 = vld [vmem:[#allocation11 + $0xa0] sm:$0xff]  ;;  %v2262_v22 = vld [vmem:[#allocation11 + $0xa8] sm:$0xff] }
  0x87   :  { %v2264_v23 = vld [vmem:[#allocation11 + $0xb0] sm:$0xff]  ;;  %v2266_v24 = vld [vmem:[#allocation11 + $0xb8] sm:$0xff]  ;;  %v2268_v25 = vld [vmem:[#allocation11 + $0xc0] sm:$0xff] }
  0x88   :  { %v2270_v26 = vld [vmem:[#allocation11 + $0xc8] sm:$0xff]  ;;  %v2272_v27 = vld [vmem:[#allocation11 + $0xd0] sm:$0xff]  ;;  %v2274_v28 = vld [vmem:[#allocation11 + $0xd8] sm:$0xff] }
  0x89   :  { %v2276_v29 = vld [vmem:[#allocation11 + $0xe0] sm:$0xff]  ;;  %v2278_v30 = vld [vmem:[#allocation11 + $0xe8] sm:$0xff]  ;;  %v2280_v31 = vld [vmem:[#allocation11 + $0xf0] sm:$0xff] }
  0x8a   :  { %v2282_v32 = vld [vmem:[#allocation11 + $0xf8] sm:$0xff]  ;;  %v2284_v33 = vld [vmem:[#allocation11 + $0x100] sm:$0xff]  ;;  %v2286_v34 = vld [vmem:[#allocation11 + $0x108] sm:$0xff] }
  0x8b   :  { %v2288_v35 = vld [vmem:[#allocation11 + $0x110] sm:$0xff]  ;;  %v2290_v36 = vld [vmem:[#allocation11 + $0x118] sm:$0xff]  ;;  %v2292_v37 = vld [vmem:[#allocation11 + $0x120] sm:$0xff] }
  0x8c   :  { %v2294_v38 = vld [vmem:[#allocation11 + $0x128] sm:$0xff]  ;;  %v2296_v39 = vld [vmem:[#allocation11 + $0x130] sm:$0xff]  ;;  %v2298_v40 = vld [vmem:[#allocation11 + $0x138] sm:$0xff] }
  0x8d   :  { %v2300_v41 = vld [vmem:[#allocation11 + $0x140] sm:$0xff]  ;;  %v2302_v42 = vld [vmem:[#allocation11 + $0x148] sm:$0xff]  ;;  %v2304_v43 = vld [vmem:[#allocation11 + $0x150] sm:$0xff] }
  0x8e   :  { %2854 = vst [vmem:[#allocation25_spill] sm:$0xff] %v2300_v41  ;;  %2855 = vst [vmem:[#allocation26_spill] sm:$0xff] %v2304_v43  ;;  %v2306_v44 = vld [vmem:[#allocation11 + $0x158] sm:$0xff]  ;;  %v2308_v45 = vld [vmem:[#allocation11 + $0x160] sm:$0xff] }
  0x8f   :  { %2856 = vst [vmem:[#allocation27_spill] sm:$0xff] %v2306_v44  ;;  %2857 = vst [vmem:[#allocation28_spill] sm:$0xff] %v2308_v45  ;;  %v2310_v46 = vld [vmem:[#allocation11 + $0x168] sm:$0xff]  ;;  %v2312_v47 = vld [vmem:[#allocation11 + $0x170] sm:$0xff] }
  0x90   :  { %2858 = vst [vmem:[#allocation29_spill] sm:$0xff] %v2312_v47  ;;  %v2314_v48 = vld [vmem:[#allocation11 + $0x178] sm:$0xff]  ;;  %v2316_v49 = vld [vmem:[#allocation11 + $0x180] sm:$0xff]  ;;  %v2318_v50 = vld [vmem:[#allocation11 + $0x188] sm:$0xff] }
  0x91   :  { %2859 = vst [vmem:[#allocation30_spill] sm:$0xff] %v2314_v48  ;;  %2860 = vst [vmem:[#allocation31_spill] sm:$0xff] %v2316_v49  ;;  %v2320_v51 = vld [vmem:[#allocation11 + $0x190] sm:$0xff]  ;;  %v2322_v52 = vld [vmem:[#allocation11 + $0x198] sm:$0xff] }
  0x92   :  { %2861 = vst [vmem:[#allocation32_spill] sm:$0xff] %v2318_v50  ;;  %2862 = vst [vmem:[#allocation33_spill] sm:$0xff] %v2320_v51  ;;  %v2324_v53 = vld [vmem:[#allocation11 + $0x1a0] sm:$0xff]  ;;  %v2326_v54 = vld [vmem:[#allocation11 + $0x1a8] sm:$0xff] }
  0x93   :  { %2863 = vst [vmem:[#allocation34_spill] sm:$0xff] %v2322_v52  ;;  %2864 = vst [vmem:[#allocation35_spill] sm:$0xff] %v2324_v53  ;;  %v2328_v55 = vld [vmem:[#allocation11 + $0x1b0] sm:$0xff]  ;;  %v2330_v56 = vld [vmem:[#allocation11 + $0x1b8] sm:$0xff] }
  0x94   :  { %2865 = vst [vmem:[#allocation36_spill] sm:$0xff] %v2326_v54  ;;  %2866 = vst [vmem:[#allocation37_spill] sm:$0xff] %v2328_v55  ;;  %v2332_v57 = vld [vmem:[#allocation11 + $0x1c0] sm:$0xff]  ;;  %v2334_v58 = vld [vmem:[#allocation11 + $0x1c8] sm:$0xff] }
  0x95   :  { %2867 = vst [vmem:[#allocation38_spill] sm:$0xff] %v2330_v56  ;;  %2868 = vst [vmem:[#allocation39_spill] sm:$0xff] %v2332_v57  ;;  %v2336_v59 = vld [vmem:[#allocation11 + $0x1d0] sm:$0xff]  ;;  %v2338_v60 = vld [vmem:[#allocation11 + $0x1d8] sm:$0xff] }
  0x96   :  { %2869 = vst [vmem:[#allocation40_spill] sm:$0xff] %v2334_v58  ;;  %2870 = vst [vmem:[#allocation41_spill] sm:$0xff] %v2336_v59  ;;  %v2340_v61 = vld [vmem:[#allocation11 + $0x1e0] sm:$0xff]  ;;  %v2342_v62 = vld [vmem:[#allocation11 + $0x1e8] sm:$0xff] }
  0x97   :  { %2871 = vst [vmem:[#allocation42_spill] sm:$0xff] %v2338_v60  ;;  %2872 = vst [vmem:[#allocation43_spill] sm:$0xff] %v2340_v61  ;;  %v2344_v63 = vld [vmem:[#allocation11 + $0x1f0] sm:$0xff]  ;;  %v2346_v0 = vld [vmem:[#allocation11 + $0x1f8] sm:$0xff] }
  0x98   :  { %2873 = vst [vmem:[#allocation44_spill] sm:$0xff] %v2342_v62  ;;  %2874 = vst [vmem:[#allocation45_spill] sm:$0xff] %v2344_v63  ;;  %v2348_v51 = vld [vmem:[#allocation13] sm:$0xff]  ;;  %v2350_v55 = vld [vmem:[#allocation13 + $0x8] sm:$0xff] }
  0x99   :  { %2875 = vst [vmem:[#allocation46_spill] sm:$0xff] %v2346_v0  ;;  %2876 = vst [vmem:[#allocation47_spill] sm:$0xff] %v2348_v51  ;;  %v2352_v53 = vld [vmem:[#allocation13 + $0x10] sm:$0xff]  ;;  %v2354_v57 = vld [vmem:[#allocation13 + $0x18] sm:$0xff] }
  0x9a   :  { %2877 = vst [vmem:[#allocation48_spill] sm:$0xff] %v2350_v55  ;;  %2878 = vst [vmem:[#allocation49_spill] sm:$0xff] %v2352_v53  ;;  %v2356_v58 = vld [vmem:[#allocation13 + $0x20] sm:$0xff]  ;;  %v2358_v59 = vld [vmem:[#allocation13 + $0x28] sm:$0xff] }
  0x9b   :  { %2879 = vst [vmem:[#allocation50_spill] sm:$0xff] %v2354_v57  ;;  %2880 = vst [vmem:[#allocation51_spill] sm:$0xff] %v2356_v58  ;;  %v2360_v60 = vld [vmem:[#allocation13 + $0x30] sm:$0xff]  ;;  %v2362_v61 = vld [vmem:[#allocation13 + $0x38] sm:$0xff] }
  0x9c   :  { %2881 = vst [vmem:[#allocation52_spill] sm:$0xff] %v2358_v59  ;;  %2882 = vst [vmem:[#allocation53_spill] sm:$0xff] %v2360_v60  ;;  %v2364_v62 = vld [vmem:[#allocation13 + $0x40] sm:$0xff]  ;;  %v2366_v63 = vld [vmem:[#allocation13 + $0x48] sm:$0xff] }
  0x9d   :  { %2883 = vst [vmem:[#allocation54_spill] sm:$0xff] %v2362_v61  ;;  %2884 = vst [vmem:[#allocation55_spill] sm:$0xff] %v2364_v62  ;;  %v2368_v0 = vld [vmem:[#allocation13 + $0x50] sm:$0xff]  ;;  %v2370_v51 = vld [vmem:[#allocation13 + $0x58] sm:$0xff] }
  0x9e   :  { %2885 = vst [vmem:[#allocation56_spill] sm:$0xff] %v2366_v63  ;;  %2886 = vst [vmem:[#allocation57_spill] sm:$0xff] %v2368_v0  ;;  %v2372_v55 = vld [vmem:[#allocation13 + $0x60] sm:$0xff]  ;;  %v2374_v53 = vld [vmem:[#allocation13 + $0x68] sm:$0xff] }
  0x9f   :  { %2887 = vst [vmem:[#allocation58_spill] sm:$0xff] %v2370_v51  ;;  %2888 = vst [vmem:[#allocation59_spill] sm:$0xff] %v2372_v55  ;;  %v2376_v57 = vld [vmem:[#allocation13 + $0x70] sm:$0xff]  ;;  %v2378_v58 = vld [vmem:[#allocation13 + $0x78] sm:$0xff] }
  0xa0   :  { %2889 = vst [vmem:[#allocation60_spill] sm:$0xff] %v2374_v53  ;;  %2890 = vst [vmem:[#allocation61_spill] sm:$0xff] %v2376_v57  ;;  %v2380_v59 = vld [vmem:[#allocation13 + $0x80] sm:$0xff]  ;;  %v2382_v60 = vld [vmem:[#allocation13 + $0x88] sm:$0xff] }
  0xa1   :  { %2891 = vst [vmem:[#allocation62_spill] sm:$0xff] %v2378_v58  ;;  %2892 = vst [vmem:[#allocation63_spill] sm:$0xff] %v2380_v59  ;;  %v2384_v61 = vld [vmem:[#allocation13 + $0x90] sm:$0xff]  ;;  %v2386_v62 = vld [vmem:[#allocation13 + $0x98] sm:$0xff] }
  0xa2   :  { %2893 = vst [vmem:[#allocation64_spill] sm:$0xff] %v2382_v60  ;;  %2894 = vst [vmem:[#allocation65_spill] sm:$0xff] %v2384_v61  ;;  %v2388_v63 = vld [vmem:[#allocation13 + $0xa0] sm:$0xff]  ;;  %v2390_v0 = vld [vmem:[#allocation13 + $0xa8] sm:$0xff] }
  0xa3   :  { %2895 = vst [vmem:[#allocation66_spill] sm:$0xff] %v2386_v62  ;;  %2896 = vst [vmem:[#allocation67_spill] sm:$0xff] %v2388_v63  ;;  %v2392_v51 = vld [vmem:[#allocation13 + $0xb0] sm:$0xff]  ;;  %v2394_v55 = vld [vmem:[#allocation13 + $0xb8] sm:$0xff] }
  0xa4   :  { %2897 = vst [vmem:[#allocation68_spill] sm:$0xff] %v2390_v0  ;;  %2898 = vst [vmem:[#allocation69_spill] sm:$0xff] %v2392_v51  ;;  %v2396_v53 = vld [vmem:[#allocation13 + $0xc0] sm:$0xff]  ;;  %v2398_v57 = vld [vmem:[#allocation13 + $0xc8] sm:$0xff] }
  0xa5   :  { %2899 = vst [vmem:[#allocation70_spill] sm:$0xff] %v2394_v55  ;;  %2900 = vst [vmem:[#allocation71_spill] sm:$0xff] %v2396_v53  ;;  %v2400_v58 = vld [vmem:[#allocation13 + $0xd0] sm:$0xff]  ;;  %v2402_v59 = vld [vmem:[#allocation13 + $0xd8] sm:$0xff] }
  0xa6   :  { %2901 = vst [vmem:[#allocation72_spill] sm:$0xff] %v2398_v57  ;;  %2902 = vst [vmem:[#allocation73_spill] sm:$0xff] %v2400_v58  ;;  %v2404_v60 = vld [vmem:[#allocation13 + $0xe0] sm:$0xff]  ;;  %v2406_v61 = vld [vmem:[#allocation13 + $0xe8] sm:$0xff] }
  0xa7   :  { %2903 = vst [vmem:[#allocation74_spill] sm:$0xff] %v2402_v59  ;;  %2904 = vst [vmem:[#allocation75_spill] sm:$0xff] %v2404_v60  ;;  %v2408_v62 = vld [vmem:[#allocation13 + $0xf0] sm:$0xff]  ;;  %v2410_v63 = vld [vmem:[#allocation13 + $0xf8] sm:$0xff] }
  0xa8   :  { %2905 = vst [vmem:[#allocation76_spill] sm:$0xff] %v2406_v61  ;;  %2906 = vst [vmem:[#allocation77_spill] sm:$0xff] %v2408_v62  ;;  %v2412_v0 = vld [vmem:[#allocation13 + $0x100] sm:$0xff]  ;;  %v2414_v51 = vld [vmem:[#allocation13 + $0x108] sm:$0xff] }
  0xa9   :  { %2907 = vst [vmem:[#allocation78_spill] sm:$0xff] %v2410_v63  ;;  %2908 = vst [vmem:[#allocation79_spill] sm:$0xff] %v2412_v0  ;;  %v2416_v55 = vld [vmem:[#allocation13 + $0x110] sm:$0xff]  ;;  %v2418_v53 = vld [vmem:[#allocation13 + $0x118] sm:$0xff] }
  0xaa   :  { %2909 = vst [vmem:[#allocation80_spill] sm:$0xff] %v2414_v51  ;;  %2910 = vst [vmem:[#allocation81_spill] sm:$0xff] %v2416_v55  ;;  %v2420_v57 = vld [vmem:[#allocation13 + $0x120] sm:$0xff]  ;;  %v2422_v58 = vld [vmem:[#allocation13 + $0x128] sm:$0xff] }
  0xab   :  { %2911 = vst [vmem:[#allocation82_spill] sm:$0xff] %v2418_v53  ;;  %2912 = vst [vmem:[#allocation83_spill] sm:$0xff] %v2420_v57  ;;  %v2424_v59 = vld [vmem:[#allocation13 + $0x130] sm:$0xff]  ;;  %v2426_v60 = vld [vmem:[#allocation13 + $0x138] sm:$0xff] }
  0xac   :  { %2913 = vst [vmem:[#allocation84_spill] sm:$0xff] %v2422_v58  ;;  %2914 = vst [vmem:[#allocation85_spill] sm:$0xff] %v2424_v59  ;;  %v2428_v61 = vld [vmem:[#allocation13 + $0x140] sm:$0xff]  ;;  %v2430_v62 = vld [vmem:[#allocation13 + $0x148] sm:$0xff] }
  0xad   :  { %2915 = vst [vmem:[#allocation86_spill] sm:$0xff] %v2426_v60  ;;  %2916 = vst [vmem:[#allocation87_spill] sm:$0xff] %v2428_v61  ;;  %v2432_v63 = vld [vmem:[#allocation13 + $0x150] sm:$0xff]  ;;  %v2434_v0 = vld [vmem:[#allocation13 + $0x158] sm:$0xff] }
  0xae   :  { %2917 = vst [vmem:[#allocation88_spill] sm:$0xff] %v2430_v62  ;;  %2918 = vst [vmem:[#allocation89_spill] sm:$0xff] %v2432_v63  ;;  %v2436_v51 = vld [vmem:[#allocation13 + $0x160] sm:$0xff]  ;;  %v2438_v55 = vld [vmem:[#allocation13 + $0x168] sm:$0xff] }
  0xaf   :  { %2919 = vst [vmem:[#allocation90_spill] sm:$0xff] %v2434_v0  ;;  %2920 = vst [vmem:[#allocation91_spill] sm:$0xff] %v2436_v51  ;;  %v2440_v53 = vld [vmem:[#allocation13 + $0x170] sm:$0xff]  ;;  %v2442_v57 = vld [vmem:[#allocation13 + $0x178] sm:$0xff] }
  0xb0   :  { %2921 = vst [vmem:[#allocation92_spill] sm:$0xff] %v2438_v55  ;;  %2922 = vst [vmem:[#allocation93_spill] sm:$0xff] %v2440_v53  ;;  %v2444_v58 = vld [vmem:[#allocation13 + $0x180] sm:$0xff]  ;;  %v2446_v59 = vld [vmem:[#allocation13 + $0x188] sm:$0xff] }
  0xb1   :  { %2923 = vst [vmem:[#allocation94_spill] sm:$0xff] %v2442_v57  ;;  %2924 = vst [vmem:[#allocation95_spill] sm:$0xff] %v2444_v58  ;;  %v2448_v60 = vld [vmem:[#allocation13 + $0x190] sm:$0xff]  ;;  %v2450_v61 = vld [vmem:[#allocation13 + $0x198] sm:$0xff] }
  0xb2   :  { %2925 = vst [vmem:[#allocation96_spill] sm:$0xff] %v2446_v59  ;;  %2926 = vst [vmem:[#allocation97_spill] sm:$0xff] %v2448_v60  ;;  %v2452_v62 = vld [vmem:[#allocation13 + $0x1a0] sm:$0xff]  ;;  %v2454_v63 = vld [vmem:[#allocation13 + $0x1a8] sm:$0xff] }
  0xb3   :  { %2927 = vst [vmem:[#allocation98_spill] sm:$0xff] %v2450_v61  ;;  %2928 = vst [vmem:[#allocation99_spill] sm:$0xff] %v2452_v62  ;;  %v2456_v0 = vld [vmem:[#allocation13 + $0x1b0] sm:$0xff]  ;;  %v2458_v51 = vld [vmem:[#allocation13 + $0x1b8] sm:$0xff] }
  0xb4   :  { %2929 = vst [vmem:[#allocation100_spill] sm:$0xff] %v2454_v63  ;;  %2930 = vst [vmem:[#allocation101_spill] sm:$0xff] %v2456_v0  ;;  %v2460_v55 = vld [vmem:[#allocation13 + $0x1c0] sm:$0xff]  ;;  %v2462_v53 = vld [vmem:[#allocation13 + $0x1c8] sm:$0xff] }
  0xb5   :  { %2931 = vst [vmem:[#allocation102_spill] sm:$0xff] %v2458_v51  ;;  %2932 = vst [vmem:[#allocation103_spill] sm:$0xff] %v2460_v55  ;;  %v2464_v57 = vld [vmem:[#allocation13 + $0x1d0] sm:$0xff]  ;;  %v2466_v58 = vld [vmem:[#allocation13 + $0x1d8] sm:$0xff] }
  0xb6   :  { %2933 = vst [vmem:[#allocation104_spill] sm:$0xff] %v2462_v53  ;;  %2934 = vst [vmem:[#allocation105_spill] sm:$0xff] %v2464_v57  ;;  %v2468_v59 = vld [vmem:[#allocation13 + $0x1e0] sm:$0xff]  ;;  %v2470_v60 = vld [vmem:[#allocation13 + $0x1e8] sm:$0xff] }
  0xb7   :  { %2935 = vst [vmem:[#allocation106_spill] sm:$0xff] %v2466_v58  ;;  %2936 = vst [vmem:[#allocation107_spill] sm:$0xff] %v2468_v59  ;;  %v2472_v61 = vld [vmem:[#allocation13 + $0x1f0] sm:$0xff]  ;;  %v2474_v62 = vld [vmem:[#allocation13 + $0x1f8] sm:$0xff] }
  0xb8   :  { %2937 = vst [vmem:[#allocation108_spill] sm:$0xff] %v2470_v60  ;;  %2938 = vst [vmem:[#allocation109_spill] sm:$0xff] %v2472_v61  ;;  %v119_v63 = vld [vmem:[#allocation8 + $0x8] sm:$0xff]  ;;  %v121_v49 = vld [vmem:[#allocation8 + $0x18] sm:$0xff] }
  0xb9   :  { %2939 = vst [vmem:[#allocation110_spill] sm:$0xff] %v2474_v62  ;;  %v127_v0 = vld [vmem:[#allocation8 + $0x48] sm:$0xff]  ;;  %v129_v51 = vld [vmem:[#allocation8 + $0x58] sm:$0xff]  ;;  %v118_v52 = vld [vmem:[#allocation8] sm:$0xff] }
  0xba   :  { %v1546_v56 = vpack.c.bf16 %v127_v0, %v119_v63  ;;  %v1550_v55 = vpack.c.bf16 %v129_v51, %v121_v49  ;;  %v126_v53 = vld [vmem:[#allocation8 + $0x40] sm:$0xff]  ;;  %v120_v47 = vld [vmem:[#allocation8 + $0x10] sm:$0xff]  ;;  %v123_v59 = vld [vmem:[#allocation8 + $0x28] sm:$0xff] }
  0xbb   :  { %v1548_v57 = vpack.c.bf16 %v126_v53, %v118_v52  ;;  %v128_v43 = vld [vmem:[#allocation8 + $0x50] sm:$0xff]  ;;  %v2476_v58 = vld [vmem:[#allocation5] sm:$0xff]  ;;  %v131_v61 = vld [vmem:[#allocation8 + $0x68] sm:$0xff] }
  0xbc   :  { %1547 = vmatprep.subr.bf16.mxu0 %v1546_v56  ;;  %1551 = vmatprep.subr.bf16.mxu1 %v1550_v55  ;;  %v1552_v60 = vpack.c.bf16 %v128_v43, %v120_v47  ;;  %v125_v54 = vld [vmem:[#allocation8 + $0x38] sm:$0xff]  ;;  %v1554_v50 = vpack.c.bf16 %v131_v61, %v123_v59  ;;  %v122_v0 = vld [vmem:[#allocation8 + $0x20] sm:$0xff]  ;;  %v124_v51 = vld [vmem:[#allocation8 + $0x30] sm:$0xff]  ;;  %v2940_v47 = vmov 0.0  }
  0xbd   :  { %v133_v62 = vld [vmem:[#allocation8 + $0x78] sm:$0xff]  ;;  %1549 = vmatpush1.bf16.msra.mxu0 %v1548_v57  ;;  %v130_v49 = vld [vmem:[#allocation8 + $0x60] sm:$0xff]  ;;  %v132_v52 = vld [vmem:[#allocation8 + $0x70] sm:$0xff] }
  0xbe   :  { %v1558_v45 = vpack.c.bf16 %v133_v62, %v125_v54  ;;  %1553 = vmatpush1.bf16.msra.mxu1 %v1552_v60  ;;  %v1556_v63 = vpack.c.bf16 %v130_v49, %v122_v0  ;;  %1555 = vmatprep.subr.bf16.mxu0 %v1554_v50  ;;  %v1560_v53 = vpack.c.bf16 %v132_v52, %v124_v51  ;;  %v264_v43 = vld [vmem:[#allocation5 + $0x8] sm:$0xff]  ;;  %v266_v50 = vld [vmem:[#allocation5 + $0x18] sm:$0xff]  ;;  %v267_v54 = vld [vmem:[#allocation5 + $0x20] sm:$0xff] }
  0xbf   :  { %v268_v55 = vld [vmem:[#allocation5 + $0x28] sm:$0xff]  ;;  %v269_v56 = vld [vmem:[#allocation5 + $0x30] sm:$0xff]  ;;  %v270_v57 = vld [vmem:[#allocation5 + $0x38] sm:$0xff] }
  0xc0   :  { %1559 = vmatprep.subr.bf16.mxu1 %v1558_v45  ;;  %1439 = vmatmul.mubr.msk.f32.vlgmr.msra.gmra.mrb[0].mxu0 %vm312_vm0, %v2476_v58  ;;  %v265_v45 = vld [vmem:[#allocation5 + $0x10] sm:$0xff]  ;;  %v2547_v61 = vld [vmem:[#allocation10] sm:$0xff] }
  0xc1   :  { %1447 = vmatmul.mubr.msk.f32.vlgmr.msra.gmra.mrb[0].mxu1 %vm312_vm0, %v2476_v58  ;;  %1557 = vmatpush1.bf16.msra.mxu0 %v1556_v63 }
  0xc2   :  { %1561 = vmatpush1.bf16.msra.mxu1 %v1560_v53  ;;  %407 = vmatprep.mubr.f32.mxu0 %v2940_v47 }
  0xc3   :  { %520 = vmatprep.mubr.f32.mxu1 %v2940_v47 }
  0xc4   :  { %1440 = vmatmul.mubr.msk.f32.gmra.mrb[2].mxu0 %vm312_vm0, %v264_v43 }
  0xc5   :  { %1448 = vmatmul.mubr.msk.f32.gmra.mrb[2].mxu1 %vm312_vm0, %v264_v43  ;;  %413 = vmatprep.mubr.f32.mxu0 %v2940_v47 }
  0xc6   :  { %526 = vmatprep.mubr.f32.mxu1 %v2940_v47 }
  0xc8   :  { %1441 = vmatmul.mubr.msk.f32.gmra.mrb[4].mxu0 %vm312_vm0, %v265_v45 }
  0xc9   :  { %1449 = vmatmul.mubr.msk.f32.gmra.mrb[4].mxu1 %vm312_vm0, %v265_v45  ;;  %419 = vmatprep.mubr.f32.mxu0 %v2940_v47 }
  0xca   :  { %532 = vmatprep.mubr.f32.mxu1 %v2940_v47 }
  0xcc   :  { %1442 = vmatmul.mubr.msk.f32.gmra.mrb[6].mxu0 %vm312_vm0, %v266_v50 }
  0xcd   :  { %1450 = vmatmul.mubr.msk.f32.gmra.mrb[6].mxu1 %vm312_vm0, %v266_v50  ;;  %425 = vmatprep.mubr.f32.mxu0 %v2940_v47 }
  0xce   :  { %538 = vmatprep.mubr.f32.mxu1 %v2940_v47 }
  0xd0   :  { %1443 = vmatmul.mubr.msk.f32.gmra.mrb[8].mxu0 %vm312_vm0, %v267_v54 }
  0xd1   :  { %1451 = vmatmul.mubr.msk.f32.gmra.mrb[8].mxu1 %vm312_vm0, %v267_v54  ;;  %431 = vmatprep.mubr.f32.mxu0 %v2940_v47 }
  0xd2   :  { %544 = vmatprep.mubr.f32.mxu1 %v2940_v47 }
  0xd4   :  { %1444 = vmatmul.mubr.msk.f32.gmra.mrb[10].mxu0 %vm312_vm0, %v268_v55 }
  0xd5   :  { %1452 = vmatmul.mubr.msk.f32.gmra.mrb[10].mxu1 %vm312_vm0, %v268_v55  ;;  %437 = vmatprep.mubr.f32.mxu0 %v2940_v47 }
  0xd6   :  { %550 = vmatprep.mubr.f32.mxu1 %v2940_v47 }
  0xd8   :  { %1445 = vmatmul.mubr.msk.f32.gmra.mrb[12].mxu0 %vm312_vm0, %v269_v56 }
  0xd9   :  { %1453 = vmatmul.mubr.msk.f32.gmra.mrb[12].mxu1 %vm312_vm0, %v269_v56  ;;  %443 = vmatprep.mubr.f32.mxu0 %v2940_v47 }
  0xda   :  { %556 = vmatprep.mubr.f32.mxu1 %v2940_v47 }
  0xdc   :  { %1446 = vmatmul.mubr.msk.f32.gmra.mrb[14].mxu0 %vm312_vm0, %v270_v57 }
  0xdd   :  { %1454 = vmatmul.mubr.msk.f32.gmra.mrb[14].mxu1 %vm312_vm0, %v270_v57  ;;  %627 = vmatprep.mubr.f32.mxu0 %v2940_v47 }
  0xde   :  { %740 = vmatprep.mubr.f32.mxu1 %v2940_v47 }
  0xe0   :  { %1455 = vmatmul.mubr.msk.f32.vlgmr.msra.gmra.mrb[16].mxu0 %vm312_vm0, %v2476_v58 }
  0xe1   :  { %1463 = vmatmul.mubr.msk.f32.vlgmr.msra.gmra.mrb[16].mxu1 %vm312_vm0, %v2476_v58  ;;  %633 = vmatprep.mubr.f32.mxu0 %v2940_v47  ;;  %v272_v58 = vlaneseq }
  0xe2   :  { %746 = vmatprep.mubr.f32.mxu1 %v2940_v47 }
  0xe3   :  { %v2544_v59 = vshrl.u32 %v272_v58, 7 }
  0xe4   :  { %1456 = vmatmul.mubr.msk.f32.gmra.mrb[18].mxu0 %vm312_vm0, %v264_v43 }
  0xe5   :  { %1464 = vmatmul.mubr.msk.f32.gmra.mrb[18].mxu1 %vm312_vm0, %v264_v43  ;;  %639 = vmatprep.mubr.f32.mxu0 %v2940_v47  ;;  %v274_v60 = vsub.s32 0, %v2544_v59  ;;  %v282_v62 = vsub.s32 2, %v2544_v59  ;;  %v278_v0 = vsub.s32 1, %v2544_v59  ;;  %v286_v49 = vsub.s32 3, %v2544_v59 }
  0xe6   :  { %752 = vmatprep.mubr.f32.mxu1 %v2940_v47 }
  0xe7   :  { %v2553_v51 = vrot.slane %v2547_v61, %v274_v60  ;;  %v2556_v63 = vrot.slane %v2547_v61, %v282_v62  ;;  %v2559_v52 = vrot.slane %v2547_v61, %v278_v0  ;;  %v2562_v53 = vrot.slane %v2547_v61, %v286_v49 }
  0xe8   :  { %1457 = vmatmul.mubr.msk.f32.gmra.mrb[20].mxu0 %vm312_vm0, %v265_v45 }
  0xe9   :  { %1465 = vmatmul.mubr.msk.f32.gmra.mrb[20].mxu1 %vm312_vm0, %v265_v45  ;;  %645 = vmatprep.mubr.f32.mxu0 %v2940_v47 }
  0xea   :  { %758 = vmatprep.mubr.f32.mxu1 %v2940_v47 }
  0xec   :  { %1458 = vmatmul.mubr.msk.f32.gmra.mrb[22].mxu0 %vm312_vm0, %v266_v50 }
  0xed   :  { %1466 = vmatmul.mubr.msk.f32.gmra.mrb[22].mxu1 %vm312_vm0, %v266_v50  ;;  %651 = vmatprep.mubr.f32.mxu0 %v2940_v47 }
  0xee   :  { %764 = vmatprep.mubr.f32.mxu1 %v2940_v47 }
  0xf0   :  { %1459 = vmatmul.mubr.msk.f32.gmra.mrb[24].mxu0 %vm312_vm0, %v267_v54 }
  0xf1   :  { %1467 = vmatmul.mubr.msk.f32.gmra.mrb[24].mxu1 %vm312_vm0, %v267_v54  ;;  %657 = vmatprep.mubr.f32.mxu0 %v2940_v47 }
  0xf2   :  { %770 = vmatprep.mubr.f32.mxu1 %v2940_v47 }
  0xf4   :  { %1460 = vmatmul.mubr.msk.f32.gmra.mrb[26].mxu0 %vm312_vm0, %v268_v55 }
  0xf5   :  { %1468 = vmatmul.mubr.msk.f32.gmra.mrb[26].mxu1 %vm312_vm0, %v268_v55  ;;  %663 = vmatprep.mubr.f32.mxu0 %v2940_v47 }
  0xf6   :  { %776 = vmatprep.mubr.f32.mxu1 %v2940_v47 }
  0xf8   :  { %1461 = vmatmul.mubr.msk.f32.gmra.mrb[28].mxu0 %vm312_vm0, %v269_v56 }
  0xf9   :  { %1469 = vmatmul.mubr.msk.f32.gmra.mrb[28].mxu1 %vm312_vm0, %v269_v56  ;;  %669 = vmatprep.mubr.f32.mxu0 %v2940_v47 }
  0xfa   :  { %782 = vmatprep.mubr.f32.mxu1 %v2940_v47 }
  0xfc   :  { %1462 = vmatmul.mubr.msk.f32.gmra.mrb[30].mxu0 %vm312_vm0, %v270_v57 }
  0xfd   :  { %1470 = vmatmul.mubr.msk.f32.gmra.mrb[30].mxu1 %vm312_vm0, %v270_v57 }
 0x193   :  { %v403_v43 = vpop.f32.mrb[0].mxu0 }
 0x194   :  { %v404_v47 = vadd.f32 %v403_v43, %v2553_v51  ;;  %v516_v45 = vpop.f32.mrb[0].mxu1  ;;  %v405_v50 = vpop.f32.mrb[1].mxu0 }
 0x195   :  { %v517_v54 = vadd.f32 %v516_v45, %v2556_v63  ;;  %v406_v55 = vadd.f32 %v405_v50, %v2559_v52  ;;  %v518_v56 = vpop.f32.mrb[1].mxu1 }
 0x196   :  { %789 = vst [vmem:[#allocation2] sm:$0xff] %v404_v47  ;;  %v519_v57 = vadd.f32 %v518_v56, %v2562_v53 }
 0x197   :  { %791 = vst [vmem:[#allocation2 + $0x10] sm:$0xff] %v517_v54  ;;  %790 = vst [vmem:[#allocation2 + $0x8] sm:$0xff] %v406_v55  ;;  %v409_v58 = vpop.f32.mrb[2].mxu0 }
 0x198   :  { %792 = vst [vmem:[#allocation2 + $0x18] sm:$0xff] %v519_v57  ;;  %v410_v60 = vadd.f32 %v409_v58, %v2553_v51  ;;  %v522_v62 = vpop.f32.mrb[2].mxu1  ;;  %v411_v0 = vpop.f32.mrb[3].mxu0 }
 0x199   :  { %v523_v49 = vadd.f32 %v522_v62, %v2556_v63  ;;  %v412_v43 = vadd.f32 %v411_v0, %v2559_v52  ;;  %v524_v41 = vpop.f32.mrb[3].mxu1 }
 0x19a   :  { %793 = vst [vmem:[#allocation2 + $0x20] sm:$0xff] %v410_v60  ;;  %v525_v45 = vadd.f32 %v524_v41, %v2562_v53 }
 0x19b   :  { %795 = vst [vmem:[#allocation2 + $0x30] sm:$0xff] %v523_v49  ;;  %794 = vst [vmem:[#allocation2 + $0x28] sm:$0xff] %v412_v43  ;;  %v415_v47 = vpop.f32.mrb[4].mxu0 }
 0x19c   :  { %796 = vst [vmem:[#allocation2 + $0x38] sm:$0xff] %v525_v45  ;;  %v416_v50 = vadd.f32 %v415_v47, %v2553_v51  ;;  %v528_v54 = vpop.f32.mrb[4].mxu1  ;;  %v417_v55 = vpop.f32.mrb[5].mxu0 }
 0x19d   :  { %v529_v56 = vadd.f32 %v528_v54, %v2556_v63  ;;  %v418_v57 = vadd.f32 %v417_v55, %v2559_v52  ;;  %v530_v58 = vpop.f32.mrb[5].mxu1 }
 0x19e   :  { %797 = vst [vmem:[#allocation2 + $0x40] sm:$0xff] %v416_v50  ;;  %v531_v62 = vadd.f32 %v530_v58, %v2562_v53 }
 0x19f   :  { %799 = vst [vmem:[#allocation2 + $0x50] sm:$0xff] %v529_v56  ;;  %798 = vst [vmem:[#allocation2 + $0x48] sm:$0xff] %v418_v57  ;;  %v421_v60 = vpop.f32.mrb[6].mxu0 }
 0x1a0   :  { %800 = vst [vmem:[#allocation2 + $0x58] sm:$0xff] %v531_v62  ;;  %v422_v41 = vadd.f32 %v421_v60, %v2553_v51  ;;  %v534_v0 = vpop.f32.mrb[6].mxu1  ;;  %v423_v49 = vpop.f32.mrb[7].mxu0 }
 0x1a1   :  { %v535_v43 = vadd.f32 %v534_v0, %v2556_v63  ;;  %v424_v45 = vadd.f32 %v423_v49, %v2559_v52  ;;  %v536_v47 = vpop.f32.mrb[7].mxu1 }
 0x1a2   :  { %801 = vst [vmem:[#allocation2 + $0x60] sm:$0xff] %v422_v41  ;;  %v537_v54 = vadd.f32 %v536_v47, %v2562_v53 }
 0x1a3   :  { %803 = vst [vmem:[#allocation2 + $0x70] sm:$0xff] %v535_v43  ;;  %802 = vst [vmem:[#allocation2 + $0x68] sm:$0xff] %v424_v45  ;;  %v427_v50 = vpop.f32.mrb[8].mxu0 }
 0x1a4   :  { %804 = vst [vmem:[#allocation2 + $0x78] sm:$0xff] %v537_v54  ;;  %v428_v55 = vadd.f32 %v427_v50, %v2553_v51  ;;  %v540_v56 = vpop.f32.mrb[8].mxu1  ;;  %v429_v57 = vpop.f32.mrb[9].mxu0 }
 0x1a5   :  { %v541_v58 = vadd.f32 %v540_v56, %v2556_v63  ;;  %v430_v62 = vadd.f32 %v429_v57, %v2559_v52  ;;  %v542_v60 = vpop.f32.mrb[9].mxu1 }
 0x1a6   :  { %805 = vst [vmem:[#allocation2 + $0x80] sm:$0xff] %v428_v55  ;;  %v543_v0 = vadd.f32 %v542_v60, %v2562_v53  ;;  %v290_v60 = vsub.s32 4, %v2544_v59 }
 0x1a7   :  { %807 = vst [vmem:[#allocation2 + $0x90] sm:$0xff] %v541_v58  ;;  %806 = vst [vmem:[#allocation2 + $0x88] sm:$0xff] %v430_v62  ;;  %v433_v41 = vpop.f32.mrb[10].mxu0 }
 0x1a8   :  { %808 = vst [vmem:[#allocation2 + $0x98] sm:$0xff] %v543_v0  ;;  %v434_v49 = vadd.f32 %v433_v41, %v2553_v51  ;;  %v546_v43 = vpop.f32.mrb[10].mxu1  ;;  %v435_v45 = vpop.f32.mrb[11].mxu0 }
 0x1a9   :  { %v547_v47 = vadd.f32 %v546_v43, %v2556_v63  ;;  %v436_v54 = vadd.f32 %v435_v45, %v2559_v52  ;;  %v548_v50 = vpop.f32.mrb[11].mxu1  ;;  %v298_v45 = vsub.s32 6, %v2544_v59 }
 0x1aa   :  { %809 = vst [vmem:[#allocation2 + $0xa0] sm:$0xff] %v434_v49  ;;  %v549_v56 = vadd.f32 %v548_v50, %v2562_v53  ;;  %v294_v49 = vsub.s32 5, %v2544_v59 }
 0x1ab   :  { %811 = vst [vmem:[#allocation2 + $0xb0] sm:$0xff] %v547_v47  ;;  %810 = vst [vmem:[#allocation2 + $0xa8] sm:$0xff] %v436_v54  ;;  %v439_v55 = vpop.f32.mrb[12].mxu0  ;;  %v302_v54 = vsub.s32 7, %v2544_v59 }
 0x1ac   :  { %812 = vst [vmem:[#allocation2 + $0xb8] sm:$0xff] %v549_v56  ;;  %v440_v57 = vadd.f32 %v439_v55, %v2553_v51  ;;  %v552_v58 = vpop.f32.mrb[12].mxu1  ;;  %v441_v62 = vpop.f32.mrb[13].mxu0  ;;  %v2606_v59 = vrot.slane %v2547_v61, %v294_v49 }
 0x1ad   :  { %v553_v0 = vadd.f32 %v552_v58, %v2556_v63  ;;  %v442_v41 = vadd.f32 %v441_v62, %v2559_v52  ;;  %v554_v43 = vpop.f32.mrb[13].mxu1  ;;  %v2598_v62 = vrot.slane %v2547_v61, %v290_v60 }
 0x1ae   :  { %813 = vst [vmem:[#allocation2 + $0xc0] sm:$0xff] %v440_v57  ;;  %v555_v47 = vadd.f32 %v554_v43, %v2562_v53  ;;  %v2603_v43 = vrot.slane %v2547_v61, %v298_v45 }
 0x1af   :  { %815 = vst [vmem:[#allocation2 + $0xd0] sm:$0xff] %v553_v0  ;;  %814 = vst [vmem:[#allocation2 + $0xc8] sm:$0xff] %v442_v41  ;;  %v445_v50 = vpop.f32.mrb[14].mxu0 }
 0x1b0   :  { %816 = vst [vmem:[#allocation2 + $0xd8] sm:$0xff] %v555_v47  ;;  %v446_v56 = vadd.f32 %v445_v50, %v2553_v51  ;;  %v558_v55 = vpop.f32.mrb[14].mxu1  ;;  %v447_v58 = vpop.f32.mrb[15].mxu0  ;;  %v2610_v51 = vrot.slane %v2547_v61, %v302_v54 }
 0x1b1   :  { %v559_v48 = vadd.f32 %v558_v55, %v2556_v63  ;;  %v448_v44 = vadd.f32 %v447_v58, %v2559_v52  ;;  %v560_v57 = vpop.f32.mrb[15].mxu1 }
 0x1b2   :  { %817 = vst [vmem:[#allocation2 + $0xe0] sm:$0xff] %v446_v56  ;;  %v561_v0 = vadd.f32 %v560_v57, %v2562_v53 }
 0x1b3   :  { %819 = vst [vmem:[#allocation2 + $0xf0] sm:$0xff] %v559_v48  ;;  %818 = vst [vmem:[#allocation2 + $0xe8] sm:$0xff] %v448_v44  ;;  %v629_v60 = vpop.f32.mrb[16].mxu0 }
 0x1b4   :  { %820 = vst [vmem:[#allocation2 + $0xf8] sm:$0xff] %v561_v0  ;;  %v630_v63 = vadd.f32 %v629_v60, %v2598_v62  ;;  %v742_v52 = vpop.f32.mrb[16].mxu1  ;;  %v631_v41 = vpop.f32.mrb[17].mxu0 }
 0x1b5   :  { %v743_v45 = vadd.f32 %v742_v52, %v2603_v43  ;;  %v632_v47 = vadd.f32 %v631_v41, %v2606_v59  ;;  %v744_v49 = vpop.f32.mrb[17].mxu1 }
 0x1b6   :  { %821 = vst [vmem:[#allocation3] sm:$0xff] %v630_v63  ;;  %v745_v50 = vadd.f32 %v744_v49, %v2610_v51 }
 0x1b7   :  { %823 = vst [vmem:[#allocation3 + $0x10] sm:$0xff] %v743_v45  ;;  %822 = vst [vmem:[#allocation3 + $0x8] sm:$0xff] %v632_v47  ;;  %v635_v61 = vpop.f32.mrb[18].mxu0 }
 0x1b8   :  { %824 = vst [vmem:[#allocation3 + $0x18] sm:$0xff] %v745_v50  ;;  %v636_v44 = vadd.f32 %v635_v61, %v2598_v62  ;;  %v748_v48 = vpop.f32.mrb[18].mxu1  ;;  %v637_v53 = vpop.f32.mrb[19].mxu0 }
 0x1b9   :  { %v749_v54 = vadd.f32 %v748_v48, %v2603_v43  ;;  %v638_v56 = vadd.f32 %v637_v53, %v2606_v59  ;;  %v750_v55 = vpop.f32.mrb[19].mxu1 }
 0x1ba   :  { %825 = vst [vmem:[#allocation3 + $0x20] sm:$0xff] %v636_v44  ;;  %v751_v58 = vadd.f32 %v750_v55, %v2610_v51 }
 0x1bb   :  { %827 = vst [vmem:[#allocation3 + $0x30] sm:$0xff] %v749_v54  ;;  %826 = vst [vmem:[#allocation3 + $0x28] sm:$0xff] %v638_v56  ;;  %v641_v57 = vpop.f32.mrb[20].mxu0 }
 0x1bc   :  { %828 = vst [vmem:[#allocation3 + $0x38] sm:$0xff] %v751_v58  ;;  %v642_v0 = vadd.f32 %v641_v57, %v2598_v62  ;;  %v754_v60 = vpop.f32.mrb[20].mxu1  ;;  %v643_v63 = vpop.f32.mrb[21].mxu0 }
 0x1bd   :  { %v755_v52 = vadd.f32 %v754_v60, %v2603_v43  ;;  %v644_v41 = vadd.f32 %v643_v63, %v2606_v59  ;;  %v756_v45 = vpop.f32.mrb[21].mxu1 }
 0x1be   :  { %829 = vst [vmem:[#allocation3 + $0x40] sm:$0xff] %v642_v0  ;;  %v757_v47 = vadd.f32 %v756_v45, %v2610_v51 }
 0x1bf   :  { %831 = vst [vmem:[#allocation3 + $0x50] sm:$0xff] %v755_v52  ;;  %830 = vst [vmem:[#allocation3 + $0x48] sm:$0xff] %v644_v41  ;;  %v647_v49 = vpop.f32.mrb[22].mxu0 }
 0x1c0   :  { %832 = vst [vmem:[#allocation3 + $0x58] sm:$0xff] %v757_v47  ;;  %v648_v50 = vadd.f32 %v647_v49, %v2598_v62  ;;  %v760_v61 = vpop.f32.mrb[22].mxu1  ;;  %v649_v44 = vpop.f32.mrb[23].mxu0 }
 0x1c1   :  { %v761_v48 = vadd.f32 %v760_v61, %v2603_v43  ;;  %v650_v53 = vadd.f32 %v649_v44, %v2606_v59  ;;  %v762_v54 = vpop.f32.mrb[23].mxu1 }
 0x1c2   :  { %833 = vst [vmem:[#allocation3 + $0x60] sm:$0xff] %v648_v50  ;;  %v763_v56 = vadd.f32 %v762_v54, %v2610_v51 }
 0x1c3   :  { %835 = vst [vmem:[#allocation3 + $0x70] sm:$0xff] %v761_v48  ;;  %834 = vst [vmem:[#allocation3 + $0x68] sm:$0xff] %v650_v53  ;;  %v653_v55 = vpop.f32.mrb[24].mxu0 }
 0x1c4   :  { %836 = vst [vmem:[#allocation3 + $0x78] sm:$0xff] %v763_v56  ;;  %v654_v58 = vadd.f32 %v653_v55, %v2598_v62  ;;  %v766_v57 = vpop.f32.mrb[24].mxu1  ;;  %v655_v0 = vpop.f32.mrb[25].mxu0 }
 0x1c5   :  { %v767_v60 = vadd.f32 %v766_v57, %v2603_v43  ;;  %v656_v63 = vadd.f32 %v655_v0, %v2606_v59  ;;  %v768_v52 = vpop.f32.mrb[25].mxu1 }
 0x1c6   :  { %837 = vst [vmem:[#allocation3 + $0x80] sm:$0xff] %v654_v58  ;;  %v769_v41 = vadd.f32 %v768_v52, %v2610_v51 }
 0x1c7   :  { %839 = vst [vmem:[#allocation3 + $0x90] sm:$0xff] %v767_v60  ;;  %838 = vst [vmem:[#allocation3 + $0x88] sm:$0xff] %v656_v63  ;;  %v659_v45 = vpop.f32.mrb[26].mxu0 }
 0x1c8   :  { %840 = vst [vmem:[#allocation3 + $0x98] sm:$0xff] %v769_v41  ;;  %v660_v47 = vadd.f32 %v659_v45, %v2598_v62  ;;  %v772_v49 = vpop.f32.mrb[26].mxu1  ;;  %v661_v50 = vpop.f32.mrb[27].mxu0 }
 0x1c9   :  { %v773_v61 = vadd.f32 %v772_v49, %v2603_v43  ;;  %v662_v44 = vadd.f32 %v661_v50, %v2606_v59  ;;  %v774_v48 = vpop.f32.mrb[27].mxu1 }
 0x1ca   :  { %841 = vst [vmem:[#allocation3 + $0xa0] sm:$0xff] %v660_v47  ;;  %v775_v53 = vadd.f32 %v774_v48, %v2610_v51  ;;  %v2644_v48 = vmov 0.0  }
 0x1cb   :  { %843 = vst [vmem:[#allocation3 + $0xb0] sm:$0xff] %v773_v61  ;;  %842 = vst [vmem:[#allocation3 + $0xa8] sm:$0xff] %v662_v44  ;;  %v665_v54 = vpop.f32.mrb[28].mxu0 }
 0x1cc   :  { %844 = vst [vmem:[#allocation3 + $0xb8] sm:$0xff] %v775_v53  ;;  %v666_v56 = vadd.f32 %v665_v54, %v2598_v62  ;;  %v778_v55 = vpop.f32.mrb[28].mxu1  ;;  %v667_v58 = vpop.f32.mrb[29].mxu0  ;;  %v2646_v53 = vmov 0.0   ;;  %v2648_v54 = vmov 0.0  }
 0x1cd   :  { %v779_v57 = vadd.f32 %v778_v55, %v2603_v43  ;;  %v668_v0 = vadd.f32 %v667_v58, %v2606_v59  ;;  %v780_v60 = vpop.f32.mrb[29].mxu1 }
 0x1ce   :  { %845 = vst [vmem:[#allocation3 + $0xc0] sm:$0xff] %v666_v56  ;;  %v781_v63 = vadd.f32 %v780_v60, %v2610_v51 }
 0x1cf   :  { %847 = vst [vmem:[#allocation3 + $0xd0] sm:$0xff] %v779_v57  ;;  %846 = vst [vmem:[#allocation3 + $0xc8] sm:$0xff] %v668_v0  ;;  %v671_v52 = vpop.f32.mrb[30].mxu0 }
 0x1d0   :  { %848 = vst [vmem:[#allocation3 + $0xd8] sm:$0xff] %v781_v63  ;;  %v672_v41 = vadd.f32 %v671_v52, %v2598_v62  ;;  %v784_v45 = vpop.f32.mrb[30].mxu1  ;;  %v673_v47 = vpop.f32.mrb[31].mxu0  ;;  %v2650_v62 = vmov 0.0  }
 0x1d1   :  { %v785_v49 = vadd.f32 %v784_v45, %v2603_v43  ;;  %v674_v50 = vadd.f32 %v673_v47, %v2606_v59  ;;  %v786_v61 = vpop.f32.mrb[31].mxu1 }
 0x1d2   :  { %849 = vst [vmem:[#allocation3 + $0xe0] sm:$0xff] %v672_v41  ;;  %v787_v44 = vadd.f32 %v786_v61, %v2610_v51 }
 0x1d3   :  { %851 = vst [vmem:[#allocation3 + $0xf0] sm:$0xff] %v785_v49  ;;  %850 = vst [vmem:[#allocation3 + $0xe8] sm:$0xff] %v674_v50 }
 0x1d4   :  { %852 = vst [vmem:[#allocation3 + $0xf8] sm:$0xff] %v787_v44 }
 0x1d5 LB: > { %v2941_v2 = vld [vmem:[#allocation24_spill] sm:$0xff]  ;;  %v2942_v1 = vld [vmem:[#allocation23_spill] sm:$0xff]  ;;  %v1566_v51 = vpack.c.bf16 %v2246_v14, %v2238_v10  ;;  %v1594_v56 = vpack.c.bf16 %v2234_v8, %v2226_v4  ;;  %v1596_v55 = vpack.c.bf16 %v2232_v7, %v2224_v3  ;;  %v1568_v58 = vpack.c.bf16 %v2244_v13, %v2236_v9  ;;  %s1486_s11 = sshll.u32 %s2050_s6, 5  ;;  %s863_s8 = ssub.s32 7, %s2050_s6  ;;  %s2050_s6 = sphi %s2652_s6, %s858_s6   ;;  %v2046_v62 = vphi %v2650_v62, %v1040_v62   ;;  %v2042_v54 = vphi %v2648_v54, %v1038_v54   ;;  %v2038_v53 = vphi %v2646_v53, %v1217_v53   ;;  %v2034_v48 = vphi %v2644_v48, %v1215_v48  }
 0x1d6   : > { %v1562_v43 = vpack.c.bf16 %v2230_v6, %v2941_v2  ;;  %v1564_v59 = vpack.c.bf16 %v2228_v5, %v2942_v1  ;;  %v1598_v57 = vpack.c.bf16 %v2250_v16, %v2242_v12  ;;  %v1570_v0 = vpack.c.bf16 %v2262_v22, %v2254_v18  ;;  %v2954_v2 = vld [vmem:[#allocation35_spill] sm:$0xff]  ;;  %s866_s0 = scalar_lea.vmem [#allocation2], %s1486_s11  ;;  %s1487_s20 = sshll.u32 %s863_s8, 5 }
 0x1d7   : > { %1595 = vmatprep.subr.bf16.mxu1 %v1594_v56  ;;  %v1600_v60 = vpack.c.bf16 %v2248_v15, %v2240_v11  ;;  %v1602_v63 = vpack.c.bf16 %v2266_v24, %v2258_v20  ;;  %v2850_v52 = vmov 0.0   ;;  %v1572_v41 = vpack.c.bf16 %v2260_v21, %v2252_v17  ;;  %s1043_s21 = scalar_lea.vmem [#allocation3], %s1487_s20  ;;  %s1488_s22 = sshll.u32 %s2050_s6, 4 }
 0x1d8   : > { %1563 = vmatprep.subr.bf16.mxu0 %v1562_v43  ;;  %1597 = vmatpush1.bf16.msra.mxu1 %v1596_v55  ;;  %v1574_v45 = vpack.c.bf16 %v2278_v30, %v2270_v26  ;;  %v1604_v47 = vpack.c.bf16 %v2264_v23, %v2256_v19  ;;  %v1606_v49 = vpack.c.bf16 %v2282_v32, %v2274_v28  ;;  %v2943_v55 = vld [vmem:[#allocation27_spill] sm:$0xff]  ;;  %s1220_s23 = scalar_lea.vmem [#allocation4], %s1488_s22  ;;  %s1489_s24 = sshll.u32 %s863_s8, 4 }
 0x1d9   : > { %1565 = vmatpush1.bf16.msra.mxu0 %v1564_v59  ;;  %1599 = vmatprep.subr.bf16.mxu1 %v1598_v57  ;;  %v1576_v50 = vpack.c.bf16 %v2276_v29, %v2268_v25  ;;  %v1578_v61 = vpack.c.bf16 %v2294_v38, %v2286_v34  ;;  %v1608_v44 = vpack.c.bf16 %v2280_v31, %v2272_v27  ;;  %s1224_s26 = scalar_lea.vmem [#allocation4], %s1489_s24  ;;  %s858_s6 = sadd.s32 1, %s2050_s6  }
 0x1da   : > { %1567 = vmatprep.subr.bf16.mxu0 %v1566_v51  ;;  %935 = vmatprep.mubr.f32.mxu0 %v2850_v52  ;;  %v1610_v43 = vpack.c.bf16 %v2298_v40, %v2290_v36  ;;  %v1580_v59 = vpack.c.bf16 %v2292_v37, %v2284_v33  ;;  %v1582_v51 = vpack.c.bf16 %v2310_v46, %v2302_v42  ;;  %p855_p0 = scmp.ge.s32.totalorder %s858_s6, 8  }
 0x1db   : > { %1006 = vmatprep.mubr.f32.mxu1 %v2850_v52  ;;  %v1612_v56 = vpack.c.bf16 %v2296_v39, %v2288_v35  ;;  %v2952_v52 = vld [vmem:[#allocation38_spill] sm:$0xff]  ;;  %v1231_v5 = vld [vmem:[#allocation14 + $0x28] sm:$0xff] (%p855_p0)  ;;  %v1248_v6 = vld [vmem:[#allocation14 + $0xb0] sm:$0xff] (%p855_p0)  ;;  %s2067_s27 = smov (%p855_p0), [#allocation17]  }
 0x1dc   : > { %1601 = vmatpush1.bf16.msra.mxu1 %v1600_v60  ;;  %v2946_v60 = vld [vmem:[#allocation28_spill] sm:$0xff]  ;;  %v1230_v4 = vld [vmem:[#allocation14 + $0x20] sm:$0xff] (%p855_p0)  ;;  %v1249_v7 = vld [vmem:[#allocation14 + $0xb8] sm:$0xff] (%p855_p0)  ;;  %s1399_s28 = sshll.u32 (%p855_p0), %s2067_s27, 4  ;;  %s1400_s28 = int_to_ptr.vmem [resolvable:$true] %s1399_s28 }
 0x1dd   : > { %1569 = vmatpush1.bf16.msra.mxu0 %v1568_v58  ;;  %1603 = vmatprep.subr.bf16.mxu1 %v1602_v63  ;;  %v2944_v58 = vld [vmem:[#allocation30_spill] sm:$0xff]  ;;  %v1700_v8 = vpack.c.bf16 (%p855_p0), %v1231_v5, %v1230_v4  ;;  %v1702_v9 = vpack.c.bf16 (%p855_p0), %v1249_v7, %v1248_v6  ;;  %v1232_v10 = vld [vmem:[#allocation14 + $0x30] sm:$0xff] (%p855_p0)  ;;  %v1251_v13 = vld [vmem:[#allocation14 + $0xc8] sm:$0xff] (%p855_p0)  ;;  %s1980_s5 = scalar_lea.vmem (%p855_p0), %s1400_s28, 1024  ;;  %p1985_p2 = scmp.lt.s32.totalorder (%p855_p0), %s1400_s28, %s1400_s28 }
 0x1de   : > { %1571 = vmatprep.subr.bf16.mxu0 %v1570_v0  ;;  %v1614_v57 = vpack.c.bf16 %v2944_v58, %v2943_v55  ;;  %v2945_v0 = vld [vmem:[#allocation25_spill] sm:$0xff]  ;;  %v2956_v58 = vld [vmem:[#allocation44_spill] sm:$0xff]  ;;  %v1250_v12 = vld [vmem:[#allocation14 + $0xc0] sm:$0xff] (%p855_p0)  ;;  %p1981_p1 = scmp.ne.s32.totalorder (%p855_p0), %s1400_s28, %s1980_s5  ;;  %p1986_p3 = scmp.lt.s32.totalorder (%p855_p0), %s1980_s5, %s1980_s5 }
 0x1df   : > { %v1584_v63 = vpack.c.bf16 %v2946_v60, %v2945_v0  ;;  %v2958_v60 = vld [vmem:[#allocation37_spill] sm:$0xff]  ;;  %v1706_v17 = vpack.c.bf16 (%p855_p0), %v1251_v13, %v1250_v12  ;;  %v1234_v18 = vld [vmem:[#allocation14 + $0x40] sm:$0xff] (%p855_p0)  ;;  %v1235_v19 = vld [vmem:[#allocation14 + $0x48] sm:$0xff] (%p855_p0) }
 0x1e0   : > { %1605 = vmatpush1.bf16.msra.mxu1 %v1604_v47  ;;  %v1233_v11 = vld [vmem:[#allocation14 + $0x38] sm:$0xff] (%p855_p0)  ;;  %v1252_v20 = vld [vmem:[#allocation14 + $0xd0] sm:$0xff] (%p855_p0)  ;;  %v1708_v22 = vpack.c.bf16 (%p855_p0), %v1235_v19, %v1234_v18  ;;  %v1254_v26 = vld [vmem:[#allocation14 + $0xe0] sm:$0xff] (%p855_p0)  ;;  %p1987_p4 = por (%p855_p0), %p1986_p3, %p1985_p2 }
 0x1e1   : > { %1573 = vmatpush1.bf16.msra.mxu0 %v1572_v41  ;;  %1607 = vmatprep.subr.bf16.mxu1 %v1606_v49  ;;  %v2947_v41 = vld [vmem:[#allocation32_spill] sm:$0xff]  ;;  %v2949_v49 = vld [vmem:[#allocation26_spill] sm:$0xff]  ;;  %v1704_v16 = vpack.c.bf16 (%p855_p0), %v1233_v11, %v1232_v10 }
 0x1e2   : > { %1575 = vmatprep.subr.bf16.mxu0 %v1574_v45  ;;  %v2948_v45 = vld [vmem:[#allocation36_spill] sm:$0xff]  ;;  %v1253_v21 = vld [vmem:[#allocation14 + $0xd8] sm:$0xff] (%p855_p0)  ;;  %v1238_v30 = vld [vmem:[#allocation14 + $0x60] sm:$0xff] (%p855_p0)  ;;  %p1988_p5 = pnand (%p855_p0), %p1987_p4, %p1981_p1 }
 0x1e3   : > { %v1586_v47 = vpack.c.bf16 %v2948_v45, %v2947_v41  ;;  %v2960_v45 = vld [vmem:[#allocation46_spill] sm:$0xff]  ;;  %v1710_v23 = vpack.c.bf16 (%p855_p0), %v1253_v21, %v1252_v20  ;;  %v1236_v24 = vld [vmem:[#allocation14 + $0x50] sm:$0xff] (%p855_p0)  ;;  %v1255_v27 = vld [vmem:[#allocation14 + $0xe8] sm:$0xff] (%p855_p0) }
 0x1e4   : > { %1609 = vmatpush1.bf16.msra.mxu1 %v1608_v44  ;;  %v2951_v44 = vld [vmem:[#allocation34_spill] sm:$0xff]  ;;  %v1714_v29 = vpack.c.bf16 (%p855_p0), %v1255_v27, %v1254_v26  ;;  %v1239_v31 = vld [vmem:[#allocation14 + $0x68] sm:$0xff] (%p855_p0)  ;;  %v1256_v32 = vld [vmem:[#allocation14 + $0xf0] sm:$0xff] (%p855_p0) }
 0x1e5   : > { %1577 = vmatpush1.bf16.msra.mxu0 %v1576_v50  ;;  %1611 = vmatprep.subr.bf16.mxu1 %v1610_v43  ;;  %v2950_v50 = vld [vmem:[#allocation29_spill] sm:$0xff]  ;;  %v1618_v1 = vpack.c.bf16 %v2952_v52, %v2951_v44  ;;  %v2953_v43 = vld [vmem:[#allocation31_spill] sm:$0xff]  ;;  %v2964_v44 = vld [vmem:[#allocation52_spill] sm:$0xff]  ;;  %v1716_v34 = vpack.c.bf16 (%p855_p0), %v1239_v31, %v1238_v30 }
 0x1e6   : > { %1579 = vmatprep.subr.bf16.mxu0 %v1578_v61  ;;  %v1616_v61 = vpack.c.bf16 %v2950_v50, %v2949_v49  ;;  %v1588_v55 = vpack.c.bf16 %v2954_v2, %v2953_v43  ;;  %v2962_v50 = vld [vmem:[#allocation43_spill] sm:$0xff]  ;;  %v2966_v43 = vld [vmem:[#allocation45_spill] sm:$0xff] }
 0x1e7   :  { %v1237_v25 = vld [vmem:[#allocation14 + $0x58] sm:$0xff] (%p855_p0)  ;;  %v1240_v36 = vld [vmem:[#allocation14 + $0x70] sm:$0xff] (%p855_p0) }
 0x1e8   : > { %1613 = vmatpush1.bf16.msra.mxu1 %v1612_v56  ;;  %v2959_v56 = vld [vmem:[#allocation42_spill] sm:$0xff]  ;;  %v1712_v28 = vpack.c.bf16 (%p855_p0), %v1237_v25, %v1236_v24 }
 0x1e9   : > { %1581 = vmatpush1.bf16.msra.mxu0 %v1580_v59  ;;  %1615 = vmatprep.subr.bf16.mxu1 %v1614_v57  ;;  %v2955_v59 = vld [vmem:[#allocation40_spill] sm:$0xff]  ;;  %v1622_v49 = vpack.c.bf16 %v2960_v45, %v2959_v56  ;;  %v2961_v57 = vld [vmem:[#allocation39_spill] sm:$0xff]  ;;  %v1257_v33 = vld [vmem:[#allocation14 + $0xf8] sm:$0xff] (%p855_p0) }
 0x1ea   : > { %1583 = vmatprep.subr.bf16.mxu0 %v1582_v51  ;;  %v1590_v0 = vpack.c.bf16 %v2956_v58, %v2955_v59  ;;  %v2957_v51 = vld [vmem:[#allocation33_spill] sm:$0xff]  ;;  %v1592_v52 = vpack.c.bf16 %v2962_v50, %v2961_v57  ;;  %v2968_v58 = vld [vmem:[#allocation54_spill] sm:$0xff]  ;;  %v2972_v45 = vld [vmem:[#allocation60_spill] sm:$0xff]  ;;  %v1718_v35 = vpack.c.bf16 (%p855_p0), %v1257_v33, %v1256_v32 }
 0x1eb   : > { %v1620_v41 = vpack.c.bf16 %v2958_v60, %v2957_v51  ;;  %v2970_v60 = vld [vmem:[#allocation51_spill] sm:$0xff]  ;;  %v2974_v50 = vld [vmem:[#allocation53_spill] sm:$0xff] }
 0x1ec   : > { %1617 = vmatpush1.bf16.msra.mxu1 %v1616_v61  ;;  %v2967_v61 = vld [vmem:[#allocation50_spill] sm:$0xff] }
 0x1ed   : > { %1585 = vmatpush1.bf16.msra.mxu0 %v1584_v63  ;;  %1619 = vmatprep.subr.bf16.mxu1 %v1618_v1  ;;  %v2963_v63 = vld [vmem:[#allocation48_spill] sm:$0xff]  ;;  %v1658_v51 = vpack.c.bf16 %v2968_v58, %v2967_v61  ;;  %v2969_v1 = vld [vmem:[#allocation47_spill] sm:$0xff]  ;;  %v2979_v61 = vmov 0.0   ;;  %v1241_v37 = vld [vmem:[#allocation14 + $0x78] sm:$0xff] (%p855_p0) }
 0x1ee   : > { %1587 = vmatprep.subr.bf16.mxu0 %v1586_v47  ;;  %v1626_v2 = vpack.c.bf16 %v2964_v44, %v2963_v63  ;;  %v2965_v47 = vld [vmem:[#allocation41_spill] sm:$0xff]  ;;  %v1628_v56 = vpack.c.bf16 %v2970_v60, %v2969_v1  ;;  %v2981_v58 = vld [vmem:[#allocation68_spill] sm:$0xff]  ;;  %v1720_v38 = vpack.c.bf16 (%p855_p0), %v1241_v37, %v1240_v36 }
 0x1ef   : > { %v1624_v59 = vpack.c.bf16 %v2966_v43, %v2965_v47  ;;  %v2977_v47 = vld [vmem:[#allocation55_spill] sm:$0xff]  ;;  %v2983_v60 = vld [vmem:[#allocation61_spill] sm:$0xff] }
 0x1f0   : > { %1621 = vmatpush1.bf16.msra.mxu1 %v1620_v41  ;;  %v2975_v41 = vld [vmem:[#allocation58_spill] sm:$0xff] }
 0x1f1   : > { %1589 = vmatpush1.bf16.msra.mxu0 %v1588_v55  ;;  %1623 = vmatprep.subr.bf16.mxu1 %v1622_v49  ;;  %v2971_v55 = vld [vmem:[#allocation56_spill] sm:$0xff]  ;;  %v2976_v49 = vld [vmem:[#allocation62_spill] sm:$0xff] }
 0x1f2   : > { %1591 = vmatprep.subr.bf16.mxu0 %v1590_v0  ;;  %v1630_v57 = vpack.c.bf16 %v2972_v45, %v2971_v55  ;;  %v2973_v0 = vld [vmem:[#allocation49_spill] sm:$0xff]  ;;  %v1662_v44 = vpack.c.bf16 %v2976_v49, %v2975_v41  ;;  %v2989_v49 = vld [vmem:[#allocation76_spill] sm:$0xff] }
 0x1f3   : > { %v1660_v63 = vpack.c.bf16 %v2974_v50, %v2973_v0  ;;  %v2986_v0 = vld [vmem:[#allocation63_spill] sm:$0xff] }
 0x1f4   : > { %1625 = vmatpush1.bf16.msra.mxu1 %v1624_v59  ;;  %v2982_v59 = vld [vmem:[#allocation57_spill] sm:$0xff]  ;;  %v2987_v50 = vld [vmem:[#allocation67_spill] sm:$0xff] }
 0x1f5   : > { %1593 = vmatpush1.bf16.msra.mxu0 %v1592_v52  ;;  %1659 = vmatprep.subr.bf16.mxu1 %v1658_v51  ;;  %v2978_v52 = vld [vmem:[#allocation59_spill] sm:$0xff]  ;;  %v1664_v55 = vpack.c.bf16 %v2983_v60, %v2982_v59  ;;  %v2984_v51 = vld [vmem:[#allocation66_spill] sm:$0xff]  ;;  %v1636_v41 = vpack.c.bf16 %v2987_v50, %v2986_v0  ;;  %v2999_v0 = vld [vmem:[#allocation77_spill] sm:$0xff] }
 0x1f6   : > { %1627 = vmatprep.subr.bf16.mxu0 %v1626_v2  ;;  %v1632_v43 = vpack.c.bf16 %v2978_v52, %v2977_v47  ;;  %v2980_v2 = vld [vmem:[#allocation64_spill] sm:$0xff]  ;;  %v2995_v59 = vld [vmem:[#allocation75_spill] sm:$0xff] }
 0x1f7   : > { %v1634_v1 = vpack.c.bf16 %v2981_v58, %v2980_v2  ;;  %1007 = vmatmul.mubr.f32.vlgmr.msra.gmra.mrb[0].mxu1 %v2046_v62  ;;  %v2992_v2 = vld [vmem:[#allocation74_spill] sm:$0xff] }
 0x1f8   : > { %936 = vmatmul.mubr.f32.vlgmr.msra.gmra.mrb[0].mxu0 %v2046_v62  ;;  %1661 = vmatpush1.bf16.msra.mxu1 %v1660_v63  ;;  %v2990_v62 = vld [vmem:[#allocation65_spill] sm:$0xff]  ;;  %v2993_v58 = vld [vmem:[#allocation78_spill] sm:$0xff] }
 0x1f9   : > { %1629 = vmatpush1.bf16.msra.mxu0 %v1628_v56  ;;  %1112 = vmatprep.mubr.f32.mxu0 %v2979_v61  ;;  %v2985_v56 = vld [vmem:[#allocation70_spill] sm:$0xff]  ;;  %v2991_v63 = vld [vmem:[#allocation69_spill] sm:$0xff] }
 0x1fa   : > { %1631 = vmatprep.subr.bf16.mxu0 %v1630_v57  ;;  %1183 = vmatprep.mubr.f32.mxu1 %v2979_v61  ;;  %v1666_v45 = vpack.c.bf16 %v2985_v56, %v2984_v51  ;;  %v2988_v57 = vld [vmem:[#allocation72_spill] sm:$0xff]  ;;  %v1668_v52 = vpack.c.bf16 %v2991_v63, %v2990_v62  ;;  %v1670_v61 = vpack.c.bf16 %v2993_v58, %v2992_v2  ;;  %v3003_v62 = vld [vmem:[#allocation83_spill] sm:$0xff] }
 0x1fb   : > { %1663 = vmatprep.subr.bf16.mxu1 %v1662_v44  ;;  %v1638_v47 = vpack.c.bf16 %v2989_v49, %v2988_v57  ;;  %v2994_v44 = vld [vmem:[#allocation71_spill] sm:$0xff]  ;;  %v2997_v51 = vld [vmem:[#allocation84_spill] sm:$0xff]  ;;  %v3001_v57 = vld [vmem:[#allocation86_spill] sm:$0xff] }
 0x1fc   : > { %1665 = vmatpush1.bf16.msra.mxu1 %v1664_v55  ;;  %v1640_v60 = vpack.c.bf16 %v2995_v59, %v2994_v44  ;;  %v3000_v55 = vld [vmem:[#allocation82_spill] sm:$0xff]  ;;  %v3005_v2 = vld [vmem:[#allocation92_spill] sm:$0xff]  ;;  %v3007_v44 = vld [vmem:[#allocation85_spill] sm:$0xff] }
 0x1fd   : > { %1633 = vmatpush1.bf16.msra.mxu0 %v1632_v43  ;;  %1667 = vmatprep.subr.bf16.mxu1 %v1666_v45  ;;  %v2996_v43 = vld [vmem:[#allocation80_spill] sm:$0xff]  ;;  %v1674_v49 = vpack.c.bf16 %v3001_v57, %v3000_v55  ;;  %v3002_v45 = vld [vmem:[#allocation79_spill] sm:$0xff] }
 0x1fe   : > { %1635 = vmatprep.subr.bf16.mxu0 %v1634_v1  ;;  %v1642_v56 = vpack.c.bf16 %v2997_v51, %v2996_v43  ;;  %v2998_v1 = vld [vmem:[#allocation73_spill] sm:$0xff]  ;;  %v1644_v63 = vpack.c.bf16 %v3003_v62, %v3002_v45  ;;  %v3009_v43 = vld [vmem:[#allocation94_spill] sm:$0xff]  ;;  %v3013_v55 = vld [vmem:[#allocation100_spill] sm:$0xff] }
 0x1ff   : > { %v1672_v50 = vpack.c.bf16 %v2999_v0, %v2998_v1  ;;  %v3011_v1 = vld [vmem:[#allocation91_spill] sm:$0xff]  ;;  %v3015_v45 = vld [vmem:[#allocation93_spill] sm:$0xff] }
 0x200   : > { %1669 = vmatpush1.bf16.msra.mxu1 %v1668_v52  ;;  %v3008_v52 = vld [vmem:[#allocation90_spill] sm:$0xff] }
 0x201   : > { %1637 = vmatpush1.bf16.msra.mxu0 %v1636_v41  ;;  %1671 = vmatprep.subr.bf16.mxu1 %v1670_v61  ;;  %v3004_v41 = vld [vmem:[#allocation88_spill] sm:$0xff]  ;;  %v1678_v51 = vpack.c.bf16 %v3009_v43, %v3008_v52  ;;  %v3010_v61 = vld [vmem:[#allocation87_spill] sm:$0xff]  ;;  %v3022_v43 = vld [vmem:[#allocation97_spill] sm:$0xff] }
 0x202   : > { %1639 = vmatprep.subr.bf16.mxu0 %v1638_v47  ;;  %v1646_v58 = vpack.c.bf16 %v3005_v2, %v3004_v41  ;;  %v3006_v47 = vld [vmem:[#allocation81_spill] sm:$0xff]  ;;  %v1648_v0 = vpack.c.bf16 %v3011_v1, %v3010_v61  ;;  %v3017_v41 = vld [vmem:[#allocation102_spill] sm:$0xff]  ;;  %v3021_v52 = vld [vmem:[#allocation108_spill] sm:$0xff] }
 0x203   : > { %v1676_v59 = vpack.c.bf16 %v3007_v44, %v3006_v47  ;;  %v3019_v47 = vld [vmem:[#allocation99_spill] sm:$0xff]  ;;  %v3023_v61 = vld [vmem:[#allocation101_spill] sm:$0xff]  ;;  %v3024_v1 = vld [vmem:[#allocation106_spill] sm:$0xff] }
 0x204   : > { %1673 = vmatpush1.bf16.msra.mxu1 %v1672_v50  ;;  %v3016_v50 = vld [vmem:[#allocation98_spill] sm:$0xff] }
 0x205   : > { %1641 = vmatpush1.bf16.msra.mxu0 %v1640_v60  ;;  %1675 = vmatprep.subr.bf16.mxu1 %v1674_v49  ;;  %v3012_v60 = vld [vmem:[#allocation96_spill] sm:$0xff]  ;;  %v1682_v2 = vpack.c.bf16 %v3017_v41, %v3016_v50  ;;  %v3018_v49 = vld [vmem:[#allocation95_spill] sm:$0xff] }
 0x206   : > { %1643 = vmatprep.subr.bf16.mxu0 %v1642_v56  ;;  %v1650_v57 = vpack.c.bf16 %v3013_v55, %v3012_v60  ;;  %v3014_v56 = vld [vmem:[#allocation89_spill] sm:$0xff]  ;;  %v1652_v44 = vpack.c.bf16 %v3019_v47, %v3018_v49  ;;  %v3025_v60 = vld [vmem:[#allocation110_spill] sm:$0xff]  ;;  %v3026_v55 = vld [vmem:[#allocation103_spill] sm:$0xff] }
 0x207   : > { %v1680_v62 = vpack.c.bf16 %v3015_v45, %v3014_v56  ;;  %v3027_v56 = vld [vmem:[#allocation107_spill] sm:$0xff]  ;;  %v3028_v45 = vld [vmem:[#allocation105_spill] sm:$0xff] }
 0x208   : > { %1677 = vmatpush1.bf16.msra.mxu1 %v1676_v59  ;;  %v1684_v59 = vpack.c.bf16 %v3023_v61, %v3022_v43  ;;  %v868_v41 = vld [vmem:[%s866_s0 + $0x8] sm:$0xff]  ;;  %v869_v61 = vld [vmem:[%s866_s0 + $0x10] sm:$0xff] }
 0x209   : > { %1645 = vmatpush1.bf16.msra.mxu0 %v1644_v63  ;;  %1679 = vmatprep.subr.bf16.mxu1 %v1678_v51  ;;  %v3020_v63 = vld [vmem:[#allocation104_spill] sm:$0xff]  ;;  %v1686_v51 = vpack.c.bf16 %v3025_v60, %v3024_v1 }
 0x20a   : > { %1647 = vmatprep.subr.bf16.mxu0 %v1646_v58  ;;  %v1654_v58 = vpack.c.bf16 %v3021_v52, %v3020_v63  ;;  %v870_v1 = vld [vmem:[%s866_s0 + $0x18] sm:$0xff] }
 0x20c   : > { %1681 = vmatpush1.bf16.msra.mxu1 %v1680_v62  ;;  %v867_v62 = vld [vmem:[%s866_s0] sm:$0xff] }
 0x20d   : > { %1649 = vmatpush1.bf16.msra.mxu0 %v1648_v0  ;;  %1683 = vmatprep.subr.bf16.mxu1 %v1682_v2  ;;  %v1656_v0 = vpack.c.bf16 %v3027_v56, %v3026_v55 }
 0x20e   : > { %1651 = vmatprep.subr.bf16.mxu0 %v1650_v57  ;;  %v3029_v57 = vld [vmem:[#allocation109_spill] sm:$0xff] }
 0x20f   : > { %v1688_v50 = vpack.c.bf16 %v3029_v57, %v3028_v45 }
 0x210   : > { %1685 = vmatpush1.bf16.msra.mxu1 %v1684_v59 }
 0x211   : > { %1653 = vmatpush1.bf16.msra.mxu0 %v1652_v44  ;;  %1687 = vmatprep.subr.bf16.mxu1 %v1686_v51 }
 0x212   : > { %1655 = vmatprep.subr.bf16.mxu0 %v1654_v58 }
 0x214   : > { %1689 = vmatpush1.bf16.msra.mxu1 %v1688_v50 }
 0x215   : > { %1657 = vmatpush1.bf16.msra.mxu0 %v1656_v0 }
 0x217   : > { %1184 = vmatmul.mubr.f32.vlgmr.msra.gmra.mrb[2].mxu1 %v2038_v53 }
 0x218   : > { %1113 = vmatmul.mubr.f32.vlgmr.msra.gmra.mrb[2].mxu0 %v2038_v53 }
 0x2ca   : > { %v1008_v63 = vpop.f32.mrb[0].mxu1 }
 0x2cb   : > { %v937_v2 = vpop.f32.mrb[0].mxu0  ;;  %v1010_v58 = vpop.f32.mrb[1].mxu1  ;;  %v1015_v59 = vadd.f32 %v1008_v63, %v869_v61 }
 0x2cc   : > { %v1013_v49 = vadd.f32 %v937_v2, %v867_v62  ;;  %v939_v47 = vpop.f32.mrb[1].mxu0  ;;  %v1016_v60 = vadd.f32 %v1010_v58, %v870_v1 }
 0x2cd   : > { %v1014_v44 = vadd.f32 %v939_v47, %v868_v41  ;;  %v1475_v53 = vmul.f32 -1.442695, %v1015_v59  ;;  %v1044_v47 = vld [vmem:[%s1043_s21] sm:$0xff] }
 0x2ce   : > { %v1473_v52 = vmul.f32 -1.442695, %v1013_v49 }
 0x2cf   : > { %v1474_v43 = vmul.f32 -1.442695, %v1014_v44  ;;  %v1045_v44 = vld [vmem:[%s1043_s21 + $0x8] sm:$0xff] }
 0x2d0   : > { %1794 = vpow2.f32 %v1473_v52 }
 0x2d1   : > { %1796 = vpow2.f32 %v1474_v43 }
 0x2d2   : > { %1798 = vpow2.f32 %v1475_v53 }
 0x2d3   : > { %1800 = vtanh.f32 %v1016_v60  ;;  %v1046_v60 = vld [vmem:[%s1043_s21 + $0x10] sm:$0xff] }
 0x2da   : > { %v1795_v51 = vpop.eup %1794 }
 0x2db   : > { %v1797_v55 = vpop.eup %1796  ;;  %v1026_v56 = vadd.f32 1.0, %v1795_v51 }
 0x2dc   : > { %v1027_v0 = vadd.f32 1.0, %v1797_v55  ;;  %v1799_v45 = vpop.eup %1798  ;;  %v1047_v55 = vld [vmem:[%s1043_s21 + $0x18] sm:$0xff] }
 0x2dd   : > { %1802 = vrcp.f32 %v1026_v56  ;;  %v1801_v57 = vpop.eup %1800  ;;  %v1028_v62 = vadd.f32 1.0, %v1799_v45 }
 0x2de   : > { %1804 = vrcp.f32 %v1027_v0 }
 0x2df   : > { %1806 = vrcp.f32 %v1028_v62 }
 0x2e7   : > { %v1803_v50 = vpop.eup %1802 }
 0x2e8   : > { %v1805_v41 = vpop.eup %1804  ;;  %v1037_v2 = vmul.f32 %v1803_v50, %v1801_v57 }
 0x2e9   : > { %v1036_v49 = vmul.f32 %v2042_v54, %v1805_v41  ;;  %v1807_v56 = vpop.eup %1806 }
 0x2ea   : > { %v1185_v61 = vpop.f32.mrb[2].mxu1 }
 0x2eb   : > { %v1038_v54 = vadd.f32 %v1037_v2, %v1036_v49   ;;  %v1114_v63 = vpop.f32.mrb[2].mxu0  ;;  %v1187_v1 = vpop.f32.mrb[3].mxu1  ;;  %v1192_v51 = vadd.f32 %v1185_v61, %v1046_v60  ;;  %v1242_v60 = vld [vmem:[#allocation14 + $0x80] sm:$0xff] (%p855_p0) }
 0x2ec   : > { %v1190_v52 = vadd.f32 %v1114_v63, %v1044_v47  ;;  %v1116_v58 = vpop.f32.mrb[3].mxu0  ;;  %v1193_v57 = vadd.f32 %v1187_v1, %v1047_v55  ;;  %v1226_v55 = vld [vmem:[#allocation14] sm:$0xff] (%p855_p0) }
 0x2ed   : > { %1808 = vtanh.f32 %v1038_v54  ;;  %v1191_v43 = vadd.f32 %v1116_v58, %v1045_v44  ;;  %v1480_v0 = vmul.f32 -1.442695, %v1192_v51  ;;  %v1243_v51 = vld [vmem:[#allocation14 + $0x88] sm:$0xff] (%p855_p0) }
 0x2ee   : > { %v1478_v59 = vmul.f32 -1.442695, %v1190_v52 }
 0x2ef   : > { %v1479_v53 = vmul.f32 -1.442695, %v1191_v43 }
 0x2f0   : > { %1810 = vpow2.f32 %v1478_v59 }
 0x2f1   : > { %1812 = vpow2.f32 %v1479_v53 }
 0x2f2   : > { %1814 = vpow2.f32 %v1480_v0  ;;  %v1227_v0 = vld [vmem:[#allocation14 + $0x8] sm:$0xff] (%p855_p0) }
 0x2f3   : > { %1816 = vtanh.f32 %v1193_v57  ;;  %v1245_v57 = vld [vmem:[#allocation14 + $0x98] sm:$0xff] (%p855_p0) }
 0x2f7   : > { %v1809_v45 = vpop.eup %1808 }
 0x2f8   : > { %v1040_v62 = vmul.f32 %v1809_v45, %v1807_v56   ;;  %v1690_v56 = vpack.c.bf16 (%p855_p0), %v1243_v51, %v1242_v60  ;;  %v1244_v45 = vld [vmem:[#allocation14 + $0x90] sm:$0xff] (%p855_p0) }
 0x2fa   : > { %v1811_v50 = vpop.eup %1810  ;;  %1221 = vst [vmem:[%s1220_s23] sm:$0xff] %v1040_v62  ;;  %1691 = vmatprep.subr.bf16.mxu0 (%p855_p0), %v1690_v56  ;;  %1722 = vmatprep.subr.bf16.mxu1 (%p855_p0), %v1690_v56 }
 0x2fb   : > { %v1813_v41 = vpop.eup %1812  ;;  %v1203_v2 = vadd.f32 1.0, %v1811_v50  ;;  %v1692_v50 = vpack.c.bf16 (%p855_p0), %v1227_v0, %v1226_v55  ;;  %v1485_v55 = vld [vmem:[#allocation16] ss:$0 sm:$0xff] (%p855_p0) }
 0x2fc   : > { %v1204_v49 = vadd.f32 1.0, %v1813_v41  ;;  %v1815_v47 = vpop.eup %1814  ;;  %v1694_v41 = vpack.c.bf16 (%p855_p0), %v1245_v57, %v1244_v45 }
 0x2fd   : > { %1818 = vrcp.f32 %v1203_v2  ;;  %v1817_v44 = vpop.eup %1816  ;;  %v1205_v52 = vadd.f32 1.0, %v1815_v47  ;;  %v1228_v2 = vld [vmem:[#allocation14 + $0x10] sm:$0xff] (%p855_p0)  ;;  %v1246_v47 = vld [vmem:[#allocation14 + $0xa0] sm:$0xff] (%p855_p0)  ;;  %1693 = vmatpush3.bf16.msra.mxu0 (%p855_p0), %v1692_v50  ;;  %1730 = vmatpush3.bf16.msra.mxu1 (%p855_p0), %v1692_v50 }
 0x2fe   : > { %1820 = vrcp.f32 %v1204_v49  ;;  %v1229_v49 = vld [vmem:[#allocation14 + $0x18] sm:$0xff] (%p855_p0)  ;;  %1695 = vmatprep.subr.bf16.mxu0 (%p855_p0), %v1694_v41  ;;  %1723 = vmatprep.subr.bf16.mxu1 (%p855_p0), %v1694_v41 }
 0x2ff   : > { %1822 = vrcp.f32 %v1205_v52  ;;  %v1696_v62 = vpack.c.bf16 (%p855_p0), %v1229_v49, %v1228_v2 }
 0x301   :  { %1697 = vmatpush3.bf16.msra.mxu0 (%p855_p0), %v1696_v62  ;;  %1731 = vmatpush3.bf16.msra.mxu1 (%p855_p0), %v1696_v62 }
 0x307   : > { %v1819_v63 = vpop.eup %1818 }
 0x308   : > { %v1821_v58 = vpop.eup %1820  ;;  %v1214_v43 = vmul.f32 %v1819_v63, %v1817_v44  ;;  %v1247_v44 = vld [vmem:[#allocation14 + $0xa8] sm:$0xff] (%p855_p0) }
 0x309   : > { %v1213_v61 = vmul.f32 %v2034_v48, %v1821_v58  ;;  %v1823_v59 = vpop.eup %1822  ;;  %v1698_v3 = vpack.c.bf16 (%p855_p0), %v1247_v44, %v1246_v47 }
 0x30b   : > { %v1215_v48 = vadd.f32 %v1214_v43, %v1213_v61   ;;  %1699 = vmatprep.subr.bf16.mxu0 (%p855_p0), %v1698_v3  ;;  %1724 = vmatprep.subr.bf16.mxu1 (%p855_p0), %v1698_v3 }
 0x30c   :  { %1701 = vmatpush3.bf16.msra.mxu0 (%p855_p0), %v1700_v8  ;;  %1732 = vmatpush3.bf16.msra.mxu1 (%p855_p0), %v1700_v8 }
 0x30d   : > { %1824 = vtanh.f32 %v1215_v48  ;;  %1703 = vmatprep.subr.bf16.mxu0 (%p855_p0), %v1702_v9  ;;  %1725 = vmatprep.subr.bf16.mxu1 (%p855_p0), %v1702_v9 }
 0x310   :  { %1705 = vmatpush3.bf16.msra.mxu0 (%p855_p0), %v1704_v16  ;;  %1733 = vmatpush3.bf16.msra.mxu1 (%p855_p0), %v1704_v16 }
 0x311   :  { %1707 = vmatprep.subr.bf16.mxu0 (%p855_p0), %v1706_v17  ;;  %1726 = vmatprep.subr.bf16.mxu1 (%p855_p0), %v1706_v17 }
 0x314   :  { %857 = sbr.rel (!%p855_p0) target bundleno = 469 (0x1d5), region = 87  ;;  %1709 = vmatpush3.bf16.msra.mxu0 (%p855_p0), %v1708_v22  ;;  %1734 = vmatpush3.bf16.msra.mxu1 (%p855_p0), %v1708_v22 }
 0x315   :  { %1711 = vmatprep.subr.bf16.mxu0 (%p855_p0), %v1710_v23  ;;  %1727 = vmatprep.subr.bf16.mxu1 (%p855_p0), %v1710_v23 }
 0x317   : > { %v1825_v1 = vpop.eup %1824 }
 0x318   : > { %v1217_v53 = vmul.f32 %v1825_v1, %v1823_v59   ;;  %1713 = vmatpush3.bf16.msra.mxu0 (%p855_p0), %v1712_v28  ;;  %1735 = vmatpush3.bf16.msra.mxu1 (%p855_p0), %v1712_v28 }
 0x319   :  { %1715 = vmatprep.subr.bf16.mxu0 (%p855_p0), %v1714_v29  ;;  %1728 = vmatprep.subr.bf16.mxu1 (%p855_p0), %v1714_v29 }
 0x31a   : > { %1225 = vst [vmem:[%s1224_s26 + $0x8] sm:$0xff] %v1217_v53 }
 0x31c   :  { %1717 = vmatpush3.bf16.msra.mxu0 %v1716_v34  ;;  %1736 = vmatpush3.bf16.msra.mxu1 %v1716_v34 }
 0x31d   :  { %1719 = vmatprep.subr.bf16.mxu0 %v1718_v35  ;;  %1729 = vmatprep.subr.bf16.mxu1 %v1718_v35 }
 0x320   :  { %1721 = vmatpush3.bf16.msra.mxu0 %v1720_v38  ;;  %1737 = vmatpush3.bf16.msra.mxu1 %v1720_v38 }
 0x321   :  { %v1260_v14 = vld [vmem:[#allocation4 + $0x8] sm:$0xff]  ;;  %v1259_v39 = vld [vmem:[#allocation4] sm:$0xff]  ;;  %v1262_v42 = vld [vmem:[#allocation4 + $0x18] sm:$0xff] }
 0x322   :  { %1345 = vmatprep.mubr.f32.mxu0 %v1260_v14  ;;  %v1268_v15 = vld [vmem:[#allocation4 + $0x48] sm:$0xff]  ;;  %v1267_v40 = vld [vmem:[#allocation4 + $0x40] sm:$0xff]  ;;  %v1270_v46 = vld [vmem:[#allocation4 + $0x58] sm:$0xff] }
 0x323   :  { %1365 = vmatprep.mubr.f32.mxu1 %v1268_v15  ;;  %1346 = vmatmul.mubr.f32.vlgmr.msra.gmra.mrb[0].mxu0 %v1259_v39  ;;  %v1261_v48 = vld [vmem:[#allocation4 + $0x10] sm:$0xff]  ;;  %v1264_v53 = vld [vmem:[#allocation4 + $0x28] sm:$0xff]  ;;  %v1263_v52 = vld [vmem:[#allocation4 + $0x20] sm:$0xff] }
 0x324   :  { %1366 = vmatmul.mubr.f32.vlgmr.msra.gmra.mrb[0].mxu1 %v1267_v40  ;;  %1350 = vmatprep.mubr.f32.mxu0 %v1262_v42  ;;  %v1269_v54 = vld [vmem:[#allocation4 + $0x50] sm:$0xff]  ;;  %v1272_v63 = vld [vmem:[#allocation4 + $0x68] sm:$0xff]  ;;  %v1271_v58 = vld [vmem:[#allocation4 + $0x60] sm:$0xff] }
 0x325   :  { %1370 = vmatprep.mubr.f32.mxu1 %v1270_v46  ;;  %v1266_v43 = vld [vmem:[#allocation4 + $0x38] sm:$0xff]  ;;  %v1265_v59 = vld [vmem:[#allocation4 + $0x30] sm:$0xff] }
 0x326   :  { %v1274_v61 = vld [vmem:[#allocation4 + $0x78] sm:$0xff]  ;;  %v1273_v1 = vld [vmem:[#allocation4 + $0x70] sm:$0xff] }
 0x327   :  { %1351 = vmatmul.mubr.f32.gmra.mrb[2].mxu0 %v1261_v48 }
 0x328   :  { %1371 = vmatmul.mubr.f32.gmra.mrb[2].mxu1 %v1269_v54  ;;  %1355 = vmatprep.mubr.f32.mxu0 %v1264_v53 }
 0x329   :  { %1375 = vmatprep.mubr.f32.mxu1 %v1272_v63 }
 0x32b   :  { %1356 = vmatmul.mubr.f32.gmra.mrb[4].mxu0 %v1263_v52 }
 0x32c   :  { %1376 = vmatmul.mubr.f32.gmra.mrb[4].mxu1 %v1271_v58  ;;  %1360 = vmatprep.mubr.f32.mxu0 %v1266_v43 }
 0x32d   :  { %1380 = vmatprep.mubr.f32.mxu1 %v1274_v61 }
 0x32f   :  { %1361 = vmatmul.mubr.f32.gmra.mrb[6].mxu0 %v1265_v59 }
 0x330   :  { %1381 = vmatmul.mubr.f32.gmra.mrb[6].mxu1 %v1273_v1 }
 0x3f6   :  { %v1522_v60 = vpop.f32.mrb[0].mxu0 }
 0x3f7   :  { %v1534_v51 = vpop.f32.mrb[0].mxu1  ;;  %v1523_v56 = vpop.f32.mrb[1].mxu0 }
 0x3f8   :  { %v1535_v0 = vpop.f32.mrb[1].mxu1  ;;  %v1524_v45 = vadd.f32 %v1523_v56, %v1522_v60 }
 0x3f9   :  { %v1536_v57 = vadd.f32 %v1535_v0, %v1534_v51 }
 0x3fa   :  { %v1348_v50 = vadd.f32 %v1524_v45, %v1485_v55  ;;  %v1525_v2 = vpop.f32.mrb[2].mxu0 }
 0x3fb   :  { %v1368_v41 = vadd.f32 %v1536_v57, %v1485_v55  ;;  %v1537_v49 = vpop.f32.mrb[2].mxu1  ;;  %v1526_v47 = vpop.f32.mrb[3].mxu0 }
 0x3fc   :  { %v1538_v44 = vpop.f32.mrb[3].mxu1  ;;  %1386 = vst [vmem:[#allocation17] sm:$0xff] %v1348_v50  ;;  %v1527_v62 = vadd.f32 %v1526_v47, %v1525_v2 }
 0x3fd   :  { %1390 = vst [vmem:[#allocation17 + $0x20] sm:$0xff] %v1368_v41  ;;  %v1539_v3 = vadd.f32 %v1538_v44, %v1537_v49 }
 0x3fe   :  { %v1353_v4 = vadd.f32 %v1527_v62, %v1485_v55  ;;  %v1528_v6 = vpop.f32.mrb[4].mxu0 }
 0x3ff   :  { %v1373_v5 = vadd.f32 %v1539_v3, %v1485_v55  ;;  %v1540_v7 = vpop.f32.mrb[4].mxu1  ;;  %v1529_v8 = vpop.f32.mrb[5].mxu0 }
 0x400   :  { %v1541_v9 = vpop.f32.mrb[5].mxu1  ;;  %1387 = vst [vmem:[#allocation17 + $0x8] sm:$0xff] %v1353_v4  ;;  %v1530_v10 = vadd.f32 %v1529_v8, %v1528_v6 }
 0x401   :  { %1391 = vst [vmem:[#allocation17 + $0x28] sm:$0xff] %v1373_v5  ;;  %v1542_v11 = vadd.f32 %v1541_v9, %v1540_v7 }
 0x402   :  { %v1358_v12 = vadd.f32 %v1530_v10, %v1485_v55  ;;  %v1531_v14 = vpop.f32.mrb[6].mxu0 }
 0x403   :  { %v1378_v13 = vadd.f32 %v1542_v11, %v1485_v55  ;;  %v1543_v15 = vpop.f32.mrb[6].mxu1  ;;  %v1532_v16 = vpop.f32.mrb[7].mxu0 }
 0x404   :  { %v1544_v17 = vpop.f32.mrb[7].mxu1  ;;  %1388 = vst [vmem:[#allocation17 + $0x10] sm:$0xff] %v1358_v12  ;;  %v1533_v18 = vadd.f32 %v1532_v16, %v1531_v14 }
 0x405   :  { %1392 = vst [vmem:[#allocation17 + $0x30] sm:$0xff] %v1378_v13  ;;  %v1545_v19 = vadd.f32 %v1544_v17, %v1543_v15 }
 0x406   :  { %v1363_v20 = vadd.f32 %v1533_v18, %v1485_v55 }
 0x407   :  { %v1383_v21 = vadd.f32 %v1545_v19, %v1485_v55 }
 0x408   :  { %1389 = vst [vmem:[#allocation17 + $0x18] sm:$0xff] %v1363_v20 }
 0x409   :  { %1393 = vst [vmem:[#allocation17 + $0x38] sm:$0xff] %v1383_v21 }
 0x40a   :  { %1991 = shalt.err (!%p1988_p5)
}
 0x40b   :  { %s1992_s30 = scalar_lea.hbm %s2847_s7, 1024 }
 0x40c   :  { %p1993_p6 = scmp.ne.s32.totalorder %s2847_s7, %s1992_s30  ;;  %p1996_p7 = scmp.lt.u32.totalorder %s1992_s30, %s2847_s7 }
 0x40e   :  { %p1998_p8 = pnand %p1996_p7, %p1993_p6 }
 0x410   :  { %2001 = shalt.err (!%p1998_p8)
}
 0x411   :  { %1405 = dma.vmem_to_hbm [thread:$0]  %s1400_s28, 1024, %s2847_s7, [#allocation7], %s2060_s16, %s2060_s16, %s2061_s17  }
 0x412   :  { %2030 = dma.done.wait [#allocation7], 1024  }
 0x413   :  { %2031 = vsyncadd [#allocation7], 4294966272 }
 0x414   :  { %1409 = vsyncpa [#allocation6], 1 }
 0x415   :  { %1410 = vsyncpa [#allocation9], 1 }
 0x416   :  { %1411 = vsyncpa [#allocation12], 1 }
 0x417   :  { %1412 = vsyncpa [#allocation15], 1 }
 0x418   :  { %1413 = vsyncpa [#allocation7], 1 }

</bundles_post_ra>
